<compile_context>
chip_gen: v7x
topology: tpu7x:2x2x1
jax: 0.10.0
libtpu: 0.0.40
codegen_flags: <defaults>
</compile_context>

<pallas_src>
import jax
import jax.numpy as jnp
from jax.experimental import pallas as pl
from jax.experimental.pallas import tpu as pltpu

NEG_SLOPE = 0.01          # F.leaky_relu default negative_slope
LANE = 128                # TPU lane width
MAX_TILE_B = 4096         # bounds (tile_b, 128) fp32 temporaries (~2 MiB each); not VMEM-critical
MIN_PALLAS_BATCH = 4096   # below this, a single XLA fusion beats pallas_call launch + HBM round trip


def _round_up(n, m):
    return ((n + m - 1) // m) * m


def _leaky_relu(v):
    # Valid because NEG_SLOPE < 1: max(v, s*v) == (v if v > 0 else s*v).
    return jnp.maximum(v, NEG_SLOPE * v)


def _num_tensorcores():
    """Best-effort TensorCores per device (2 on v7x, 1 on v5e/v6e)."""
    try:
        return max(1, int(getattr(jax.devices()[0], "num_cores", 1)))
    except Exception:
        return 1


def _make_kernel(n_features, n_output, fma_first_layer):
    def kernel(x_ref, w0_ref, b0_ref, w1_ref, b1_ref, w2_ref, b2_ref, o_ref):
        x = x_ref[...]
        if fma_first_layer:
            # K == n_features is tiny: broadcast FMAs on the VPU instead of a nearly
            # empty MXU pass (and its result-FIFO latency).
            w0 = w0_ref[...]
            h0 = x[:, 0:1] * w0[0:1, :]
            for k in range(1, n_features):
                h0 = h0 + x[:, k:k + 1] * w0[k:k + 1, :]
            h0 = h0 + b0_ref[...]
        else:
            h0 = jnp.dot(x, w0_ref[...], preferred_element_type=jnp.float32) + b0_ref[...]
        h0 = _leaky_relu(h0)
        h1 = _leaky_relu(
            jnp.dot(h0, w1_ref[...], preferred_element_type=jnp.float32) + b1_ref[...])
        y = jnp.dot(h1, w2_ref[...], preferred_element_type=jnp.float32) + b2_ref[...]
        # Store only the real output columns -> HBM write is (tile_b, n_output), not
        # (tile_b, 128); the padded lanes never leave VMEM.
        o_ref[...] = y[:, :n_output].astype(o_ref.dtype)
    return kernel


def init_params(key, n_features, n_hidden_0, n_hidden_1, n_output):
    """torch.nn.Linear-style init (uniform +/- 1/sqrt(fan_in)); weights stored (in, out)."""
    ks = jax.random.split(key, 6)

    def lin(kw, kb, fan_in, fan_out):
        bound = 1.0 / jnp.sqrt(float(fan_in))
        w = jax.random.uniform(kw, (fan_in, fan_out), jnp.float32, -bound, bound)
        b = jax.random.uniform(kb, (1, fan_out), jnp.float32, -bound, bound)
        return w, b

    w0, b0 = lin(ks[0], ks[1], n_features, n_hidden_0)
    w1, b1 = lin(ks[2], ks[3], n_hidden_0, n_hidden_1)
    w2, b2 = lin(ks[4], ks[5], n_hidden_1, n_output)
    return (w0, b0, w1, b1, w2, b2)


def pack_params(params):
    """Zero-pad hidden/output feature dims to multiples of 128 lanes so every matmul is
    lane-full (exact: padded units carry zero weight + zero bias; leaky_relu(0) == 0).
    Everything stays fp32; the kernel slices the output back to n_output before storing."""
    w0, b0, w1, b1, w2, b2 = params
    h0p = _round_up(w0.shape[1], LANE)
    h1p = _round_up(w1.shape[1], LANE)
    op = _round_up(w2.shape[1], LANE)

    def pad2(a, rows, cols):
        return jnp.pad(a, ((0, rows - a.shape[0]), (0, cols - a.shape[1])))

    w0p = pad2(w0, w0.shape[0], h0p)
    b0p = pad2(b0, 1, h0p)
    w1p = pad2(w1, h0p, h1p)
    b1p = pad2(b1, 1, h1p)
    w2p = pad2(w2, h1p, op)
    b2p = pad2(b2, 1, op)
    return (w0p, b0p, w1p, b1p, w2p, b2p)


def net_forward(x, packed_params, n_output, *, use_pallas=None):
    """Forward pass of Net. x: (B, n_features) fp32 -> (B, n_output) fp32."""
    w0, b0, w1, b1, w2, b2 = packed_params
    B, F = x.shape
    h0p, h1p, op = w0.shape[1], w1.shape[1], w2.shape[1]

    if use_pallas is None:
        use_pallas = B >= MIN_PALLAS_BATCH
    if not use_pallas:
        # Tiny batches: one XLA fusion, no pallas_call launch / forced HBM round trip.
        hp = jax.lax.Precision.HIGHEST
        h = _leaky_relu(jnp.dot(x, w0, precision=hp) + b0)
        h = _leaky_relu(jnp.dot(h, w1, precision=hp) + b1)
        return (jnp.dot(h, w2, precision=hp) + b2)[:, :n_output]

    # One batch tile per TensorCore; more tiles only if MAX_TILE_B forces it. VMEM is
    # ~1 MiB here, nowhere near binding on any chip, so tile size is chosen purely to
    # minimize per-grid-step overhead while letting v7x split the batch across its 2 TCs.
    n_tc = _num_tensorcores()
    b_req = _round_up(B, 8)
    tile_cap = min(MAX_TILE_B, b_req)
    n_tiles = max(n_tc, pl.cdiv(b_req, tile_cap))
    n_tiles = n_tc * pl.cdiv(n_tiles, n_tc)           # keep tile count balanced across cores
    tile_b = _round_up(pl.cdiv(b_req, n_tiles), 8)
    b_pad = tile_b * n_tiles
    if b_pad != B:
        x = jnp.pad(x, ((0, b_pad - B), (0, 0)))

    kernel = _make_kernel(F, n_output, fma_first_layer=F <= 8)
    out = pl.pallas_call(
        kernel,
        out_shape=jax.ShapeDtypeStruct((b_pad, n_output), jnp.float32),
        grid=(n_tiles,),
        in_specs=[
            pl.BlockSpec((tile_b, F), lambda i: (i, 0)),     # x: tiled along batch
            pl.BlockSpec((F, h0p), lambda i: (0, 0)),        # weights/biases: VMEM-resident
            pl.BlockSpec((1, h0p), lambda i: (0, 0)),
            pl.BlockSpec((h0p, h1p), lambda i: (0, 0)),
            pl.BlockSpec((1, h1p), lambda i: (0, 0)),
            pl.BlockSpec((h1p, op), lambda i: (0, 0)),
            pl.BlockSpec((1, op), lambda i: (0, 0)),
        ],
        # Output at its true width (block last dim == full array dim): no padded lanes in HBM.
        out_specs=pl.BlockSpec((tile_b, n_output), lambda i: (i, 0)),
        compiler_params=pltpu.CompilerParams(
            dimension_semantics=("parallel",)),              # lets dual-TC v7x split the batch
    )(x, w0, b0, w1, b1, w2, b2)
    return out[:B]


def ref_forward(x, params):
    """Pure-JAX fp32 reference mirroring the PyTorch Net math."""
    w0, b0, w1, b1, w2, b2 = params
    hp = jax.lax.Precision.HIGHEST
    h = jnp.dot(x, w0, precision=hp) + b0
    h = jnp.where(h > 0, h, NEG_SLOPE * h)
    h = jnp.dot(h, w1, precision=hp) + b1
    h = jnp.where(h > 0, h, NEG_SLOPE * h)
    return jnp.dot(h, w2, precision=hp) + b2


if __name__ == "__main__":
    key = jax.random.PRNGKey(0)
    # Shapes implied by the original script: 2000-point, 1-feature regression, 32/32 hidden, 1 output.
    B, n_features, n_hidden_0, n_hidden_1, n_output = 2000, 1, 32, 32, 1

    _, kp = jax.random.split(key)
    # linspace input (scaled to O(1) so tolerances are meaningful).
    x = jnp.linspace(-1.0, 2.0, B, dtype=jnp.float32).reshape(B, n_features)
    params = init_params(kp, n_features, n_hidden_0, n_hidden_1, n_output)
    packed = pack_params(params)

    # Force the Pallas path (B=2000 is below MIN_PALLAS_BATCH, where the XLA fallback
    # would normally win) so the kernel itself is exercised.
    out = net_forward(x, packed, n_output, use_pallas=True)
    jax.block_until_ready(out)

    ref = ref_forward(x, params)
    assert out.shape == (B, n_output), out.shape
    max_err = float(jnp.max(jnp.abs(out - ref)))
    assert jnp.allclose(out, ref, atol=1e-4, rtol=1e-4), max_err

    # Sanity-check the small-batch XLA fallback agrees too.
    out_xla = net_forward(x, packed, n_output, use_pallas=False)
    assert jnp.allclose(out_xla, ref, atol=1e-4, rtol=1e-4)

    print("KERNEL_OK")
</pallas_src>

<mosaic_0001>
module attributes {stable_mosaic.version = 11 : i64} {
  func.func @kernel(%arg0: i32, %arg1: memref<2000x1xf32, #tpu.memory_space<vmem>>, %arg2: memref<1x128xf32, #tpu.memory_space<vmem>>, %arg3: memref<1x128xf32, #tpu.memory_space<vmem>>, %arg4: memref<128x128xf32, #tpu.memory_space<vmem>>, %arg5: memref<1x128xf32, #tpu.memory_space<vmem>>, %arg6: memref<128x128xf32, #tpu.memory_space<vmem>>, %arg7: memref<1x128xf32, #tpu.memory_space<vmem>>, %arg8: memref<2000x1xf32, #tpu.memory_space<vmem>>) attributes {dimension_semantics = [#tpu.dimension_semantics<parallel>], iteration_bounds = array<i64: 1>, scalar_prefetch = 0 : i64, scratch_operands = 0 : i64, tpu.core_type = #tpu.core_type<tc>, window_params = [{transform_indices = @transform_0, window_bounds = array<i64: 2000, 1>}, {pipeline_mode = #tpu.pipeline_mode<synchronous>, transform_indices = @transform_1, window_bounds = array<i64: 1, 128>}, {pipeline_mode = #tpu.pipeline_mode<synchronous>, transform_indices = @transform_2, window_bounds = array<i64: 1, 128>}, {pipeline_mode = #tpu.pipeline_mode<synchronous>, transform_indices = @transform_3, window_bounds = array<i64: 128, 128>}, {pipeline_mode = #tpu.pipeline_mode<synchronous>, transform_indices = @transform_4, window_bounds = array<i64: 1, 128>}, {pipeline_mode = #tpu.pipeline_mode<synchronous>, transform_indices = @transform_5, window_bounds = array<i64: 128, 128>}, {pipeline_mode = #tpu.pipeline_mode<synchronous>, transform_indices = @transform_6, window_bounds = array<i64: 1, 128>}, {transform_indices = @transform_7, window_bounds = array<i64: 2000, 1>}]} {
    %c0 = arith.constant 0 : index
    %c0_0 = arith.constant 0 : index
    %0 = vector.load %arg1[%c0, %c0_0] : memref<2000x1xf32, #tpu.memory_space<vmem>>, vector<2000x1xf32>
    %c0_1 = arith.constant 0 : index
    %c0_2 = arith.constant 0 : index
    %1 = vector.load %arg2[%c0_1, %c0_2] : memref<1x128xf32, #tpu.memory_space<vmem>>, vector<1x128xf32>
    %2 = vector.broadcast %0 : vector<2000x1xf32> to vector<2000x128xf32>
    %3 = vector.broadcast %1 : vector<1x128xf32> to vector<2000x128xf32>
    %4 = arith.mulf %2, %3 : vector<2000x128xf32>
    %c0_3 = arith.constant 0 : index
    %c0_4 = arith.constant 0 : index
    %5 = vector.load %arg3[%c0_3, %c0_4] : memref<1x128xf32, #tpu.memory_space<vmem>>, vector<1x128xf32>
    %6 = vector.broadcast %5 : vector<1x128xf32> to vector<2000x128xf32>
    %7 = arith.addf %4, %6 : vector<2000x128xf32>
    %cst = arith.constant 0.00999999977 : f32
    %8 = vector.broadcast %cst : f32 to vector<2000x128xf32>
    %9 = arith.mulf %8, %7 : vector<2000x128xf32>
    %10 = arith.maximumf %7, %9 : vector<2000x128xf32>
    %c0_5 = arith.constant 0 : index
    %c0_6 = arith.constant 0 : index
    %11 = vector.load %arg4[%c0_5, %c0_6] : memref<128x128xf32, #tpu.memory_space<vmem>>, vector<128x128xf32>
    %cst_7 = arith.constant dense<0.000000e+00> : vector<2000x128xf32>
    %12 = tpu.matmul %10, %11, %cst_7 {dimension_numbers = #tpu.dot_dimension_numbers<[1], [0], [0], [1], [0, 0, 1, 1], [], []>} : vector<2000x128xf32>, vector<128x128xf32>, vector<2000x128xf32> -> vector<2000x128xf32>
    %c0_8 = arith.constant 0 : index
    %c0_9 = arith.constant 0 : index
    %13 = vector.load %arg5[%c0_8, %c0_9] : memref<1x128xf32, #tpu.memory_space<vmem>>, vector<1x128xf32>
    %14 = vector.broadcast %13 : vector<1x128xf32> to vector<2000x128xf32>
    %15 = arith.addf %12, %14 : vector<2000x128xf32>
    %cst_10 = arith.constant 0.00999999977 : f32
    %16 = vector.broadcast %cst_10 : f32 to vector<2000x128xf32>
    %17 = arith.mulf %16, %15 : vector<2000x128xf32>
    %18 = arith.maximumf %15, %17 : vector<2000x128xf32>
    %c0_11 = arith.constant 0 : index
    %c0_12 = arith.constant 0 : index
    %19 = vector.load %arg6[%c0_11, %c0_12] : memref<128x128xf32, #tpu.memory_space<vmem>>, vector<128x128xf32>
    %cst_13 = arith.constant dense<0.000000e+00> : vector<2000x128xf32>
    %20 = tpu.matmul %18, %19, %cst_13 {dimension_numbers = #tpu.dot_dimension_numbers<[1], [0], [0], [1], [0, 0, 1, 1], [], []>} : vector<2000x128xf32>, vector<128x128xf32>, vector<2000x128xf32> -> vector<2000x128xf32>
    %c0_14 = arith.constant 0 : index
    %c0_15 = arith.constant 0 : index
    %21 = vector.load %arg7[%c0_14, %c0_15] : memref<1x128xf32, #tpu.memory_space<vmem>>, vector<1x128xf32>
    %22 = vector.broadcast %21 : vector<1x128xf32> to vector<2000x128xf32>
    %23 = arith.addf %20, %22 : vector<2000x128xf32>
    %24 = vector.extract_strided_slice %23 {offsets = [0, 0], sizes = [2000, 1], strides = [1, 1]} : vector<2000x128xf32> to vector<2000x1xf32>
    %c0_16 = arith.constant 0 : index
    %c0_17 = arith.constant 0 : index
    %25 = vector.load %arg8[%c0_16, %c0_17] : memref<2000x1xf32, #tpu.memory_space<vmem>>, vector<2000x1xf32>
    tpu.vector_store %arg8[%c0_16, %c0_17], %24 {strides = array<i32>} : memref<2000x1xf32, #tpu.memory_space<vmem>>, vector<2000x1xf32>,
    return
  }
  func.func @transform_0(%arg0: i32) -> (i32, i32) {
    %c0_i32 = arith.constant 0 : i32
    %c0_i32_0 = arith.constant 0 : i32
    return %arg0, %c0_i32 : i32, i32
  }
  func.func @transform_1(%arg0: i32) -> (i32, i32) {
    %c0_i32 = arith.constant 0 : i32
    %c0_i32_0 = arith.constant 0 : i32
    %c0_i32_1 = arith.constant 0 : i32
    return %c0_i32, %c0_i32_0 : i32, i32
  }
  func.func @transform_2(%arg0: i32) -> (i32, i32) {
    %c0_i32 = arith.constant 0 : i32
    %c0_i32_0 = arith.constant 0 : i32
    %c0_i32_1 = arith.constant 0 : i32
    return %c0_i32, %c0_i32_0 : i32, i32
  }
  func.func @transform_3(%arg0: i32) -> (i32, i32) {
    %c0_i32 = arith.constant 0 : i32
    %c0_i32_0 = arith.constant 0 : i32
    %c0_i32_1 = arith.constant 0 : i32
    return %c0_i32, %c0_i32_0 : i32, i32
  }
  func.func @transform_4(%arg0: i32) -> (i32, i32) {
    %c0_i32 = arith.constant 0 : i32
    %c0_i32_0 = arith.constant 0 : i32
    %c0_i32_1 = arith.constant 0 : i32
    return %c0_i32, %c0_i32_0 : i32, i32
  }
  func.func @transform_5(%arg0: i32) -> (i32, i32) {
    %c0_i32 = arith.constant 0 : i32
    %c0_i32_0 = arith.constant 0 : i32
    %c0_i32_1 = arith.constant 0 : i32
    return %c0_i32, %c0_i32_0 : i32, i32
  }
  func.func @transform_6(%arg0: i32) -> (i32, i32) {
    %c0_i32 = arith.constant 0 : i32
    %c0_i32_0 = arith.constant 0 : i32
    %c0_i32_1 = arith.constant 0 : i32
    return %c0_i32, %c0_i32_0 : i32, i32
  }
  func.func @transform_7(%arg0: i32) -> (i32, i32) {
    %c0_i32 = arith.constant 0 : i32
    %c0_i32_0 = arith.constant 0 : i32
    return %arg0, %c0_i32 : i32, i32
  }
}

</mosaic_0001>

<bundles_post_ra>
// kernel: tpu_custom_call.1
= control target key start
LH: loop header
LB: loop body
LE: loop exit
PB: predicated region body
PF: predicated region fallthrough
CT: control target
= control target key end

     0   :  { %v7406_v0 = vmov 0   ;;  %vm5716_vm0 = vcmask 7168   ;;  %s10759_s0 = inlined_call_operand.vmem [shape: f32[2000,1], index: 0, kind: input, shape index: {}]   ;;  %s10760_s3 = inlined_call_operand.vmem [shape: f32[128,128], index: 3, kind: input, shape index: {}]   ;;  %s10761_s1 = inlined_call_operand.vmem [shape: f32[1,128], index: 1, kind: input, shape index: {}]   ;;  %s10762_s2 = inlined_call_operand.vmem [shape: f32[1,128], index: 2, kind: input, shape index: {}]   ;;  %s10763_s5 = inlined_call_operand.vmem [shape: f32[128,128], index: 5, kind: input, shape index: {}]   ;;  %s10764_s4 = inlined_call_operand.vmem [shape: f32[1,128], index: 4, kind: input, shape index: {}]   ;;  %s10765_s6 = inlined_call_operand.vmem [shape: f32[1,128], index: 6, kind: input, shape index: {}]   ;;  %s10766_s7 = inlined_call_operand.vmem [shape: f32[2000,1], index: 7, kind: output, shape index: {}]  }
   0x1   :  { %7387 = vset.pattern.permute.xlu1 %v7406_v0  ;;  %7386 = vset.pattern.permute.xlu0 %v7406_v0  ;;  %v28_v1 = vld [vmem:[%s10759_s0 + $0x10] sm:$0xff]  ;;  %v26_v2 = vld [vmem:[%s10759_s0] sm:$0xff]  ;;  %v29_v3 = vld [vmem:[%s10759_s0 + $0x18] sm:$0xff] }
   0x2   :  { %289 = vperm.xlu1 %7387, %v28_v1   ;;  %279 = vperm.xlu0 %7386, %v26_v2   ;;  %v27_v4 = vld [vmem:[%s10759_s0 + $0x8] sm:$0xff]  ;;  %v30_v6 = vld [vmem:[%s10759_s0 + $0x20] sm:$0xff]  ;;  %v33_v7 = vld [vmem:[%s10759_s0 + $0x38] sm:$0xff] }
   0x3   :  { %v31_v5 = vld [vmem:[%s10759_s0 + $0x28] sm:$0xff]  ;;  %v32_v8 = vld [vmem:[%s10759_s0 + $0x30] sm:$0xff]  ;;  %v34_v10 = vld [vmem:[%s10759_s0 + $0x40] sm:$0xff] }
   0x4   :  { %v35_v9 = vld [vmem:[%s10759_s0 + $0x48] sm:$0xff]  ;;  %v37_v11 = vld [vmem:[%s10759_s0 + $0x58] sm:$0xff]  ;;  %v36_v12 = vld [vmem:[%s10759_s0 + $0x50] sm:$0xff] }
   0x5   :  { %v2540_v13 = vld [vmem:[%s10760_s3] sm:$0xff]  ;;  %v2541_v14 = vld [vmem:[%s10760_s3 + $0x8] sm:$0xff]  ;;  %v2542_v16 = vld [vmem:[%s10760_s3 + $0x10] sm:$0xff] }
   0x6   :  { %294 = vperm.xlu1 %7387, %v29_v3   ;;  %284 = vperm.xlu0 %7386, %v27_v4   ;;  %v7321_v15 = vpack.c.bf16 %v2541_v14, %v2540_v13  ;;  %v2543_v17 = vld [vmem:[%s10760_s3 + $0x18] sm:$0xff]  ;;  %v2544_v19 = vld [vmem:[%s10760_s3 + $0x20] sm:$0xff]  ;;  %v2545_v20 = vld [vmem:[%s10760_s3 + $0x28] sm:$0xff] }
   0x7   :  { %v7325_v18 = vpack.c.bf16 %v2543_v17, %v2542_v16  ;;  %v39_v21 = vld [vmem:[%s10759_s0 + $0x68] sm:$0xff]  ;;  %v38_v22 = vld [vmem:[%s10759_s0 + $0x60] sm:$0xff]  ;;  %v7329_v23 = vpack.c.bf16 %v2545_v20, %v2544_v19  ;;  %v2546_v24 = vld [vmem:[%s10760_s3 + $0x30] sm:$0xff] }
   0x8   :  { %7322 = vmatprep.subr.bf16.mxu0 %v7321_v15  ;;  %v2547_v25 = vld [vmem:[%s10760_s3 + $0x38] sm:$0xff]  ;;  %v40_v27 = vld [vmem:[%s10759_s0 + $0x70] sm:$0xff]  ;;  %v2548_v29 = vld [vmem:[%s10760_s3 + $0x40] sm:$0xff] }
   0x9   :  { %7324 = vmatpush3.bf16.msra.mxu0 %v7321_v15  ;;  %v41_v26 = vld [vmem:[%s10759_s0 + $0x78] sm:$0xff]  ;;  %v7333_v28 = vpack.c.bf16 %v2547_v25, %v2546_v24  ;;  %v2549_v30 = vld [vmem:[%s10760_s3 + $0x48] sm:$0xff]  ;;  %v42_v32 = vld [vmem:[%s10759_s0 + $0x80] sm:$0xff] }
   0xa   :  { %304 = vperm.xlu1 %7387, %v31_v5   ;;  %299 = vperm.xlu0 %7386, %v30_v6   ;;  %v43_v31 = vld [vmem:[%s10759_s0 + $0x88] sm:$0xff]  ;;  %v7337_v33 = vpack.c.bf16 %v2549_v30, %v2548_v29  ;;  %v2550_v34 = vld [vmem:[%s10760_s3 + $0x50] sm:$0xff]  ;;  %v2551_v35 = vld [vmem:[%s10760_s3 + $0x58] sm:$0xff] }
   0xb   :  { %7326 = vmatprep.subr.bf16.mxu0 %v7325_v18  ;;  %v45_v36 = vld [vmem:[%s10759_s0 + $0x98] sm:$0xff]  ;;  %v44_v37 = vld [vmem:[%s10759_s0 + $0x90] sm:$0xff]  ;;  %v7341_v38 = vpack.c.bf16 %v2551_v35, %v2550_v34  ;;  %v2552_v39 = vld [vmem:[%s10760_s3 + $0x60] sm:$0xff] }
   0xc   :  { %v2553_v40 = vld [vmem:[%s10760_s3 + $0x68] sm:$0xff]  ;;  %v46_v42 = vld [vmem:[%s10759_s0 + $0xa0] sm:$0xff]  ;;  %v2554_v44 = vld [vmem:[%s10760_s3 + $0x70] sm:$0xff] }
   0xd   :  { %7328 = vmatpush3.bf16.msra.mxu0 %v7325_v18  ;;  %v47_v41 = vld [vmem:[%s10759_s0 + $0xa8] sm:$0xff]  ;;  %v7345_v43 = vpack.c.bf16 %v2553_v40, %v2552_v39  ;;  %v2555_v45 = vld [vmem:[%s10760_s3 + $0x78] sm:$0xff]  ;;  %v48_v47 = vld [vmem:[%s10759_s0 + $0xb0] sm:$0xff] }
   0xe   :  { %314 = vperm.xlu1 %7387, %v33_v7   ;;  %309 = vperm.xlu0 %7386, %v32_v8   ;;  %v49_v46 = vld [vmem:[%s10759_s0 + $0xb8] sm:$0xff]  ;;  %v7349_v48 = vpack.c.bf16 %v2555_v45, %v2554_v44  ;;  %v51_v49 = vld [vmem:[%s10759_s0 + $0xc8] sm:$0xff]  ;;  %v50_v50 = vld [vmem:[%s10759_s0 + $0xc0] sm:$0xff] }
   0xf   :  { %7330 = vmatprep.subr.bf16.mxu0 %v7329_v23  ;;  %v53_v51 = vld [vmem:[%s10759_s0 + $0xd8] sm:$0xff]  ;;  %v52_v52 = vld [vmem:[%s10759_s0 + $0xd0] sm:$0xff]  ;;  %v55_v53 = vld [vmem:[%s10759_s0 + $0xe8] sm:$0xff] }
  0x10   :  { %v54_v54 = vld [vmem:[%s10759_s0 + $0xe0] sm:$0xff]  ;;  %v57_v55 = vld [vmem:[%s10759_s0 + $0xf8] sm:$0xff]  ;;  %v56_v56 = vld [vmem:[%s10759_s0 + $0xf0] sm:$0xff] }
  0x11   :  { %7332 = vmatpush3.bf16.msra.mxu0 %v7329_v23  ;;  %v59_v57 = vld [vmem:[%s10759_s0 + $0x108] sm:$0xff]  ;;  %v58_v58 = vld [vmem:[%s10759_s0 + $0x100] sm:$0xff]  ;;  %v61_v59 = vld [vmem:[%s10759_s0 + $0x118] sm:$0xff] }
  0x12   :  { %324 = vperm.xlu1 %7387, %v35_v9   ;;  %319 = vperm.xlu0 %7386, %v34_v10   ;;  %v60_v60 = vld [vmem:[%s10759_s0 + $0x110] sm:$0xff]  ;;  %v63_v61 = vld [vmem:[%s10759_s0 + $0x128] sm:$0xff]  ;;  %v62_v62 = vld [vmem:[%s10759_s0 + $0x120] sm:$0xff] }
  0x13   :  { %7334 = vmatprep.subr.bf16.mxu0 %v7333_v28  ;;  %v65_v63 = vld [vmem:[%s10759_s0 + $0x138] sm:$0xff]  ;;  %v64_v0 = vld [vmem:[%s10759_s0 + $0x130] sm:$0xff]  ;;  %v67_v1 = vld [vmem:[%s10759_s0 + $0x148] sm:$0xff] }
  0x14   :  { %v66_v2 = vld [vmem:[%s10759_s0 + $0x140] sm:$0xff]  ;;  %v69_v3 = vld [vmem:[%s10759_s0 + $0x158] sm:$0xff]  ;;  %v68_v4 = vld [vmem:[%s10759_s0 + $0x150] sm:$0xff] }
  0x15   :  { %7336 = vmatpush3.bf16.msra.mxu0 %v7333_v28  ;;  %v71_v5 = vld [vmem:[%s10759_s0 + $0x168] sm:$0xff]  ;;  %v70_v6 = vld [vmem:[%s10759_s0 + $0x160] sm:$0xff]  ;;  %v73_v7 = vld [vmem:[%s10759_s0 + $0x178] sm:$0xff] }
  0x16   :  { %334 = vperm.xlu1 %7387, %v37_v11   ;;  %329 = vperm.xlu0 %7386, %v36_v12   ;;  %v72_v8 = vld [vmem:[%s10759_s0 + $0x170] sm:$0xff]  ;;  %v75_v9 = vld [vmem:[%s10759_s0 + $0x188] sm:$0xff]  ;;  %v74_v10 = vld [vmem:[%s10759_s0 + $0x180] sm:$0xff] }
  0x17   :  { %7338 = vmatprep.subr.bf16.mxu0 %v7337_v33  ;;  %v77_v11 = vld [vmem:[%s10759_s0 + $0x198] sm:$0xff]  ;;  %v76_v12 = vld [vmem:[%s10759_s0 + $0x190] sm:$0xff]  ;;  %v79_v13 = vld [vmem:[%s10759_s0 + $0x1a8] sm:$0xff] }
  0x18   :  { %v78_v14 = vld [vmem:[%s10759_s0 + $0x1a0] sm:$0xff]  ;;  %v81_v15 = vld [vmem:[%s10759_s0 + $0x1b8] sm:$0xff]  ;;  %v80_v16 = vld [vmem:[%s10759_s0 + $0x1b0] sm:$0xff] }
  0x19   :  { %7340 = vmatpush3.bf16.msra.mxu0 %v7337_v33  ;;  %v83_v17 = vld [vmem:[%s10759_s0 + $0x1c8] sm:$0xff]  ;;  %v82_v18 = vld [vmem:[%s10759_s0 + $0x1c0] sm:$0xff]  ;;  %v85_v19 = vld [vmem:[%s10759_s0 + $0x1d8] sm:$0xff] }
  0x1a   :  { %344 = vperm.xlu1 %7387, %v39_v21   ;;  %339 = vperm.xlu0 %7386, %v38_v22   ;;  %v84_v20 = vld [vmem:[%s10759_s0 + $0x1d0] sm:$0xff]  ;;  %v87_v21 = vld [vmem:[%s10759_s0 + $0x1e8] sm:$0xff]  ;;  %v86_v22 = vld [vmem:[%s10759_s0 + $0x1e0] sm:$0xff] }
  0x1b   :  { %7342 = vmatprep.subr.bf16.mxu0 %v7341_v38  ;;  %v89_v23 = vld [vmem:[%s10759_s0 + $0x1f8] sm:$0xff]  ;;  %v88_v24 = vld [vmem:[%s10759_s0 + $0x1f0] sm:$0xff]  ;;  %v7690_v25 = vld [vmem:[%s10761_s1] ss:$0 sm:$0xff] }
  0x1c   :  { %v7701_v28 = vld [vmem:[%s10762_s2] ss:$0 sm:$0xff]  ;;  %v93_v33 = vld [vmem:[%s10759_s0 + $0x218] sm:$0xff]  ;;  %v92_v34 = vld [vmem:[%s10759_s0 + $0x210] sm:$0xff] }
  0x1d   :  { %7344 = vmatpush3.bf16.msra.mxu0 %v7341_v38 }
  0x1e   :  { %354 = vperm.xlu1 %7387, %v41_v26   ;;  %349 = vperm.xlu0 %7386, %v40_v27   ;;  %v91_v26 = vld [vmem:[%s10759_s0 + $0x208] sm:$0xff]  ;;  %v90_v27 = vld [vmem:[%s10759_s0 + $0x200] sm:$0xff] }
  0x1f   :  { %7346 = vmatprep.subr.bf16.mxu0 %v7345_v43 }
  0x21   :  { %7348 = vmatpush3.bf16.msra.mxu0 %v7345_v43  ;;  %v94_v43 = vld [vmem:[%s10759_s0 + $0x220] sm:$0xff] }
  0x22   :  { %364 = vperm.xlu1 %7387, %v43_v31   ;;  %359 = vperm.xlu0 %7386, %v42_v32  }
  0x23   :  { %7350 = vmatprep.subr.bf16.mxu0 %v7349_v48 }
  0x25   :  { %7352 = vmatpush3.bf16.msra.mxu0 %v7349_v48 }
  0x26   :  { %374 = vperm.xlu1 %7387, %v45_v36   ;;  %369 = vperm.xlu0 %7386, %v44_v37  }
  0x2a   :  { %384 = vperm.xlu1 %7387, %v47_v41   ;;  %379 = vperm.xlu0 %7386, %v46_v42   ;;  %v95_v42 = vld [vmem:[%s10759_s0 + $0x228] sm:$0xff] }
  0x2e   :  { %394 = vperm.xlu1 %7387, %v49_v46   ;;  %389 = vperm.xlu0 %7386, %v48_v47  }
  0x32   :  { %404 = vperm.xlu1 %7387, %v51_v49   ;;  %399 = vperm.xlu0 %7386, %v50_v50  }
  0x36   :  { %414 = vperm.xlu1 %7387, %v53_v51   ;;  %409 = vperm.xlu0 %7386, %v52_v52  }
  0x3a   :  { %424 = vperm.xlu1 %7387, %v55_v53   ;;  %419 = vperm.xlu0 %7386, %v54_v54   ;;  %v97_v53 = vld [vmem:[%s10759_s0 + $0x238] sm:$0xff]  ;;  %v96_v54 = vld [vmem:[%s10759_s0 + $0x230] sm:$0xff] }
  0x3e   :  { %434 = vperm.xlu1 %7387, %v57_v55   ;;  %429 = vperm.xlu0 %7386, %v56_v56  }
  0x42   :  { %444 = vperm.xlu1 %7387, %v59_v57   ;;  %439 = vperm.xlu0 %7386, %v58_v58  }
  0x46   :  { %454 = vperm.xlu1 %7387, %v61_v59   ;;  %449 = vperm.xlu0 %7386, %v60_v60  }
  0x4a   :  { %464 = vperm.xlu1 %7387, %v63_v61   ;;  %459 = vperm.xlu0 %7386, %v62_v62  }
  0x4e   :  { %474 = vperm.xlu1 %7387, %v65_v63   ;;  %469 = vperm.xlu0 %7386, %v64_v0  }
  0x52   :  { %484 = vperm.xlu1 %7387, %v67_v1   ;;  %479 = vperm.xlu0 %7386, %v66_v2   ;;  %v99_v1 = vld [vmem:[%s10759_s0 + $0x248] sm:$0xff]  ;;  %v98_v2 = vld [vmem:[%s10759_s0 + $0x240] sm:$0xff] }
  0x56   :  { %494 = vperm.xlu1 %7387, %v69_v3   ;;  %489 = vperm.xlu0 %7386, %v68_v4  }
  0x5a   :  { %504 = vperm.xlu1 %7387, %v71_v5   ;;  %499 = vperm.xlu0 %7386, %v70_v6  }
  0x5e   :  { %514 = vperm.xlu1 %7387, %v73_v7   ;;  %509 = vperm.xlu0 %7386, %v72_v8  }
  0x62   :  { %524 = vperm.xlu1 %7387, %v75_v9   ;;  %519 = vperm.xlu0 %7386, %v74_v10  }
  0x66   :  { %534 = vperm.xlu1 %7387, %v77_v11   ;;  %529 = vperm.xlu0 %7386, %v76_v12  }
  0x6a   :  { %544 = vperm.xlu1 %7387, %v79_v13   ;;  %539 = vperm.xlu0 %7386, %v78_v14   ;;  %v101_v13 = vld [vmem:[%s10759_s0 + $0x258] sm:$0xff]  ;;  %v100_v14 = vld [vmem:[%s10759_s0 + $0x250] sm:$0xff] }
  0x6e   :  { %554 = vperm.xlu1 %7387, %v81_v15   ;;  %549 = vperm.xlu0 %7386, %v80_v16  }
  0x72   :  { %564 = vperm.xlu1 %7387, %v83_v17   ;;  %559 = vperm.xlu0 %7386, %v82_v18  }
  0x76   :  { %574 = vperm.xlu1 %7387, %v85_v19   ;;  %569 = vperm.xlu0 %7386, %v84_v20  }
  0x7a   :  { %584 = vperm.xlu1 %7387, %v87_v21   ;;  %579 = vperm.xlu0 %7386, %v86_v22  }
  0x7e   :  { %594 = vperm.xlu1 %7387, %v89_v23   ;;  %589 = vperm.xlu0 %7386, %v88_v24  }
  0x81   :  { %v290_v29 = vpop.permute.xlu1 %289  ;;  %v280_v30 = vpop.permute.xlu0 %279 }
  0x82   :  { %v1535_v31 = vmul.f32 %v7690_v25, %v290_v29  ;;  %v1533_v32 = vmul.f32 %v7690_v25, %v280_v30  ;;  %604 = vperm.xlu1 %7387, %v91_v26   ;;  %599 = vperm.xlu0 %7386, %v90_v27   ;;  %v103_v26 = vld [vmem:[%s10759_s0 + $0x268] sm:$0xff]  ;;  %v102_v27 = vld [vmem:[%s10759_s0 + $0x260] sm:$0xff] }
  0x84   :  { %v1790_v35 = vadd.f32 %v7701_v28, %v1533_v32  ;;  %v1792_v38 = vadd.f32 %v7701_v28, %v1535_v31 }
  0x85   :  { %v295_v36 = vpop.permute.xlu1 %294  ;;  %v285_v37 = vpop.permute.xlu0 %284 }
  0x86   :  { %v1536_v39 = vmul.f32 %v7690_v25, %v295_v36  ;;  %v1534_v40 = vmul.f32 %v7690_v25, %v285_v37  ;;  %614 = vperm.xlu1 %7387, %v93_v33   ;;  %609 = vperm.xlu0 %7386, %v92_v34   ;;  %v2040_v41 = vmul.f32 0.01, %v1790_v35  ;;  %v2042_v49 = vmul.f32 0.01, %v1792_v38 }
  0x88   :  { %v1791_v44 = vadd.f32 %v7701_v28, %v1534_v40  ;;  %v2290_v45 = vmax.f32 %v1790_v35, %v2040_v41  ;;  %v1793_v46 = vadd.f32 %v7701_v28, %v1536_v39  ;;  %v2292_v0 = vmax.f32 %v1792_v38, %v2042_v49  ;;  %v105_v39 = vld [vmem:[%s10759_s0 + $0x278] sm:$0xff]  ;;  %v104_v40 = vld [vmem:[%s10759_s0 + $0x270] sm:$0xff] }
  0x89   :  { %v305_v47 = vpop.permute.xlu1 %304  ;;  %v300_v48 = vpop.permute.xlu0 %299 }
  0x8a   :  { %v2041_v50 = vmul.f32 0.01, %v1791_v44  ;;  %v1538_v51 = vmul.f32 %v7690_v25, %v305_v47  ;;  %v1537_v52 = vmul.f32 %v7690_v25, %v300_v48  ;;  %624 = vperm.xlu1 %7387, %v95_v42   ;;  %619 = vperm.xlu0 %7386, %v94_v43   ;;  %v2043_v57 = vmul.f32 0.01, %v1793_v46 }
  0x8b   :  { %6539 = vmatprep.mubr.f32.mxu0 %v2290_v45 }
  0x8c   :  { %v1794_v55 = vadd.f32 %v7701_v28, %v1537_v52  ;;  %v2291_v56 = vmax.f32 %v1791_v44, %v2041_v50  ;;  %v1795_v58 = vadd.f32 %v7701_v28, %v1538_v51  ;;  %v2293_v9 = vmax.f32 %v1793_v46, %v2043_v57  ;;  %v107_v51 = vld [vmem:[%s10759_s0 + $0x288] sm:$0xff]  ;;  %v106_v52 = vld [vmem:[%s10759_s0 + $0x280] sm:$0xff] }
  0x8d   :  { %v315_v59 = vpop.permute.xlu1 %314  ;;  %v310_v60 = vpop.permute.xlu0 %309 }
  0x8e   :  { %v2044_v61 = vmul.f32 0.01, %v1794_v55  ;;  %v1540_v62 = vmul.f32 %v7690_v25, %v315_v59  ;;  %v1539_v63 = vmul.f32 %v7690_v25, %v310_v60  ;;  %634 = vperm.xlu1 %7387, %v97_v53   ;;  %629 = vperm.xlu0 %7386, %v96_v54   ;;  %v2045_v5 = vmul.f32 0.01, %v1795_v58 }
  0x8f   :  { %6540 = vmatmul.mubr.f32.vlgmr.msra.gmra.mrb[0].mxu0 %v2291_v56 }
  0x90   :  { %v1796_v3 = vadd.f32 %v7701_v28, %v1539_v63  ;;  %6542 = vmatprep.mubr.f32.mxu0 %v2292_v0  ;;  %v2294_v4 = vmax.f32 %v1794_v55, %v2044_v61  ;;  %v1797_v6 = vadd.f32 %v7701_v28, %v1540_v62  ;;  %v2295_v21 = vmax.f32 %v1795_v58, %v2045_v5  ;;  %v109_v63 = vld [vmem:[%s10759_s0 + $0x298] sm:$0xff]  ;;  %v108_v0 = vld [vmem:[%s10759_s0 + $0x290] sm:$0xff] }
  0x91   :  { %v325_v7 = vpop.permute.xlu1 %324  ;;  %v320_v8 = vpop.permute.xlu0 %319 }
  0x92   :  { %v2046_v10 = vmul.f32 0.01, %v1796_v3  ;;  %v1542_v11 = vmul.f32 %v7690_v25, %v325_v7  ;;  %v1541_v12 = vmul.f32 %v7690_v25, %v320_v8  ;;  %644 = vperm.xlu1 %7387, %v99_v1   ;;  %639 = vperm.xlu0 %7386, %v98_v2   ;;  %v2047_v17 = vmul.f32 0.01, %v1797_v6 }
  0x93   :  { %6543 = vmatmul.mubr.f32.gmra.mrb[2].mxu0 %v2293_v9 }
  0x94   :  { %v1798_v15 = vadd.f32 %v7701_v28, %v1541_v12  ;;  %6545 = vmatprep.mubr.f32.mxu0 %v2294_v4  ;;  %v2296_v16 = vmax.f32 %v1796_v3, %v2046_v10  ;;  %v1799_v18 = vadd.f32 %v7701_v28, %v1542_v11  ;;  %v2297_v35 = vmax.f32 %v1797_v6, %v2047_v17  ;;  %v111_v11 = vld [vmem:[%s10759_s0 + $0x2a8] sm:$0xff]  ;;  %v110_v12 = vld [vmem:[%s10759_s0 + $0x2a0] sm:$0xff] }
  0x95   :  { %v335_v19 = vpop.permute.xlu1 %334  ;;  %v330_v20 = vpop.permute.xlu0 %329 }
  0x96   :  { %v2048_v22 = vmul.f32 0.01, %v1798_v15  ;;  %v1544_v23 = vmul.f32 %v7690_v25, %v335_v19  ;;  %v1543_v24 = vmul.f32 %v7690_v25, %v330_v20  ;;  %654 = vperm.xlu1 %7387, %v101_v13   ;;  %649 = vperm.xlu0 %7386, %v100_v14   ;;  %v2049_v31 = vmul.f32 0.01, %v1799_v18 }
  0x97   :  { %6546 = vmatmul.mubr.f32.gmra.mrb[4].mxu0 %v2295_v21 }
  0x98   :  { %v1800_v29 = vadd.f32 %v7701_v28, %v1543_v24  ;;  %6548 = vmatprep.mubr.f32.mxu0 %v2296_v16  ;;  %v2298_v30 = vmax.f32 %v1798_v15, %v2048_v22  ;;  %v1801_v32 = vadd.f32 %v7701_v28, %v1544_v23  ;;  %v2299_v47 = vmax.f32 %v1799_v18, %v2049_v31  ;;  %v113_v23 = vld [vmem:[%s10759_s0 + $0x2b8] sm:$0xff]  ;;  %v112_v24 = vld [vmem:[%s10759_s0 + $0x2b0] sm:$0xff] }
  0x99   :  { %v345_v33 = vpop.permute.xlu1 %344  ;;  %v340_v34 = vpop.permute.xlu0 %339 }
  0x9a   :  { %v2050_v36 = vmul.f32 0.01, %v1800_v29  ;;  %v1546_v37 = vmul.f32 %v7690_v25, %v345_v33  ;;  %v1545_v38 = vmul.f32 %v7690_v25, %v340_v34  ;;  %664 = vperm.xlu1 %7387, %v103_v26   ;;  %659 = vperm.xlu0 %7386, %v102_v27   ;;  %v2051_v43 = vmul.f32 0.01, %v1801_v32 }
  0x9b   :  { %6549 = vmatmul.mubr.f32.gmra.mrb[6].mxu0 %v2297_v35 }
  0x9c   :  { %v1802_v41 = vadd.f32 %v7701_v28, %v1545_v38  ;;  %6551 = vmatprep.mubr.f32.mxu0 %v2298_v30  ;;  %v2300_v42 = vmax.f32 %v1800_v29, %v2050_v36  ;;  %v1803_v44 = vadd.f32 %v7701_v28, %v1546_v37  ;;  %v2301_v59 = vmax.f32 %v1801_v32, %v2051_v43  ;;  %v115_v37 = vld [vmem:[%s10759_s0 + $0x2c8] sm:$0xff]  ;;  %v114_v38 = vld [vmem:[%s10759_s0 + $0x2c0] sm:$0xff] }
  0x9d   :  { %v355_v45 = vpop.permute.xlu1 %354  ;;  %v350_v46 = vpop.permute.xlu0 %349 }
  0x9e   :  { %v2052_v48 = vmul.f32 0.01, %v1802_v41  ;;  %v1548_v49 = vmul.f32 %v7690_v25, %v355_v45  ;;  %v1547_v50 = vmul.f32 %v7690_v25, %v350_v46  ;;  %674 = vperm.xlu1 %7387, %v105_v39   ;;  %669 = vperm.xlu0 %7386, %v104_v40   ;;  %v2053_v55 = vmul.f32 0.01, %v1803_v44 }
  0x9f   :  { %6552 = vmatmul.mubr.f32.gmra.mrb[8].mxu0 %v2299_v47 }
  0xa0   :  { %v1804_v53 = vadd.f32 %v7701_v28, %v1547_v50  ;;  %6554 = vmatprep.mubr.f32.mxu0 %v2300_v42  ;;  %v2302_v54 = vmax.f32 %v1802_v41, %v2052_v48  ;;  %v1805_v56 = vadd.f32 %v7701_v28, %v1548_v49  ;;  %v2303_v7 = vmax.f32 %v1803_v44, %v2053_v55  ;;  %v117_v49 = vld [vmem:[%s10759_s0 + $0x2d8] sm:$0xff]  ;;  %v116_v50 = vld [vmem:[%s10759_s0 + $0x2d0] sm:$0xff] }
  0xa1   :  { %v365_v57 = vpop.permute.xlu1 %364  ;;  %v360_v58 = vpop.permute.xlu0 %359 }
  0xa2   :  { %v2054_v60 = vmul.f32 0.01, %v1804_v53  ;;  %v1550_v61 = vmul.f32 %v7690_v25, %v365_v57  ;;  %v1549_v62 = vmul.f32 %v7690_v25, %v360_v58  ;;  %684 = vperm.xlu1 %7387, %v107_v51   ;;  %679 = vperm.xlu0 %7386, %v106_v52   ;;  %v2055_v3 = vmul.f32 0.01, %v1805_v56 }
  0xa3   :  { %6555 = vmatmul.mubr.f32.gmra.mrb[10].mxu0 %v2301_v59 }
  0xa4   :  { %v1806_v1 = vadd.f32 %v7701_v28, %v1549_v62  ;;  %6557 = vmatprep.mubr.f32.mxu0 %v2302_v54  ;;  %v2304_v2 = vmax.f32 %v1804_v53, %v2054_v60  ;;  %v1807_v4 = vadd.f32 %v7701_v28, %v1550_v61  ;;  %v2305_v19 = vmax.f32 %v1805_v56, %v2055_v3  ;;  %v119_v61 = vld [vmem:[%s10759_s0 + $0x2e8] sm:$0xff]  ;;  %v118_v62 = vld [vmem:[%s10759_s0 + $0x2e0] sm:$0xff] }
  0xa5   :  { %v375_v5 = vpop.permute.xlu1 %374  ;;  %v370_v6 = vpop.permute.xlu0 %369 }
  0xa6   :  { %v2056_v8 = vmul.f32 0.01, %v1806_v1  ;;  %v1552_v9 = vmul.f32 %v7690_v25, %v375_v5  ;;  %v1551_v10 = vmul.f32 %v7690_v25, %v370_v6  ;;  %694 = vperm.xlu1 %7387, %v109_v63   ;;  %689 = vperm.xlu0 %7386, %v108_v0   ;;  %v2057_v15 = vmul.f32 0.01, %v1807_v4 }
  0xa7   :  { %6558 = vmatmul.mubr.f32.gmra.mrb[12].mxu0 %v2303_v7 }
  0xa8   :  { %v1808_v13 = vadd.f32 %v7701_v28, %v1551_v10  ;;  %6560 = vmatprep.mubr.f32.mxu0 %v2304_v2  ;;  %v2306_v14 = vmax.f32 %v1806_v1, %v2056_v8  ;;  %v1809_v16 = vadd.f32 %v7701_v28, %v1552_v9  ;;  %v2307_v33 = vmax.f32 %v1807_v4, %v2057_v15  ;;  %v121_v9 = vld [vmem:[%s10759_s0 + $0x2f8] sm:$0xff]  ;;  %v120_v10 = vld [vmem:[%s10759_s0 + $0x2f0] sm:$0xff] }
  0xa9   :  { %v385_v17 = vpop.permute.xlu1 %384  ;;  %v380_v18 = vpop.permute.xlu0 %379 }
  0xaa   :  { %v2058_v20 = vmul.f32 0.01, %v1808_v13  ;;  %v1554_v21 = vmul.f32 %v7690_v25, %v385_v17  ;;  %v1553_v22 = vmul.f32 %v7690_v25, %v380_v18  ;;  %704 = vperm.xlu1 %7387, %v111_v11   ;;  %699 = vperm.xlu0 %7386, %v110_v12   ;;  %v2059_v29 = vmul.f32 0.01, %v1809_v16 }
  0xab   :  { %6561 = vmatmul.mubr.f32.gmra.mrb[14].mxu0 %v2305_v19 }
  0xac   :  { %v1810_v26 = vadd.f32 %v7701_v28, %v1553_v22  ;;  %6563 = vmatprep.mubr.f32.mxu0 %v2306_v14  ;;  %v2308_v27 = vmax.f32 %v1808_v13, %v2058_v20  ;;  %v1811_v30 = vadd.f32 %v7701_v28, %v1554_v21  ;;  %v2309_v45 = vmax.f32 %v1809_v16, %v2059_v29  ;;  %v123_v21 = vld [vmem:[%s10759_s0 + $0x308] sm:$0xff]  ;;  %v122_v22 = vld [vmem:[%s10759_s0 + $0x300] sm:$0xff] }
  0xad   :  { %v395_v31 = vpop.permute.xlu1 %394  ;;  %v390_v32 = vpop.permute.xlu0 %389 }
  0xae   :  { %v2060_v34 = vmul.f32 0.01, %v1810_v26  ;;  %v1556_v35 = vmul.f32 %v7690_v25, %v395_v31  ;;  %v1555_v36 = vmul.f32 %v7690_v25, %v390_v32  ;;  %714 = vperm.xlu1 %7387, %v113_v23   ;;  %709 = vperm.xlu0 %7386, %v112_v24   ;;  %v2061_v41 = vmul.f32 0.01, %v1811_v30 }
  0xaf   :  { %6564 = vmatmul.mubr.f32.gmra.mrb[16].mxu0 %v2307_v33 }
  0xb0   :  { %v1812_v39 = vadd.f32 %v7701_v28, %v1555_v36  ;;  %6566 = vmatprep.mubr.f32.mxu0 %v2308_v27  ;;  %v2310_v40 = vmax.f32 %v1810_v26, %v2060_v34  ;;  %v1813_v42 = vadd.f32 %v7701_v28, %v1556_v35  ;;  %v2311_v57 = vmax.f32 %v1811_v30, %v2061_v41  ;;  %v125_v35 = vld [vmem:[%s10759_s0 + $0x318] sm:$0xff]  ;;  %v124_v36 = vld [vmem:[%s10759_s0 + $0x310] sm:$0xff] }
  0xb1   :  { %v405_v43 = vpop.permute.xlu1 %404  ;;  %v400_v44 = vpop.permute.xlu0 %399 }
  0xb2   :  { %v2062_v46 = vmul.f32 0.01, %v1812_v39  ;;  %v1558_v47 = vmul.f32 %v7690_v25, %v405_v43  ;;  %v1557_v48 = vmul.f32 %v7690_v25, %v400_v44  ;;  %724 = vperm.xlu1 %7387, %v115_v37   ;;  %719 = vperm.xlu0 %7386, %v114_v38   ;;  %v2063_v53 = vmul.f32 0.01, %v1813_v42 }
  0xb3   :  { %6567 = vmatmul.mubr.f32.gmra.mrb[18].mxu0 %v2309_v45 }
  0xb4   :  { %v1814_v51 = vadd.f32 %v7701_v28, %v1557_v48  ;;  %6569 = vmatprep.mubr.f32.mxu0 %v2310_v40  ;;  %v2312_v52 = vmax.f32 %v1812_v39, %v2062_v46  ;;  %v1815_v54 = vadd.f32 %v7701_v28, %v1558_v47  ;;  %v2313_v5 = vmax.f32 %v1813_v42, %v2063_v53  ;;  %v127_v47 = vld [vmem:[%s10759_s0 + $0x328] sm:$0xff]  ;;  %v126_v48 = vld [vmem:[%s10759_s0 + $0x320] sm:$0xff] }
  0xb5   :  { %v415_v55 = vpop.permute.xlu1 %414  ;;  %v410_v56 = vpop.permute.xlu0 %409 }
  0xb6   :  { %v2064_v58 = vmul.f32 0.01, %v1814_v51  ;;  %v1560_v59 = vmul.f32 %v7690_v25, %v415_v55  ;;  %v1559_v60 = vmul.f32 %v7690_v25, %v410_v56  ;;  %734 = vperm.xlu1 %7387, %v117_v49   ;;  %729 = vperm.xlu0 %7386, %v116_v50   ;;  %v2065_v1 = vmul.f32 0.01, %v1815_v54 }
  0xb7   :  { %6570 = vmatmul.mubr.f32.gmra.mrb[20].mxu0 %v2311_v57 }
  0xb8   :  { %v1816_v63 = vadd.f32 %v7701_v28, %v1559_v60  ;;  %6572 = vmatprep.mubr.f32.mxu0 %v2312_v52  ;;  %v2314_v0 = vmax.f32 %v1814_v51, %v2064_v58  ;;  %v1817_v2 = vadd.f32 %v7701_v28, %v1560_v59  ;;  %v2315_v17 = vmax.f32 %v1815_v54, %v2065_v1  ;;  %v4378_v51 = vld [vmem:[%s10763_s5] sm:$0xff]  ;;  %v4379_v52 = vld [vmem:[%s10763_s5 + $0x8] sm:$0xff] }
  0xb9   :  { %v425_v3 = vpop.permute.xlu1 %424  ;;  %v420_v4 = vpop.permute.xlu0 %419  ;;  %v7353_v58 = vpack.c.bf16 %v4379_v52, %v4378_v51 }
  0xba   :  { %v2066_v6 = vmul.f32 0.01, %v1816_v63  ;;  %v1562_v7 = vmul.f32 %v7690_v25, %v425_v3  ;;  %v1561_v8 = vmul.f32 %v7690_v25, %v420_v4  ;;  %744 = vperm.xlu1 %7387, %v119_v61   ;;  %739 = vperm.xlu0 %7386, %v118_v62   ;;  %v2067_v13 = vmul.f32 0.01, %v1817_v2  ;;  %v129_v62 = vld [vmem:[%s10759_s0 + $0x338] sm:$0xff] }
  0xbb   :  { %6573 = vmatmul.mubr.f32.gmra.mrb[22].mxu0 %v2313_v5  ;;  %7354 = vmatprep.subr.bf16.mxu1 %v7353_v58  ;;  %v4381_v3 = vld [vmem:[%s10763_s5 + $0x18] sm:$0xff] }
  0xbc   :  { %v1818_v11 = vadd.f32 %v7701_v28, %v1561_v8  ;;  %6575 = vmatprep.mubr.f32.mxu0 %v2314_v0  ;;  %v2316_v12 = vmax.f32 %v1816_v63, %v2066_v6  ;;  %v1819_v14 = vadd.f32 %v7701_v28, %v1562_v7  ;;  %v2317_v31 = vmax.f32 %v1817_v2, %v2067_v13  ;;  %v128_v63 = vld [vmem:[%s10759_s0 + $0x330] sm:$0xff]  ;;  %v131_v13 = vld [vmem:[%s10759_s0 + $0x348] sm:$0xff] }
  0xbd   :  { %v435_v15 = vpop.permute.xlu1 %434  ;;  %v430_v16 = vpop.permute.xlu0 %429  ;;  %v4380_v2 = vld [vmem:[%s10763_s5 + $0x10] sm:$0xff]  ;;  %7356 = vmatpush3.bf16.msra.mxu1 %v7353_v58 }
  0xbe   :  { %v2068_v18 = vmul.f32 0.01, %v1818_v11  ;;  %v1564_v19 = vmul.f32 %v7690_v25, %v435_v15  ;;  %v1563_v20 = vmul.f32 %v7690_v25, %v430_v16  ;;  %754 = vperm.xlu1 %7387, %v121_v9   ;;  %749 = vperm.xlu0 %7386, %v120_v10   ;;  %v2069_v26 = vmul.f32 0.01, %v1819_v14 }
  0xbf   :  { %6576 = vmatmul.mubr.f32.gmra.mrb[24].mxu0 %v2315_v17  ;;  %v7357_v9 = vpack.c.bf16 %v4381_v3, %v4380_v2  ;;  %v4382_v17 = vld [vmem:[%s10763_s5 + $0x20] sm:$0xff] }
  0xc0   :  { %v1820_v23 = vadd.f32 %v7701_v28, %v1563_v20  ;;  %6578 = vmatprep.mubr.f32.mxu0 %v2316_v12  ;;  %v2318_v24 = vmax.f32 %v1818_v11, %v2068_v18  ;;  %v1821_v27 = vadd.f32 %v7701_v28, %v1564_v19  ;;  %v2319_v43 = vmax.f32 %v1819_v14, %v2069_v26  ;;  %v130_v14 = vld [vmem:[%s10759_s0 + $0x340] sm:$0xff]  ;;  %v4383_v18 = vld [vmem:[%s10763_s5 + $0x28] sm:$0xff] }
  0xc1   :  { %v445_v29 = vpop.permute.xlu1 %444  ;;  %v440_v30 = vpop.permute.xlu0 %439  ;;  %7358 = vmatprep.subr.bf16.mxu1 %v7357_v9 }
  0xc2   :  { %v2070_v32 = vmul.f32 0.01, %v1820_v23  ;;  %v1566_v33 = vmul.f32 %v7690_v25, %v445_v29  ;;  %v1565_v34 = vmul.f32 %v7690_v25, %v440_v30  ;;  %764 = vperm.xlu1 %7387, %v123_v21   ;;  %759 = vperm.xlu0 %7386, %v122_v22   ;;  %v2071_v39 = vmul.f32 0.01, %v1821_v27  ;;  %v133_v30 = vld [vmem:[%s10759_s0 + $0x358] sm:$0xff] }
  0xc3   :  { %6579 = vmatmul.mubr.f32.gmra.mrb[26].mxu0 %v2317_v31  ;;  %7360 = vmatpush3.bf16.msra.mxu1 %v7357_v9  ;;  %v132_v31 = vld [vmem:[%s10759_s0 + $0x350] sm:$0xff] }
  0xc4   :  { %v1822_v37 = vadd.f32 %v7701_v28, %v1565_v34  ;;  %6581 = vmatprep.mubr.f32.mxu0 %v2318_v24  ;;  %v2320_v38 = vmax.f32 %v1820_v23, %v2070_v32  ;;  %v1823_v40 = vadd.f32 %v7701_v28, %v1566_v33  ;;  %v2321_v57 = vmax.f32 %v1821_v27, %v2071_v39  ;;  %v4384_v34 = vld [vmem:[%s10763_s5 + $0x30] sm:$0xff] }
  0xc5   :  { %v455_v41 = vpop.permute.xlu1 %454  ;;  %v450_v42 = vpop.permute.xlu0 %449  ;;  %v7361_v24 = vpack.c.bf16 %v4383_v18, %v4382_v17 }
  0xc6   :  { %v2072_v44 = vmul.f32 0.01, %v1822_v37  ;;  %v1568_v45 = vmul.f32 %v7690_v25, %v455_v41  ;;  %v1567_v46 = vmul.f32 %v7690_v25, %v450_v42  ;;  %774 = vperm.xlu1 %7387, %v125_v35   ;;  %769 = vperm.xlu0 %7386, %v124_v36   ;;  %v2073_v53 = vmul.f32 0.01, %v1823_v40  ;;  %v4385_v35 = vld [vmem:[%s10763_s5 + $0x38] sm:$0xff] }
  0xc7   :  { %6582 = vmatmul.mubr.f32.gmra.mrb[28].mxu0 %v2319_v43  ;;  %7362 = vmatprep.subr.bf16.mxu1 %v7361_v24  ;;  %v7365_v41 = vpack.c.bf16 %v4385_v35, %v4384_v34 }
  0xc8   :  { %v1824_v49 = vadd.f32 %v7701_v28, %v1567_v46  ;;  %6584 = vmatprep.mubr.f32.mxu0 %v2320_v38  ;;  %v2322_v50 = vmax.f32 %v1822_v37, %v2072_v44  ;;  %v1825_v54 = vadd.f32 %v7701_v28, %v1568_v45  ;;  %v2323_v8 = vmax.f32 %v1823_v40, %v2073_v53  ;;  %v135_v45 = vld [vmem:[%s10759_s0 + $0x368] sm:$0xff]  ;;  %v134_v46 = vld [vmem:[%s10759_s0 + $0x360] sm:$0xff] }
  0xc9   :  { %v465_v55 = vpop.permute.xlu1 %464  ;;  %v460_v56 = vpop.permute.xlu0 %459  ;;  %7364 = vmatpush3.bf16.msra.mxu1 %v7361_v24 }
  0xca   :  { %v2074_v59 = vmul.f32 0.01, %v1824_v49  ;;  %v1570_v60 = vmul.f32 %v7690_v25, %v465_v55  ;;  %v1569_v61 = vmul.f32 %v7690_v25, %v460_v56  ;;  %784 = vperm.xlu1 %7387, %v127_v47   ;;  %779 = vperm.xlu0 %7386, %v126_v48   ;;  %v2075_v4 = vmul.f32 0.01, %v1825_v54 }
  0xcb   :  { %6585 = vmatmul.mubr.f32.gmra.mrb[30].mxu0 %v2321_v57  ;;  %7366 = vmatprep.subr.bf16.mxu1 %v7365_v41 }
  0xcc   :  { %v1826_v0 = vadd.f32 %v7701_v28, %v1569_v61  ;;  %6587 = vmatprep.mubr.f32.mxu0 %v2322_v50  ;;  %v2324_v1 = vmax.f32 %v1824_v49, %v2074_v59  ;;  %v1827_v5 = vadd.f32 %v7701_v28, %v1570_v60  ;;  %v2325_v23 = vmax.f32 %v1825_v54, %v2075_v4  ;;  %v4386_v49 = vld [vmem:[%s10763_s5 + $0x40] sm:$0xff]  ;;  %v4387_v50 = vld [vmem:[%s10763_s5 + $0x48] sm:$0xff]  ;;  %v137_v60 = vld [vmem:[%s10759_s0 + $0x378] sm:$0xff] }
  0xcd   :  { %v475_v6 = vpop.permute.xlu1 %474  ;;  %v470_v7 = vpop.permute.xlu0 %469  ;;  %7368 = vmatpush3.bf16.msra.mxu1 %v7365_v41  ;;  %v7369_v56 = vpack.c.bf16 %v4387_v50, %v4386_v49  ;;  %v136_v61 = vld [vmem:[%s10759_s0 + $0x370] sm:$0xff] }
  0xce   :  { %v2076_v10 = vmul.f32 0.01, %v1826_v0  ;;  %v1572_v11 = vmul.f32 %v7690_v25, %v475_v6  ;;  %v1571_v12 = vmul.f32 %v7690_v25, %v470_v7  ;;  %794 = vperm.xlu1 %7387, %v129_v62   ;;  %789 = vperm.xlu0 %7386, %v128_v63   ;;  %v2077_v19 = vmul.f32 0.01, %v1827_v5 }
  0xcf   :  { %6588 = vmatmul.mubr.f32.gmra.mrb[32].mxu0 %v2323_v8  ;;  %7370 = vmatprep.subr.bf16.mxu1 %v7369_v56 }
  0xd0   :  { %v1828_v15 = vadd.f32 %v7701_v28, %v1571_v12  ;;  %6590 = vmatprep.mubr.f32.mxu0 %v2324_v1  ;;  %v2326_v16 = vmax.f32 %v1826_v0, %v2076_v10  ;;  %v1829_v20 = vadd.f32 %v7701_v28, %v1572_v11  ;;  %v2327_v40 = vmax.f32 %v1827_v5, %v2077_v19  ;;  %v4388_v0 = vld [vmem:[%s10763_s5 + $0x50] sm:$0xff]  ;;  %v4389_v1 = vld [vmem:[%s10763_s5 + $0x58] sm:$0xff]  ;;  %v139_v11 = vld [vmem:[%s10759_s0 + $0x388] sm:$0xff] }
  0xd1   :  { %v485_v21 = vpop.permute.xlu1 %484  ;;  %v480_v22 = vpop.permute.xlu0 %479  ;;  %7372 = vmatpush3.bf16.msra.mxu1 %v7369_v56  ;;  %v7373_v7 = vpack.c.bf16 %v4389_v1, %v4388_v0  ;;  %v138_v12 = vld [vmem:[%s10759_s0 + $0x380] sm:$0xff]  ;;  %v144_v56 = vld [vmem:[%s10759_s0 + $0x3b0] sm:$0xff] }
  0xd2   :  { %v2078_v26 = vmul.f32 0.01, %v1828_v15  ;;  %v1574_v27 = vmul.f32 %v7690_v25, %v485_v21  ;;  %v1573_v29 = vmul.f32 %v7690_v25, %v480_v22  ;;  %804 = vperm.xlu1 %7387, %v131_v13   ;;  %799 = vperm.xlu0 %7386, %v130_v14   ;;  %v2079_v36 = vmul.f32 0.01, %v1829_v20 }
  0xd3   :  { %6591 = vmatmul.mubr.f32.gmra.mrb[34].mxu0 %v2325_v23  ;;  %7374 = vmatprep.subr.bf16.mxu1 %v7373_v7 }
  0xd4   :  { %v1830_v32 = vadd.f32 %v7701_v28, %v1573_v29  ;;  %6593 = vmatprep.mubr.f32.mxu0 %v2326_v16  ;;  %v2328_v33 = vmax.f32 %v1828_v15, %v2078_v26  ;;  %v1831_v37 = vadd.f32 %v7701_v28, %v1574_v27  ;;  %v2329_v55 = vmax.f32 %v1829_v20, %v2079_v36  ;;  %v4390_v15 = vld [vmem:[%s10763_s5 + $0x60] sm:$0xff]  ;;  %v4391_v16 = vld [vmem:[%s10763_s5 + $0x68] sm:$0xff]  ;;  %v141_v27 = vld [vmem:[%s10759_s0 + $0x398] sm:$0xff] }
  0xd5   :  { %v495_v38 = vpop.permute.xlu1 %494  ;;  %v490_v39 = vpop.permute.xlu0 %489  ;;  %7376 = vmatpush3.bf16.msra.mxu1 %v7373_v7  ;;  %v7377_v22 = vpack.c.bf16 %v4391_v16, %v4390_v15  ;;  %v140_v29 = vld [vmem:[%s10759_s0 + $0x390] sm:$0xff]  ;;  %v149_v15 = vld [vmem:[%s10759_s0 + $0x3d8] sm:$0xff] }
  0xd6   :  { %v2080_v42 = vmul.f32 0.01, %v1830_v32  ;;  %v1576_v43 = vmul.f32 %v7690_v25, %v495_v38  ;;  %v1575_v44 = vmul.f32 %v7690_v25, %v490_v39  ;;  %814 = vperm.xlu1 %7387, %v133_v30   ;;  %809 = vperm.xlu0 %7386, %v132_v31   ;;  %v2081_v51 = vmul.f32 0.01, %v1831_v37  ;;  %v148_v16 = vld [vmem:[%s10759_s0 + $0x3d0] sm:$0xff] }
  0xd7   :  { %6594 = vmatmul.mubr.f32.gmra.mrb[36].mxu0 %v2327_v40  ;;  %7378 = vmatprep.subr.bf16.mxu1 %v7377_v22 }
  0xd8   :  { %v1832_v47 = vadd.f32 %v7701_v28, %v1575_v44  ;;  %6596 = vmatprep.mubr.f32.mxu0 %v2328_v33  ;;  %v2330_v48 = vmax.f32 %v1830_v32, %v2080_v42  ;;  %v1833_v52 = vadd.f32 %v7701_v28, %v1576_v43  ;;  %v2331_v6 = vmax.f32 %v1831_v37, %v2081_v51  ;;  %v4392_v32 = vld [vmem:[%s10763_s5 + $0x70] sm:$0xff]  ;;  %v4393_v33 = vld [vmem:[%s10763_s5 + $0x78] sm:$0xff]  ;;  %v143_v43 = vld [vmem:[%s10759_s0 + $0x3a8] sm:$0xff] }
  0xd9   :  { %v505_v53 = vpop.permute.xlu1 %504  ;;  %v500_v54 = vpop.permute.xlu0 %499  ;;  %7380 = vmatpush3.bf16.msra.mxu1 %v7377_v22  ;;  %v7381_v39 = vpack.c.bf16 %v4393_v33, %v4392_v32  ;;  %v142_v44 = vld [vmem:[%s10759_s0 + $0x3a0] sm:$0xff] }
  0xda   :  { %v2082_v57 = vmul.f32 0.01, %v1832_v47  ;;  %v1578_v58 = vmul.f32 %v7690_v25, %v505_v53  ;;  %v1577_v59 = vmul.f32 %v7690_v25, %v500_v54  ;;  %824 = vperm.xlu1 %7387, %v135_v45   ;;  %819 = vperm.xlu0 %7386, %v134_v46   ;;  %v2083_v2 = vmul.f32 0.01, %v1833_v52 }
  0xdb   :  { %6597 = vmatmul.mubr.f32.gmra.mrb[38].mxu0 %v2329_v55  ;;  %7382 = vmatprep.subr.bf16.mxu1 %v7381_v39  ;;  %v145_v55 = vld [vmem:[%s10759_s0 + $0x3b8] sm:$0xff] }
  0xdc   :  { %v1834_v62 = vadd.f32 %v7701_v28, %v1577_v59  ;;  %6599 = vmatprep.mubr.f32.mxu0 %v2330_v48  ;;  %v2332_v63 = vmax.f32 %v1832_v47, %v2082_v57  ;;  %v1835_v3 = vadd.f32 %v7701_v28, %v1578_v58  ;;  %v2333_v21 = vmax.f32 %v1833_v52, %v2083_v2 }
  0xdd   :  { %v515_v4 = vpop.permute.xlu1 %514  ;;  %v510_v5 = vpop.permute.xlu0 %509  ;;  %7384 = vmatpush3.bf16.msra.mxu1 %v7381_v39 }
  0xde   :  { %v2084_v8 = vmul.f32 0.01, %v1834_v62  ;;  %v1580_v9 = vmul.f32 %v7690_v25, %v515_v4  ;;  %v1579_v10 = vmul.f32 %v7690_v25, %v510_v5  ;;  %834 = vperm.xlu1 %7387, %v137_v60   ;;  %829 = vperm.xlu0 %7386, %v136_v61   ;;  %v2085_v17 = vmul.f32 0.01, %v1835_v3  ;;  %v146_v4 = vld [vmem:[%s10759_s0 + $0x3c0] sm:$0xff] }
  0xdf   :  { %6600 = vmatmul.mubr.f32.gmra.mrb[40].mxu0 %v2331_v6 }
  0xe0   :  { %v1836_v13 = vadd.f32 %v7701_v28, %v1579_v10  ;;  %6602 = vmatprep.mubr.f32.mxu0 %v2332_v63  ;;  %v2334_v14 = vmax.f32 %v1834_v62, %v2084_v8  ;;  %v1837_v18 = vadd.f32 %v7701_v28, %v1580_v9  ;;  %v2335_v38 = vmax.f32 %v1835_v3, %v2085_v17  ;;  %v147_v3 = vld [vmem:[%s10759_s0 + $0x3c8] sm:$0xff] }
  0xe1   :  { %v525_v19 = vpop.permute.xlu1 %524  ;;  %v520_v20 = vpop.permute.xlu0 %519 }
  0xe2   :  { %v2086_v23 = vmul.f32 0.01, %v1836_v13  ;;  %v1582_v24 = vmul.f32 %v7690_v25, %v525_v19  ;;  %v1581_v26 = vmul.f32 %v7690_v25, %v520_v20  ;;  %844 = vperm.xlu1 %7387, %v139_v11   ;;  %839 = vperm.xlu0 %7386, %v138_v12   ;;  %v2087_v34 = vmul.f32 0.01, %v1837_v18 }
  0xe3   :  { %6603 = vmatmul.mubr.f32.gmra.mrb[42].mxu0 %v2333_v21 }
  0xe4   :  { %v1838_v30 = vadd.f32 %v7701_v28, %v1581_v26  ;;  %6605 = vmatprep.mubr.f32.mxu0 %v2334_v14  ;;  %v2336_v31 = vmax.f32 %v1836_v13, %v2086_v23  ;;  %v1839_v35 = vadd.f32 %v7701_v28, %v1582_v24  ;;  %v2337_v51 = vmax.f32 %v1837_v18, %v2087_v34 }
  0xe5   :  { %v535_v36 = vpop.permute.xlu1 %534  ;;  %v530_v37 = vpop.permute.xlu0 %529 }
  0xe6   :  { %v2088_v40 = vmul.f32 0.01, %v1838_v30  ;;  %v1584_v41 = vmul.f32 %v7690_v25, %v535_v36  ;;  %v1583_v42 = vmul.f32 %v7690_v25, %v530_v37  ;;  %854 = vperm.xlu1 %7387, %v141_v27   ;;  %849 = vperm.xlu0 %7386, %v140_v29   ;;  %v2089_v47 = vmul.f32 0.01, %v1839_v35  ;;  %v151_v29 = vld [vmem:[%s10759_s0 + $0x3e8] sm:$0xff] }
  0xe7   :  { %6606 = vmatmul.mubr.f32.gmra.mrb[44].mxu0 %v2335_v38  ;;  %v8054_v38 = vld [vmem:[%s10761_s1] ss:$0 sm:$0xff] }
  0xe8   :  { %v1840_v45 = vadd.f32 %v7701_v28, %v1583_v42  ;;  %6608 = vmatprep.mubr.f32.mxu0 %v2336_v31  ;;  %v2338_v46 = vmax.f32 %v1838_v30, %v2088_v40  ;;  %v1841_v48 = vadd.f32 %v7701_v28, %v1584_v41  ;;  %v2339_v63 = vmax.f32 %v1839_v35, %v2089_v47  ;;  %v150_v30 = vld [vmem:[%s10759_s0 + $0x3e0] sm:$0xff]  ;;  %v152_v41 = vld [vmem:[%s10759_s0 + $0x3f0] sm:$0xff] }
  0xe9   :  { %v545_v49 = vpop.permute.xlu1 %544  ;;  %v540_v50 = vpop.permute.xlu0 %539  ;;  %v8067_v42 = vld [vmem:[%s10762_s2] ss:$0 sm:$0xff] }
  0xea   :  { %v2090_v52 = vmul.f32 0.01, %v1840_v45  ;;  %v1586_v53 = vmul.f32 %v7690_v25, %v545_v49  ;;  %v1585_v54 = vmul.f32 %v7690_v25, %v540_v50  ;;  %864 = vperm.xlu1 %7387, %v143_v43   ;;  %859 = vperm.xlu0 %7386, %v142_v44   ;;  %v2091_v59 = vmul.f32 0.01, %v1841_v48 }
  0xeb   :  { %6609 = vmatmul.mubr.f32.gmra.mrb[46].mxu0 %v2337_v51 }
  0xec   :  { %v1842_v57 = vadd.f32 %v7701_v28, %v1585_v54  ;;  %6611 = vmatprep.mubr.f32.mxu0 %v2338_v46  ;;  %v2340_v58 = vmax.f32 %v1840_v45, %v2090_v52  ;;  %v1843_v60 = vadd.f32 %v7701_v28, %v1586_v53  ;;  %v2341_v11 = vmax.f32 %v1841_v48, %v2091_v59  ;;  %v155_v53 = vld [vmem:[%s10759_s0 + $0x408] sm:$0xff]  ;;  %v154_v54 = vld [vmem:[%s10759_s0 + $0x400] sm:$0xff] }
  0xed   :  { %v555_v61 = vpop.permute.xlu1 %554  ;;  %v550_v62 = vpop.permute.xlu0 %549 }
  0xee   :  { %v2092_v0 = vmul.f32 0.01, %v1842_v57  ;;  %v1588_v1 = vmul.f32 %v7690_v25, %v555_v61  ;;  %v1587_v2 = vmul.f32 %v7690_v25, %v550_v62  ;;  %874 = vperm.xlu1 %7387, %v145_v55   ;;  %869 = vperm.xlu0 %7386, %v144_v56   ;;  %v2093_v7 = vmul.f32 0.01, %v1843_v60 }
  0xef   :  { %6612 = vmatmul.mubr.f32.gmra.mrb[48].mxu0 %v2339_v63 }
  0xf0   :  { %v1844_v5 = vadd.f32 %v7701_v28, %v1587_v2  ;;  %6614 = vmatprep.mubr.f32.mxu0 %v2340_v58  ;;  %v2342_v6 = vmax.f32 %v1842_v57, %v2092_v0  ;;  %v1845_v8 = vadd.f32 %v7701_v28, %v1588_v1  ;;  %v2343_v23 = vmax.f32 %v1843_v60, %v2093_v7  ;;  %v157_v1 = vld [vmem:[%s10759_s0 + $0x418] sm:$0xff]  ;;  %v156_v2 = vld [vmem:[%s10759_s0 + $0x410] sm:$0xff] }
  0xf1   :  { %v565_v9 = vpop.permute.xlu1 %564  ;;  %v560_v10 = vpop.permute.xlu0 %559 }
  0xf2   :  { %v2094_v12 = vmul.f32 0.01, %v1844_v5  ;;  %v1590_v13 = vmul.f32 %v7690_v25, %v565_v9  ;;  %v1589_v14 = vmul.f32 %v7690_v25, %v560_v10  ;;  %884 = vperm.xlu1 %7387, %v147_v3   ;;  %879 = vperm.xlu0 %7386, %v146_v4   ;;  %v2095_v19 = vmul.f32 0.01, %v1845_v8 }
  0xf3   :  { %6615 = vmatmul.mubr.f32.gmra.mrb[50].mxu0 %v2341_v11 }
  0xf4   :  { %v1846_v17 = vadd.f32 %v7701_v28, %v1589_v14  ;;  %6617 = vmatprep.mubr.f32.mxu0 %v2342_v6  ;;  %v2344_v18 = vmax.f32 %v1844_v5, %v2094_v12  ;;  %v1847_v20 = vadd.f32 %v7701_v28, %v1590_v13  ;;  %v2345_v36 = vmax.f32 %v1845_v8, %v2095_v19  ;;  %v159_v13 = vld [vmem:[%s10759_s0 + $0x428] sm:$0xff]  ;;  %v158_v14 = vld [vmem:[%s10759_s0 + $0x420] sm:$0xff] }
  0xf5   :  { %v575_v21 = vpop.permute.xlu1 %574  ;;  %v570_v22 = vpop.permute.xlu0 %569 }
  0xf6   :  { %v2096_v24 = vmul.f32 0.01, %v1846_v17  ;;  %v1592_v26 = vmul.f32 %v7690_v25, %v575_v21  ;;  %v1591_v27 = vmul.f32 %v7690_v25, %v570_v22  ;;  %894 = vperm.xlu1 %7387, %v149_v15   ;;  %889 = vperm.xlu0 %7386, %v148_v16   ;;  %v2097_v33 = vmul.f32 0.01, %v1847_v20 }
  0xf7   :  { %6618 = vmatmul.mubr.f32.gmra.mrb[52].mxu0 %v2343_v23 }
  0xf8   :  { %v1848_v31 = vadd.f32 %v7701_v28, %v1591_v27  ;;  %6620 = vmatprep.mubr.f32.mxu0 %v2344_v18  ;;  %v2346_v32 = vmax.f32 %v1846_v17, %v2096_v24  ;;  %v1849_v34 = vadd.f32 %v7701_v28, %v1592_v26  ;;  %v153_v28 = vld [vmem:[%s10759_s0 + $0x3f8] sm:$0xff]  ;;  %v2347_v49 = vmax.f32 %v1847_v20, %v2097_v33  ;;  %v160_v27 = vld [vmem:[%s10759_s0 + $0x430] sm:$0xff] }
  0xf9   :  { %v585_v35 = vpop.permute.xlu1 %584  ;;  %v580_v25 = vpop.permute.xlu0 %579  ;;  %v161_v26 = vld [vmem:[%s10759_s0 + $0x438] sm:$0xff] }
  0xfa   :  { %v2098_v37 = vmul.f32 0.01, %v1848_v31  ;;  %v1594_v39 = vmul.f32 %v8054_v38, %v585_v35  ;;  %v1593_v40 = vmul.f32 %v8054_v38, %v580_v25  ;;  %904 = vperm.xlu1 %7387, %v151_v29   ;;  %899 = vperm.xlu0 %7386, %v150_v30   ;;  %v2099_v45 = vmul.f32 0.01, %v1849_v34 }
  0xfb   :  { %6621 = vmatmul.mubr.f32.gmra.mrb[54].mxu0 %v2345_v36 }
  0xfc   :  { %v1850_v43 = vadd.f32 %v8067_v42, %v1593_v40  ;;  %6623 = vmatprep.mubr.f32.mxu0 %v2346_v32  ;;  %v2348_v44 = vmax.f32 %v1848_v31, %v2098_v37  ;;  %v1851_v46 = vadd.f32 %v8067_v42, %v1594_v39  ;;  %v2349_v61 = vmax.f32 %v1849_v34, %v2099_v45  ;;  %v163_v39 = vld [vmem:[%s10759_s0 + $0x448] sm:$0xff]  ;;  %v162_v40 = vld [vmem:[%s10759_s0 + $0x440] sm:$0xff] }
  0xfd   :  { %v595_v47 = vpop.permute.xlu1 %594  ;;  %v590_v48 = vpop.permute.xlu0 %589 }
  0xfe   :  { %v2100_v50 = vmul.f32 0.01, %v1850_v43  ;;  %v1596_v51 = vmul.f32 %v8054_v38, %v595_v47  ;;  %v1595_v52 = vmul.f32 %v8054_v38, %v590_v48  ;;  %914 = vperm.xlu1 %7387, %v153_v28   ;;  %909 = vperm.xlu0 %7386, %v152_v41   ;;  %v2101_v57 = vmul.f32 0.01, %v1851_v46 }
  0xff   :  { %6624 = vmatmul.mubr.f32.gmra.mrb[56].mxu0 %v2347_v49 }
 0x100   :  { %v1852_v55 = vadd.f32 %v8067_v42, %v1595_v52  ;;  %6626 = vmatprep.mubr.f32.mxu0 %v2348_v44  ;;  %v2350_v56 = vmax.f32 %v1850_v43, %v2100_v50  ;;  %v1853_v58 = vadd.f32 %v8067_v42, %v1596_v51  ;;  %v2351_v9 = vmax.f32 %v1851_v46, %v2101_v57  ;;  %v165_v51 = vld [vmem:[%s10759_s0 + $0x458] sm:$0xff]  ;;  %v164_v52 = vld [vmem:[%s10759_s0 + $0x450] sm:$0xff] }
 0x101   :  { %v605_v59 = vpop.permute.xlu1 %604  ;;  %v600_v60 = vpop.permute.xlu0 %599 }
 0x102   :  { %v2102_v62 = vmul.f32 0.01, %v1852_v55  ;;  %v1598_v63 = vmul.f32 %v8054_v38, %v605_v59  ;;  %v1597_v0 = vmul.f32 %v8054_v38, %v600_v60  ;;  %924 = vperm.xlu1 %7387, %v155_v53   ;;  %919 = vperm.xlu0 %7386, %v154_v54   ;;  %v2103_v5 = vmul.f32 0.01, %v1853_v58 }
 0x103   :  { %6627 = vmatmul.mubr.f32.gmra.mrb[58].mxu0 %v2349_v61 }
 0x104   :  { %v1854_v3 = vadd.f32 %v8067_v42, %v1597_v0  ;;  %6629 = vmatprep.mubr.f32.mxu0 %v2350_v56  ;;  %v2352_v4 = vmax.f32 %v1852_v55, %v2102_v62  ;;  %v1855_v6 = vadd.f32 %v8067_v42, %v1598_v63  ;;  %v2353_v21 = vmax.f32 %v1853_v58, %v2103_v5  ;;  %v167_v63 = vld [vmem:[%s10759_s0 + $0x468] sm:$0xff]  ;;  %v166_v0 = vld [vmem:[%s10759_s0 + $0x460] sm:$0xff] }
 0x105   :  { %v615_v7 = vpop.permute.xlu1 %614  ;;  %v610_v8 = vpop.permute.xlu0 %609 }
 0x106   :  { %v2104_v10 = vmul.f32 0.01, %v1854_v3  ;;  %v1600_v11 = vmul.f32 %v8054_v38, %v615_v7  ;;  %v1599_v12 = vmul.f32 %v8054_v38, %v610_v8  ;;  %934 = vperm.xlu1 %7387, %v157_v1   ;;  %929 = vperm.xlu0 %7386, %v156_v2   ;;  %v2105_v17 = vmul.f32 0.01, %v1855_v6 }
 0x107   :  { %6630 = vmatmul.mubr.f32.gmra.mrb[60].mxu0 %v2351_v9 }
 0x108   :  { %v1856_v15 = vadd.f32 %v8067_v42, %v1599_v12  ;;  %6632 = vmatprep.mubr.f32.mxu0 %v2352_v4  ;;  %v2354_v16 = vmax.f32 %v1854_v3, %v2104_v10  ;;  %v1857_v18 = vadd.f32 %v8067_v42, %v1600_v11  ;;  %v2355_v35 = vmax.f32 %v1855_v6, %v2105_v17  ;;  %v169_v11 = vld [vmem:[%s10759_s0 + $0x478] sm:$0xff]  ;;  %v168_v12 = vld [vmem:[%s10759_s0 + $0x470] sm:$0xff] }
 0x109   :  { %v625_v19 = vpop.permute.xlu1 %624  ;;  %v620_v20 = vpop.permute.xlu0 %619 }
 0x10a   :  { %v2106_v22 = vmul.f32 0.01, %v1856_v15  ;;  %v1602_v23 = vmul.f32 %v8054_v38, %v625_v19  ;;  %v1601_v24 = vmul.f32 %v8054_v38, %v620_v20  ;;  %944 = vperm.xlu1 %7387, %v159_v13   ;;  %939 = vperm.xlu0 %7386, %v158_v14   ;;  %v2107_v31 = vmul.f32 0.01, %v1857_v18 }
 0x10b   :  { %6633 = vmatmul.mubr.f32.gmra.mrb[62].mxu0 %v2353_v21 }
 0x10c   :  { %v1858_v29 = vadd.f32 %v8067_v42, %v1601_v24  ;;  %6635 = vmatprep.mubr.f32.mxu0 %v2354_v16  ;;  %v2356_v30 = vmax.f32 %v1856_v15, %v2106_v22  ;;  %v1859_v32 = vadd.f32 %v8067_v42, %v1602_v23  ;;  %v2357_v47 = vmax.f32 %v1857_v18, %v2107_v31  ;;  %v171_v23 = vld [vmem:[%s10759_s0 + $0x488] sm:$0xff]  ;;  %v170_v24 = vld [vmem:[%s10759_s0 + $0x480] sm:$0xff] }
 0x10d   :  { %v635_v33 = vpop.permute.xlu1 %634  ;;  %v630_v34 = vpop.permute.xlu0 %629 }
 0x10e   :  { %v2108_v25 = vmul.f32 0.01, %v1858_v29  ;;  %v1604_v36 = vmul.f32 %v8054_v38, %v635_v33  ;;  %v1603_v37 = vmul.f32 %v8054_v38, %v630_v34  ;;  %954 = vperm.xlu1 %7387, %v161_v26   ;;  %949 = vperm.xlu0 %7386, %v160_v27   ;;  %v2109_v43 = vmul.f32 0.01, %v1859_v32 }
 0x10f   :  { %6636 = vmatmul.mubr.f32.gmra.mrb[64].mxu0 %v2355_v35 }
 0x110   :  { %v1860_v28 = vadd.f32 %v8067_v42, %v1603_v37  ;;  %6638 = vmatprep.mubr.f32.mxu0 %v2356_v30  ;;  %v2358_v41 = vmax.f32 %v1858_v29, %v2108_v25  ;;  %v1861_v44 = vadd.f32 %v8067_v42, %v1604_v36  ;;  %v2359_v59 = vmax.f32 %v1859_v32, %v2109_v43  ;;  %v173_v36 = vld [vmem:[%s10759_s0 + $0x498] sm:$0xff]  ;;  %v172_v37 = vld [vmem:[%s10759_s0 + $0x490] sm:$0xff] }
 0x111   :  { %v645_v45 = vpop.permute.xlu1 %644  ;;  %v640_v46 = vpop.permute.xlu0 %639 }
 0x112   :  { %v2110_v48 = vmul.f32 0.01, %v1860_v28  ;;  %v1606_v49 = vmul.f32 %v8054_v38, %v645_v45  ;;  %v1605_v50 = vmul.f32 %v8054_v38, %v640_v46  ;;  %964 = vperm.xlu1 %7387, %v163_v39   ;;  %959 = vperm.xlu0 %7386, %v162_v40   ;;  %v2111_v55 = vmul.f32 0.01, %v1861_v44 }
 0x113   :  { %6639 = vmatmul.mubr.f32.gmra.mrb[66].mxu0 %v2357_v47 }
 0x114   :  { %v1862_v53 = vadd.f32 %v8067_v42, %v1605_v50  ;;  %6641 = vmatprep.mubr.f32.mxu0 %v2358_v41  ;;  %v2360_v54 = vmax.f32 %v1860_v28, %v2110_v48  ;;  %v1863_v56 = vadd.f32 %v8067_v42, %v1606_v49  ;;  %v2361_v7 = vmax.f32 %v1861_v44, %v2111_v55  ;;  %v175_v49 = vld [vmem:[%s10759_s0 + $0x4a8] sm:$0xff]  ;;  %v174_v50 = vld [vmem:[%s10759_s0 + $0x4a0] sm:$0xff] }
 0x115   :  { %v655_v57 = vpop.permute.xlu1 %654  ;;  %v650_v58 = vpop.permute.xlu0 %649 }
 0x116   :  { %v2112_v60 = vmul.f32 0.01, %v1862_v53  ;;  %v1608_v61 = vmul.f32 %v8054_v38, %v655_v57  ;;  %v1607_v62 = vmul.f32 %v8054_v38, %v650_v58  ;;  %974 = vperm.xlu1 %7387, %v165_v51   ;;  %969 = vperm.xlu0 %7386, %v164_v52   ;;  %v2113_v3 = vmul.f32 0.01, %v1863_v56 }
 0x117   :  { %6642 = vmatmul.mubr.f32.gmra.mrb[68].mxu0 %v2359_v59 }
 0x118   :  { %v1864_v1 = vadd.f32 %v8067_v42, %v1607_v62  ;;  %6644 = vmatprep.mubr.f32.mxu0 %v2360_v54  ;;  %v2362_v2 = vmax.f32 %v1862_v53, %v2112_v60  ;;  %v1865_v4 = vadd.f32 %v8067_v42, %v1608_v61  ;;  %v2363_v19 = vmax.f32 %v1863_v56, %v2113_v3  ;;  %v177_v61 = vld [vmem:[%s10759_s0 + $0x4b8] sm:$0xff]  ;;  %v176_v62 = vld [vmem:[%s10759_s0 + $0x4b0] sm:$0xff] }
 0x119   :  { %v665_v5 = vpop.permute.xlu1 %664  ;;  %v660_v6 = vpop.permute.xlu0 %659 }
 0x11a   :  { %v2114_v8 = vmul.f32 0.01, %v1864_v1  ;;  %v1610_v9 = vmul.f32 %v8054_v38, %v665_v5  ;;  %v1609_v10 = vmul.f32 %v8054_v38, %v660_v6  ;;  %984 = vperm.xlu1 %7387, %v167_v63   ;;  %979 = vperm.xlu0 %7386, %v166_v0   ;;  %v2115_v15 = vmul.f32 0.01, %v1865_v4 }
 0x11b   :  { %6645 = vmatmul.mubr.f32.gmra.mrb[70].mxu0 %v2361_v7 }
 0x11c   :  { %v1866_v13 = vadd.f32 %v8067_v42, %v1609_v10  ;;  %6647 = vmatprep.mubr.f32.mxu0 %v2362_v2  ;;  %v2364_v14 = vmax.f32 %v1864_v1, %v2114_v8  ;;  %v1867_v16 = vadd.f32 %v8067_v42, %v1610_v9  ;;  %v2365_v33 = vmax.f32 %v1865_v4, %v2115_v15  ;;  %v179_v9 = vld [vmem:[%s10759_s0 + $0x4c8] sm:$0xff]  ;;  %v178_v10 = vld [vmem:[%s10759_s0 + $0x4c0] sm:$0xff] }
 0x11d   :  { %v675_v17 = vpop.permute.xlu1 %674  ;;  %v670_v18 = vpop.permute.xlu0 %669 }
 0x11e   :  { %v2116_v20 = vmul.f32 0.01, %v1866_v13  ;;  %v1612_v21 = vmul.f32 %v8054_v38, %v675_v17  ;;  %v1611_v22 = vmul.f32 %v8054_v38, %v670_v18  ;;  %994 = vperm.xlu1 %7387, %v169_v11   ;;  %989 = vperm.xlu0 %7386, %v168_v12   ;;  %v2117_v29 = vmul.f32 0.01, %v1867_v16 }
 0x11f   :  { %6648 = vmatmul.mubr.f32.gmra.mrb[72].mxu0 %v2363_v19 }
 0x120   :  { %v1868_v26 = vadd.f32 %v8067_v42, %v1611_v22  ;;  %6650 = vmatprep.mubr.f32.mxu0 %v2364_v14  ;;  %v2366_v27 = vmax.f32 %v1866_v13, %v2116_v20  ;;  %v1869_v30 = vadd.f32 %v8067_v42, %v1612_v21  ;;  %v2367_v45 = vmax.f32 %v1867_v16, %v2117_v29  ;;  %v181_v21 = vld [vmem:[%s10759_s0 + $0x4d8] sm:$0xff]  ;;  %v180_v22 = vld [vmem:[%s10759_s0 + $0x4d0] sm:$0xff] }
 0x121   :  { %v685_v31 = vpop.permute.xlu1 %684  ;;  %v680_v32 = vpop.permute.xlu0 %679 }
 0x122   :  { %v2118_v34 = vmul.f32 0.01, %v1868_v26  ;;  %v1614_v35 = vmul.f32 %v8054_v38, %v685_v31  ;;  %v1613_v25 = vmul.f32 %v8054_v38, %v680_v32  ;;  %1004 = vperm.xlu1 %7387, %v171_v23   ;;  %999 = vperm.xlu0 %7386, %v170_v24   ;;  %v2119_v28 = vmul.f32 0.01, %v1869_v30 }
 0x123   :  { %6651 = vmatmul.mubr.f32.gmra.mrb[74].mxu0 %v2365_v33 }
 0x124   :  { %v1870_v39 = vadd.f32 %v8067_v42, %v1613_v25  ;;  %6653 = vmatprep.mubr.f32.mxu0 %v2366_v27  ;;  %v2368_v40 = vmax.f32 %v1868_v26, %v2118_v34  ;;  %v1871_v41 = vadd.f32 %v8067_v42, %v1614_v35  ;;  %v2369_v57 = vmax.f32 %v1869_v30, %v2119_v28  ;;  %v183_v35 = vld [vmem:[%s10759_s0 + $0x4e8] sm:$0xff]  ;;  %v182_v25 = vld [vmem:[%s10759_s0 + $0x4e0] sm:$0xff] }
 0x125   :  { %v695_v43 = vpop.permute.xlu1 %694  ;;  %v690_v44 = vpop.permute.xlu0 %689 }
 0x126   :  { %v2120_v46 = vmul.f32 0.01, %v1870_v39  ;;  %v1616_v47 = vmul.f32 %v8054_v38, %v695_v43  ;;  %v1615_v48 = vmul.f32 %v8054_v38, %v690_v44  ;;  %1014 = vperm.xlu1 %7387, %v173_v36   ;;  %1009 = vperm.xlu0 %7386, %v172_v37   ;;  %v2121_v53 = vmul.f32 0.01, %v1871_v41 }
 0x127   :  { %6654 = vmatmul.mubr.f32.gmra.mrb[76].mxu0 %v2367_v45 }
 0x128   :  { %v1872_v51 = vadd.f32 %v8067_v42, %v1615_v48  ;;  %6656 = vmatprep.mubr.f32.mxu0 %v2368_v40  ;;  %v2370_v52 = vmax.f32 %v1870_v39, %v2120_v46  ;;  %v1873_v54 = vadd.f32 %v8067_v42, %v1616_v47  ;;  %v2371_v5 = vmax.f32 %v1871_v41, %v2121_v53  ;;  %v185_v47 = vld [vmem:[%s10759_s0 + $0x4f8] sm:$0xff]  ;;  %v184_v48 = vld [vmem:[%s10759_s0 + $0x4f0] sm:$0xff] }
 0x129   :  { %v705_v55 = vpop.permute.xlu1 %704  ;;  %v700_v56 = vpop.permute.xlu0 %699 }
 0x12a   :  { %v2122_v58 = vmul.f32 0.01, %v1872_v51  ;;  %v1618_v59 = vmul.f32 %v8054_v38, %v705_v55  ;;  %v1617_v60 = vmul.f32 %v8054_v38, %v700_v56  ;;  %1024 = vperm.xlu1 %7387, %v175_v49   ;;  %1019 = vperm.xlu0 %7386, %v174_v50   ;;  %v2123_v1 = vmul.f32 0.01, %v1873_v54 }
 0x12b   :  { %6657 = vmatmul.mubr.f32.gmra.mrb[78].mxu0 %v2369_v57 }
 0x12c   :  { %v1874_v63 = vadd.f32 %v8067_v42, %v1617_v60  ;;  %6659 = vmatprep.mubr.f32.mxu0 %v2370_v52  ;;  %v2372_v0 = vmax.f32 %v1872_v51, %v2122_v58  ;;  %v1875_v2 = vadd.f32 %v8067_v42, %v1618_v59  ;;  %v2373_v17 = vmax.f32 %v1873_v54, %v2123_v1  ;;  %v187_v59 = vld [vmem:[%s10759_s0 + $0x508] sm:$0xff]  ;;  %v186_v60 = vld [vmem:[%s10759_s0 + $0x500] sm:$0xff] }
 0x12d   :  { %v715_v3 = vpop.permute.xlu1 %714  ;;  %v710_v4 = vpop.permute.xlu0 %709 }
 0x12e   :  { %v2124_v6 = vmul.f32 0.01, %v1874_v63  ;;  %v1620_v7 = vmul.f32 %v8054_v38, %v715_v3  ;;  %v1619_v8 = vmul.f32 %v8054_v38, %v710_v4  ;;  %1034 = vperm.xlu1 %7387, %v177_v61   ;;  %1029 = vperm.xlu0 %7386, %v176_v62   ;;  %v2125_v13 = vmul.f32 0.01, %v1875_v2 }
 0x12f   :  { %6660 = vmatmul.mubr.f32.gmra.mrb[80].mxu0 %v2371_v5 }
 0x130   :  { %v1876_v11 = vadd.f32 %v8067_v42, %v1619_v8  ;;  %6662 = vmatprep.mubr.f32.mxu0 %v2372_v0  ;;  %v2374_v12 = vmax.f32 %v1874_v63, %v2124_v6  ;;  %v1877_v14 = vadd.f32 %v8067_v42, %v1620_v7  ;;  %v2375_v31 = vmax.f32 %v1875_v2, %v2125_v13  ;;  %v189_v7 = vld [vmem:[%s10759_s0 + $0x518] sm:$0xff]  ;;  %v188_v8 = vld [vmem:[%s10759_s0 + $0x510] sm:$0xff] }
 0x131   :  { %v725_v15 = vpop.permute.xlu1 %724  ;;  %v720_v16 = vpop.permute.xlu0 %719 }
 0x132   :  { %v2126_v18 = vmul.f32 0.01, %v1876_v11  ;;  %v1622_v19 = vmul.f32 %v8054_v38, %v725_v15  ;;  %v1621_v20 = vmul.f32 %v8054_v38, %v720_v16  ;;  %1044 = vperm.xlu1 %7387, %v179_v9   ;;  %1039 = vperm.xlu0 %7386, %v178_v10   ;;  %v2127_v26 = vmul.f32 0.01, %v1877_v14 }
 0x133   :  { %6663 = vmatmul.mubr.f32.gmra.mrb[82].mxu0 %v2373_v17 }
 0x134   :  { %v1878_v23 = vadd.f32 %v8067_v42, %v1621_v20  ;;  %6665 = vmatprep.mubr.f32.mxu0 %v2374_v12  ;;  %v2376_v24 = vmax.f32 %v1876_v11, %v2126_v18  ;;  %v1879_v27 = vadd.f32 %v8067_v42, %v1622_v19  ;;  %v2377_v43 = vmax.f32 %v1877_v14, %v2127_v26  ;;  %v191_v19 = vld [vmem:[%s10759_s0 + $0x528] sm:$0xff]  ;;  %v190_v20 = vld [vmem:[%s10759_s0 + $0x520] sm:$0xff] }
 0x135   :  { %v735_v29 = vpop.permute.xlu1 %734  ;;  %v730_v30 = vpop.permute.xlu0 %729 }
 0x136   :  { %v2128_v32 = vmul.f32 0.01, %v1878_v23  ;;  %v1624_v33 = vmul.f32 %v8054_v38, %v735_v29  ;;  %v1623_v34 = vmul.f32 %v8054_v38, %v730_v30  ;;  %1054 = vperm.xlu1 %7387, %v181_v21   ;;  %1049 = vperm.xlu0 %7386, %v180_v22   ;;  %v2129_v39 = vmul.f32 0.01, %v1879_v27 }
 0x137   :  { %6666 = vmatmul.mubr.f32.gmra.mrb[84].mxu0 %v2375_v31 }
 0x138   :  { %v1880_v36 = vadd.f32 %v8067_v42, %v1623_v34  ;;  %6668 = vmatprep.mubr.f32.mxu0 %v2376_v24  ;;  %v2378_v37 = vmax.f32 %v1878_v23, %v2128_v32  ;;  %v1881_v40 = vadd.f32 %v8067_v42, %v1624_v33  ;;  %v2379_v55 = vmax.f32 %v1879_v27, %v2129_v39  ;;  %v193_v33 = vld [vmem:[%s10759_s0 + $0x538] sm:$0xff]  ;;  %v192_v34 = vld [vmem:[%s10759_s0 + $0x530] sm:$0xff] }
 0x139   :  { %v745_v28 = vpop.permute.xlu1 %744  ;;  %v740_v41 = vpop.permute.xlu0 %739 }
 0x13a   :  { %v2130_v44 = vmul.f32 0.01, %v1880_v36  ;;  %v1626_v45 = vmul.f32 %v8054_v38, %v745_v28  ;;  %v1625_v46 = vmul.f32 %v8054_v38, %v740_v41  ;;  %1064 = vperm.xlu1 %7387, %v183_v35   ;;  %1059 = vperm.xlu0 %7386, %v182_v25   ;;  %v2131_v51 = vmul.f32 0.01, %v1881_v40 }
 0x13b   :  { %6669 = vmatmul.mubr.f32.gmra.mrb[86].mxu0 %v2377_v43 }
 0x13c   :  { %v1882_v49 = vadd.f32 %v8067_v42, %v1625_v46  ;;  %6671 = vmatprep.mubr.f32.mxu0 %v2378_v37  ;;  %v2380_v50 = vmax.f32 %v1880_v36, %v2130_v44  ;;  %v1883_v52 = vadd.f32 %v8067_v42, %v1626_v45  ;;  %v2381_v3 = vmax.f32 %v1881_v40, %v2131_v51  ;;  %v195_v45 = vld [vmem:[%s10759_s0 + $0x548] sm:$0xff]  ;;  %v194_v46 = vld [vmem:[%s10759_s0 + $0x540] sm:$0xff] }
 0x13d   :  { %v755_v53 = vpop.permute.xlu1 %754  ;;  %v750_v54 = vpop.permute.xlu0 %749 }
 0x13e   :  { %v2132_v56 = vmul.f32 0.01, %v1882_v49  ;;  %v1628_v57 = vmul.f32 %v8054_v38, %v755_v53  ;;  %v1627_v58 = vmul.f32 %v8054_v38, %v750_v54  ;;  %1074 = vperm.xlu1 %7387, %v185_v47   ;;  %1069 = vperm.xlu0 %7386, %v184_v48   ;;  %v2133_v63 = vmul.f32 0.01, %v1883_v52 }
 0x13f   :  { %6672 = vmatmul.mubr.f32.gmra.mrb[88].mxu0 %v2379_v55 }
 0x140   :  { %v1884_v61 = vadd.f32 %v8067_v42, %v1627_v58  ;;  %6674 = vmatprep.mubr.f32.mxu0 %v2380_v50  ;;  %v2382_v62 = vmax.f32 %v1882_v49, %v2132_v56  ;;  %v1885_v0 = vadd.f32 %v8067_v42, %v1628_v57  ;;  %v2383_v15 = vmax.f32 %v1883_v52, %v2133_v63  ;;  %v197_v57 = vld [vmem:[%s10759_s0 + $0x558] sm:$0xff]  ;;  %v196_v58 = vld [vmem:[%s10759_s0 + $0x550] sm:$0xff] }
 0x141   :  { %v765_v1 = vpop.permute.xlu1 %764  ;;  %v760_v2 = vpop.permute.xlu0 %759 }
 0x142   :  { %v2134_v4 = vmul.f32 0.01, %v1884_v61  ;;  %v1630_v5 = vmul.f32 %v8054_v38, %v765_v1  ;;  %v1629_v6 = vmul.f32 %v8054_v38, %v760_v2  ;;  %1084 = vperm.xlu1 %7387, %v187_v59   ;;  %1079 = vperm.xlu0 %7386, %v186_v60   ;;  %v2135_v11 = vmul.f32 0.01, %v1885_v0 }
 0x143   :  { %6675 = vmatmul.mubr.f32.gmra.mrb[90].mxu0 %v2381_v3 }
 0x144   :  { %v1886_v9 = vadd.f32 %v8067_v42, %v1629_v6  ;;  %6677 = vmatprep.mubr.f32.mxu0 %v2382_v62  ;;  %v2384_v10 = vmax.f32 %v1884_v61, %v2134_v4  ;;  %v1887_v12 = vadd.f32 %v8067_v42, %v1630_v5  ;;  %v2385_v29 = vmax.f32 %v1885_v0, %v2135_v11  ;;  %v199_v5 = vld [vmem:[%s10759_s0 + $0x568] sm:$0xff]  ;;  %v198_v6 = vld [vmem:[%s10759_s0 + $0x560] sm:$0xff] }
 0x145   :  { %v775_v13 = vpop.permute.xlu1 %774  ;;  %v770_v14 = vpop.permute.xlu0 %769 }
 0x146   :  { %v2136_v16 = vmul.f32 0.01, %v1886_v9  ;;  %v1632_v17 = vmul.f32 %v8054_v38, %v775_v13  ;;  %v1631_v18 = vmul.f32 %v8054_v38, %v770_v14  ;;  %1094 = vperm.xlu1 %7387, %v189_v7   ;;  %1089 = vperm.xlu0 %7386, %v188_v8   ;;  %v2137_v23 = vmul.f32 0.01, %v1887_v12 }
 0x147   :  { %6678 = vmatmul.mubr.f32.gmra.mrb[92].mxu0 %v2383_v15 }
 0x148   :  { %v1888_v21 = vadd.f32 %v8067_v42, %v1631_v18  ;;  %6680 = vmatprep.mubr.f32.mxu0 %v2384_v10  ;;  %v2386_v22 = vmax.f32 %v1886_v9, %v2136_v16  ;;  %v1889_v24 = vadd.f32 %v8067_v42, %v1632_v17  ;;  %v2387_v28 = vmax.f32 %v1887_v12, %v2137_v23  ;;  %v201_v17 = vld [vmem:[%s10759_s0 + $0x578] sm:$0xff]  ;;  %v200_v18 = vld [vmem:[%s10759_s0 + $0x570] sm:$0xff] }
 0x149   :  { %v785_v26 = vpop.permute.xlu1 %784  ;;  %v780_v27 = vpop.permute.xlu0 %779 }
 0x14a   :  { %v2138_v30 = vmul.f32 0.01, %v1888_v21  ;;  %v1634_v31 = vmul.f32 %v8054_v38, %v785_v26  ;;  %v1633_v32 = vmul.f32 %v8054_v38, %v780_v27  ;;  %1104 = vperm.xlu1 %7387, %v191_v19   ;;  %1099 = vperm.xlu0 %7386, %v190_v20   ;;  %v2139_v36 = vmul.f32 0.01, %v1889_v24 }
 0x14b   :  { %6681 = vmatmul.mubr.f32.gmra.mrb[94].mxu0 %v2385_v29 }
 0x14c   :  { %v1890_v35 = vadd.f32 %v8067_v42, %v1633_v32  ;;  %6683 = vmatprep.mubr.f32.mxu0 %v2386_v22  ;;  %v2388_v25 = vmax.f32 %v1888_v21, %v2138_v30  ;;  %v1891_v37 = vadd.f32 %v8067_v42, %v1634_v31  ;;  %v2389_v53 = vmax.f32 %v1889_v24, %v2139_v36  ;;  %v203_v31 = vld [vmem:[%s10759_s0 + $0x588] sm:$0xff]  ;;  %v202_v32 = vld [vmem:[%s10759_s0 + $0x580] sm:$0xff] }
 0x14d   :  { %v795_v39 = vpop.permute.xlu1 %794  ;;  %v790_v40 = vpop.permute.xlu0 %789 }
 0x14e   :  { %v2140_v41 = vmul.f32 0.01, %v1890_v35  ;;  %v1636_v43 = vmul.f32 %v8054_v38, %v795_v39  ;;  %v1635_v44 = vmul.f32 %v8054_v38, %v790_v40  ;;  %1114 = vperm.xlu1 %7387, %v193_v33   ;;  %1109 = vperm.xlu0 %7386, %v192_v34   ;;  %v2141_v49 = vmul.f32 0.01, %v1891_v37  ;;  %v8323_v34 = vld [vmem:[%s10764_s4] ss:$0 sm:$0xff] }
 0x14f   :  { %6684 = vmatmul.mubr.f32.gmra.mrb[96].mxu0 %v2387_v28 }
 0x150   :  { %v1892_v47 = vadd.f32 %v8067_v42, %v1635_v44  ;;  %6686 = vmatprep.mubr.f32.mxu0 %v2388_v25  ;;  %v2390_v48 = vmax.f32 %v1890_v35, %v2140_v41  ;;  %v1893_v50 = vadd.f32 %v8067_v42, %v1636_v43  ;;  %v2391_v1 = vmax.f32 %v1891_v37, %v2141_v49 }
 0x151   :  { %v805_v51 = vpop.permute.xlu1 %804  ;;  %v800_v52 = vpop.permute.xlu0 %799 }
 0x152   :  { %v2142_v54 = vmul.f32 0.01, %v1892_v47  ;;  %v1638_v55 = vmul.f32 %v8054_v38, %v805_v51  ;;  %v1637_v56 = vmul.f32 %v8054_v38, %v800_v52  ;;  %1124 = vperm.xlu1 %7387, %v195_v45   ;;  %1119 = vperm.xlu0 %7386, %v194_v46   ;;  %v2143_v61 = vmul.f32 0.01, %v1893_v50 }
 0x153   :  { %6687 = vmatmul.mubr.f32.gmra.mrb[98].mxu0 %v2389_v53 }
 0x154   :  { %v1894_v59 = vadd.f32 %v8067_v42, %v1637_v56  ;;  %6689 = vmatprep.mubr.f32.mxu0 %v2390_v48  ;;  %v2392_v60 = vmax.f32 %v1892_v47, %v2142_v54  ;;  %v1895_v62 = vadd.f32 %v8067_v42, %v1638_v55  ;;  %v2393_v13 = vmax.f32 %v1893_v50, %v2143_v61  ;;  %v205_v47 = vld [vmem:[%s10759_s0 + $0x598] sm:$0xff]  ;;  %v204_v48 = vld [vmem:[%s10759_s0 + $0x590] sm:$0xff] }
 0x155   :  { %v815_v63 = vpop.permute.xlu1 %814  ;;  %v810_v0 = vpop.permute.xlu0 %809 }
 0x156   :  { %v2144_v2 = vmul.f32 0.01, %v1894_v59  ;;  %v1640_v3 = vmul.f32 %v8054_v38, %v815_v63  ;;  %v1639_v4 = vmul.f32 %v8054_v38, %v810_v0  ;;  %1134 = vperm.xlu1 %7387, %v197_v57   ;;  %1129 = vperm.xlu0 %7386, %v196_v58   ;;  %v2145_v9 = vmul.f32 0.01, %v1895_v62 }
 0x157   :  { %6690 = vmatmul.mubr.f32.gmra.mrb[100].mxu0 %v2391_v1  ;;  %v207_v1 = vld [vmem:[%s10759_s0 + $0x5a8] sm:$0xff] }
 0x158   :  { %v1896_v7 = vadd.f32 %v8067_v42, %v1639_v4  ;;  %6692 = vmatprep.mubr.f32.mxu0 %v2392_v60  ;;  %v2394_v8 = vmax.f32 %v1894_v59, %v2144_v2  ;;  %v1897_v10 = vadd.f32 %v8067_v42, %v1640_v3  ;;  %v2395_v26 = vmax.f32 %v1895_v62, %v2145_v9  ;;  %v206_v2 = vld [vmem:[%s10759_s0 + $0x5a0] sm:$0xff] }
 0x159   :  { %v825_v11 = vpop.permute.xlu1 %824  ;;  %v820_v12 = vpop.permute.xlu0 %819 }
 0x15a   :  { %v2146_v14 = vmul.f32 0.01, %v1896_v7  ;;  %v1642_v15 = vmul.f32 %v8054_v38, %v825_v11  ;;  %v1641_v16 = vmul.f32 %v8054_v38, %v820_v12  ;;  %1144 = vperm.xlu1 %7387, %v199_v5   ;;  %1139 = vperm.xlu0 %7386, %v198_v6   ;;  %v2147_v21 = vmul.f32 0.01, %v1897_v10 }
 0x15b   :  { %6693 = vmatmul.mubr.f32.gmra.mrb[102].mxu0 %v2393_v13 }
 0x15c   :  { %v1898_v19 = vadd.f32 %v8067_v42, %v1641_v16  ;;  %6695 = vmatprep.mubr.f32.mxu0 %v2394_v8  ;;  %v2396_v20 = vmax.f32 %v1896_v7, %v2146_v14  ;;  %v1899_v22 = vadd.f32 %v8067_v42, %v1642_v15  ;;  %v2397_v40 = vmax.f32 %v1897_v10, %v2147_v21 }
 0x15d   :  { %v835_v23 = vpop.permute.xlu1 %834  ;;  %v830_v24 = vpop.permute.xlu0 %829 }
 0x15e   :  { %v2148_v27 = vmul.f32 0.01, %v1898_v19  ;;  %v1644_v29 = vmul.f32 %v8054_v38, %v835_v23  ;;  %v1643_v30 = vmul.f32 %v8054_v38, %v830_v24  ;;  %1154 = vperm.xlu1 %7387, %v201_v17   ;;  %1149 = vperm.xlu0 %7386, %v200_v18   ;;  %v2149_v25 = vmul.f32 0.01, %v1899_v22  ;;  %v208_v24 = vld [vmem:[%s10759_s0 + $0x5b0] sm:$0xff] }
 0x15f   :  { %6696 = vmatmul.mubr.f32.gmra.mrb[104].mxu0 %v2395_v26 }
 0x160   :  { %v1900_v33 = vadd.f32 %v8067_v42, %v1643_v30  ;;  %6698 = vmatprep.mubr.f32.mxu0 %v2396_v20  ;;  %v2398_v35 = vmax.f32 %v1898_v19, %v2148_v27  ;;  %v1901_v36 = vadd.f32 %v8067_v42, %v1644_v29  ;;  %v2399_v56 = vmax.f32 %v1899_v22, %v2149_v25  ;;  %v209_v19 = vld [vmem:[%s10759_s0 + $0x5b8] sm:$0xff] }
 0x161   :  { %v845_v37 = vpop.permute.xlu1 %844  ;;  %v840_v39 = vpop.permute.xlu0 %839 }
 0x162   :  { %v2150_v28 = vmul.f32 0.01, %v1900_v33  ;;  %v1646_v41 = vmul.f32 %v8054_v38, %v845_v37  ;;  %v6541_v43 = vpop.f32.mrb[0].mxu0  ;;  %v1645_v44 = vmul.f32 %v8054_v38, %v840_v39  ;;  %1164 = vperm.xlu1 %7387, %v203_v31   ;;  %1159 = vperm.xlu0 %7386, %v202_v32   ;;  %v2151_v52 = vmul.f32 0.01, %v1901_v36 }
 0x163   :  { %v2635_v45 = vadd.f32 %v6541_v43, %v8323_v34  ;;  %v2629_v46 = vpop.f32.mrb[1].mxu0  ;;  %6699 = vmatmul.mubr.f32.gmra.mrb[106].mxu0 %v2397_v40 }
 0x164   :  { %v1902_v49 = vadd.f32 %v8067_v42, %v1645_v44  ;;  %v2630_v50 = vadd.f32 %v8323_v34, %v2629_v46  ;;  %6701 = vmatprep.mubr.f32.mxu0 %v2398_v35  ;;  %v2400_v51 = vmax.f32 %v1900_v33, %v2150_v28  ;;  %v8338_v53 = vadd.f32 %v8067_v42, %v1646_v41  ;;  %v211_v44 = vld [vmem:[%s10759_s0 + $0x5c8] sm:$0xff]  ;;  %v210_v46 = vld [vmem:[%s10759_s0 + $0x5c0] sm:$0xff] }
 0x165   :  { %v855_v54 = vpop.permute.xlu1 %854  ;;  %v850_v55 = vpop.permute.xlu0 %849  ;;  %v3879_v57 = vmul.f32 0.01, %v2635_v45  ;;  %v2401_v11 = vmax.f32 %v1901_v36, %v2151_v52 }
 0x166   :  { %v2152_v58 = vmul.f32 0.01, %v1902_v49  ;;  %v1648_v59 = vmul.f32 %v8054_v38, %v855_v54  ;;  %v6544_v60 = vpop.f32.mrb[2].mxu0  ;;  %v1647_v61 = vmul.f32 %v8054_v38, %v850_v55  ;;  %1174 = vperm.xlu1 %7387, %v205_v47   ;;  %1169 = vperm.xlu0 %7386, %v204_v48   ;;  %v3878_v0 = vmul.f32 0.01, %v2630_v50 }
 0x167   :  { %v2645_v62 = vadd.f32 %v6544_v60, %v8323_v34  ;;  %v2639_v63 = vpop.f32.mrb[3].mxu0  ;;  %6702 = vmatmul.mubr.f32.gmra.mrb[108].mxu0 %v2399_v56  ;;  %v2153_v7 = vmul.f32 0.01, %v8338_v53  ;;  %v4129_v12 = vmax.f32 %v2635_v45, %v3879_v57  ;;  %v8392_v57 = vld [vmem:[%s10761_s1] ss:$0 sm:$0xff] }
 0x168   :  { %v8350_v3 = vadd.f32 %v8067_v42, %v1648_v59  ;;  %v1904_v4 = vadd.f32 %v8067_v42, %v1647_v61  ;;  %v2640_v5 = vadd.f32 %v8323_v34, %v2639_v63  ;;  %6704 = vmatprep.mubr.f32.mxu0 %v2400_v51  ;;  %v2402_v6 = vmax.f32 %v1902_v49, %v2152_v58  ;;  %v213_v61 = vld [vmem:[%s10759_s0 + $0x5d8] sm:$0xff]  ;;  %v8403_v63 = vld [vmem:[%s10762_s2] ss:$0 sm:$0xff] }
 0x169   :  { %v865_v8 = vpop.permute.xlu1 %864  ;;  %v4128_v9 = vmax.f32 %v2630_v50, %v3878_v0  ;;  %v860_v10 = vpop.permute.xlu0 %859  ;;  %v3881_v13 = vmul.f32 0.01, %v2645_v62  ;;  %v2403_v31 = vmax.f32 %v8338_v53, %v2153_v7 }
 0x16a   :  { %v2154_v14 = vmul.f32 0.01, %v1904_v4  ;;  %v3880_v15 = vmul.f32 0.01, %v2640_v5  ;;  %1184 = vperm.xlu1 %7387, %v207_v1   ;;  %1179 = vperm.xlu0 %7386, %v206_v2   ;;  %v1650_v16 = vmul.f32 %v8054_v38, %v865_v8  ;;  %v6547_v17 = vpop.f32.mrb[4].mxu0  ;;  %v1649_v18 = vmul.f32 %v8054_v38, %v860_v10 }
 0x16b   :  { %6946 = vmatprep.mubr.f32.mxu1 %v4128_v9  ;;  %6705 = vmatmul.mubr.f32.gmra.mrb[110].mxu0 %v2401_v11  ;;  %v2155_v20 = vmul.f32 0.01, %v8350_v3  ;;  %v2655_v22 = vadd.f32 %v6547_v17, %v8323_v34  ;;  %v2649_v23 = vpop.f32.mrb[5].mxu0  ;;  %v4131_v33 = vmax.f32 %v2645_v62, %v3881_v13 }
 0x16c   :  { %v4130_v21 = vmax.f32 %v2640_v5, %v3880_v15  ;;  %6947 = vmatmul.mubr.f32.vlgmr.msra.gmra.mrb[0].mxu1 %v4129_v12  ;;  %6707 = vmatprep.mubr.f32.mxu0 %v2402_v6  ;;  %v1906_v26 = vadd.f32 %v8067_v42, %v1649_v18  ;;  %v2650_v27 = vadd.f32 %v8323_v34, %v2649_v23 }
 0x16d   :  { %v875_v29 = vpop.permute.xlu1 %874  ;;  %v870_v30 = vpop.permute.xlu0 %869  ;;  %v2404_v32 = vmax.f32 %v1904_v4, %v2154_v14  ;;  %v3883_v35 = vmul.f32 0.01, %v2655_v22  ;;  %v8371_v39 = vadd.f32 %v8067_v42, %v1650_v16  ;;  %v2405_v47 = vmax.f32 %v8350_v3, %v2155_v20  ;;  %v212_v3 = vld [vmem:[%s10759_s0 + $0x5d0] sm:$0xff]  ;;  %v215_v20 = vld [vmem:[%s10759_s0 + $0x5e8] sm:$0xff] }
 0x16e   :  { %v1652_v25 = vmul.f32 %v8054_v38, %v875_v29  ;;  %v6550_v36 = vpop.f32.mrb[6].mxu0  ;;  %6949 = vmatprep.mubr.f32.mxu1 %v4130_v21  ;;  %v1651_v37 = vmul.f32 %v8054_v38, %v870_v30  ;;  %1194 = vperm.xlu1 %7387, %v209_v19   ;;  %v2156_v40 = vmul.f32 0.01, %v1906_v26  ;;  %v3882_v28 = vmul.f32 0.01, %v2650_v27 }
 0x16f   :  { %v2665_v41 = vadd.f32 %v6550_v36, %v8323_v34  ;;  %v2659_v43 = vpop.f32.mrb[7].mxu0  ;;  %1189 = vperm.xlu0 %7386, %v208_v24   ;;  %6708 = vmatmul.mubr.f32.gmra.mrb[112].mxu0 %v2403_v31  ;;  %v4133_v54 = vmax.f32 %v2655_v22, %v3883_v35  ;;  %v214_v24 = vld [vmem:[%s10759_s0 + $0x5e0] sm:$0xff] }
 0x170   :  { %v8378_v45 = vadd.f32 %v8067_v42, %v1651_v37  ;;  %v2660_v38 = vadd.f32 %v8323_v34, %v2659_v43  ;;  %6950 = vmatmul.mubr.f32.gmra.mrb[2].mxu1 %v4131_v33  ;;  %v4132_v48 = vmax.f32 %v2650_v27, %v3882_v28  ;;  %v8386_v49 = vadd.f32 %v8067_v42, %v1652_v25 }
 0x171   :  { %v3885_v50 = vmul.f32 0.01, %v2665_v41  ;;  %6710 = vmatprep.mubr.f32.mxu0 %v2404_v32  ;;  %v885_v51 = vpop.permute.xlu1 %884  ;;  %v880_v52 = vpop.permute.xlu0 %879  ;;  %v2406_v53 = vmax.f32 %v1906_v26, %v2156_v40  ;;  %v2157_v42 = vmul.f32 0.01, %v8371_v39 }
 0x172   :  { %v2158_v55 = vmul.f32 0.01, %v8378_v45  ;;  %v3884_v56 = vmul.f32 0.01, %v2660_v38  ;;  %v1654_v58 = vmul.f32 %v8392_v57, %v885_v51  ;;  %1204 = vperm.xlu1 %7387, %v211_v44   ;;  %v6553_v59 = vpop.f32.mrb[8].mxu0  ;;  %6952 = vmatprep.mubr.f32.mxu1 %v4132_v48  ;;  %v1653_v60 = vmul.f32 %v8392_v57, %v880_v52  ;;  %v217_v44 = vld [vmem:[%s10759_s0 + $0x5f8] sm:$0xff] }
 0x173   :  { %1199 = vperm.xlu0 %7386, %v210_v46   ;;  %v2675_v1 = vadd.f32 %v6553_v59, %v8323_v34  ;;  %v2669_v2 = vpop.f32.mrb[9].mxu0  ;;  %6711 = vmatmul.mubr.f32.gmra.mrb[114].mxu0 %v2405_v47  ;;  %v2159_v4 = vmul.f32 0.01, %v8386_v49  ;;  %v4135_v5 = vmax.f32 %v2665_v41, %v3885_v50  ;;  %v2407_v19 = vmax.f32 %v8371_v39, %v2157_v42 }
 0x174   :  { %v4134_v62 = vmax.f32 %v2660_v38, %v3884_v56  ;;  %v8406_v0 = vadd.f32 %v8403_v63, %v1654_v58  ;;  %6953 = vmatmul.mubr.f32.gmra.mrb[4].mxu1 %v4133_v54  ;;  %v1910_v6 = vadd.f32 %v8403_v63, %v1653_v60  ;;  %v2670_v7 = vadd.f32 %v8323_v34, %v2669_v2 }
 0x175   :  { %6713 = vmatprep.mubr.f32.mxu0 %v2406_v53  ;;  %v895_v8 = vpop.permute.xlu1 %894  ;;  %v890_v9 = vpop.permute.xlu0 %889  ;;  %v3887_v10 = vmul.f32 0.01, %v2675_v1  ;;  %v2408_v14 = vmax.f32 %v8378_v45, %v2158_v55  ;;  %v2409_v40 = vmax.f32 %v8386_v49, %v2159_v4  ;;  %v216_v45 = vld [vmem:[%s10759_s0 + $0x5f0] sm:$0xff] }
 0x176   :  { %v1656_v11 = vmul.f32 %v8392_v57, %v895_v8  ;;  %v6556_v12 = vpop.f32.mrb[10].mxu0  ;;  %6955 = vmatprep.mubr.f32.mxu1 %v4134_v62  ;;  %v1655_v13 = vmul.f32 %v8392_v57, %v890_v9  ;;  %1214 = vperm.xlu1 %7387, %v213_v61   ;;  %v2160_v15 = vmul.f32 0.01, %v1910_v6  ;;  %v3886_v16 = vmul.f32 0.01, %v2670_v7  ;;  %v218_v8 = vld [vmem:[%s10759_s0 + $0x600] sm:$0xff] }
 0x177   :  { %v2685_v17 = vadd.f32 %v6556_v12, %v8323_v34  ;;  %v2679_v18 = vpop.f32.mrb[11].mxu0  ;;  %1209 = vperm.xlu0 %7386, %v212_v3   ;;  %v2161_v21 = vmul.f32 0.01, %v8406_v0  ;;  %6714 = vmatmul.mubr.f32.gmra.mrb[116].mxu0 %v2407_v19  ;;  %v4137_v32 = vmax.f32 %v2675_v1, %v3887_v10  ;;  %v219_v1 = vld [vmem:[%s10759_s0 + $0x608] sm:$0xff] }
 0x178   :  { %v8425_v22 = vadd.f32 %v8403_v63, %v1655_v13  ;;  %v2680_v23 = vadd.f32 %v8323_v34, %v2679_v18  ;;  %6956 = vmatmul.mubr.f32.gmra.mrb[6].mxu1 %v4135_v5  ;;  %v4136_v26 = vmax.f32 %v2670_v7, %v3886_v16  ;;  %v8432_v27 = vadd.f32 %v8403_v63, %v1656_v11 }
 0x179   :  { %v3889_v29 = vmul.f32 0.01, %v2685_v17  ;;  %v905_v30 = vpop.permute.xlu1 %904  ;;  %v900_v31 = vpop.permute.xlu0 %899  ;;  %6716 = vmatprep.mubr.f32.mxu0 %v2408_v14  ;;  %v2410_v25 = vmax.f32 %v1910_v6, %v2160_v15  ;;  %v2411_v38 = vmax.f32 %v8406_v0, %v2161_v21  ;;  %v221_v21 = vld [vmem:[%s10759_s0 + $0x618] sm:$0xff] }
 0x17a   :  { %v2162_v33 = vmul.f32 0.01, %v8425_v22  ;;  %v3888_v35 = vmul.f32 0.01, %v2680_v23  ;;  %1224 = vperm.xlu1 %7387, %v215_v20   ;;  %v1658_v36 = vmul.f32 %v8392_v57, %v905_v30  ;;  %v6559_v37 = vpop.f32.mrb[12].mxu0  ;;  %6958 = vmatprep.mubr.f32.mxu1 %v4136_v26  ;;  %v1657_v39 = vmul.f32 %v8392_v57, %v900_v31 }
 0x17b   :  { %1219 = vperm.xlu0 %7386, %v214_v24   ;;  %v2695_v41 = vadd.f32 %v6559_v37, %v8323_v34  ;;  %v2689_v43 = vpop.f32.mrb[13].mxu0  ;;  %v2163_v46 = vmul.f32 0.01, %v8432_v27  ;;  %v4139_v47 = vmax.f32 %v2685_v17, %v3889_v29  ;;  %6717 = vmatmul.mubr.f32.gmra.mrb[118].mxu0 %v2409_v40 }
 0x17c   :  { %v4138_v28 = vmax.f32 %v2680_v23, %v3888_v35  ;;  %6959 = vmatmul.mubr.f32.gmra.mrb[8].mxu1 %v4137_v32  ;;  %v1914_v48 = vadd.f32 %v8403_v63, %v1657_v39  ;;  %v2690_v49 = vadd.f32 %v8323_v34, %v2689_v43  ;;  %6719 = vmatprep.mubr.f32.mxu0 %v2410_v25  ;;  %v220_v35 = vld [vmem:[%s10759_s0 + $0x610] sm:$0xff] }
 0x17d   :  { %v915_v50 = vpop.permute.xlu1 %914  ;;  %v910_v51 = vpop.permute.xlu0 %909  ;;  %v3891_v52 = vmul.f32 0.01, %v2695_v41  ;;  %v2412_v56 = vmax.f32 %v8425_v22, %v2162_v33  ;;  %v8453_v58 = vadd.f32 %v8403_v63, %v1658_v36  ;;  %v2413_v16 = vmax.f32 %v8432_v27, %v2163_v46 }
 0x17e   :  { %v1660_v53 = vmul.f32 %v8392_v57, %v915_v50  ;;  %v6562_v54 = vpop.f32.mrb[14].mxu0  ;;  %6961 = vmatprep.mubr.f32.mxu1 %v4138_v28  ;;  %v1659_v55 = vmul.f32 %v8392_v57, %v910_v51  ;;  %v2164_v42 = vmul.f32 0.01, %v1914_v48  ;;  %v3890_v59 = vmul.f32 0.01, %v2690_v49  ;;  %1234 = vperm.xlu1 %7387, %v217_v44  }
 0x17f   :  { %v2705_v60 = vadd.f32 %v6562_v54, %v8323_v34  ;;  %v2699_v61 = vpop.f32.mrb[15].mxu0  ;;  %1229 = vperm.xlu0 %7386, %v216_v45   ;;  %v4141_v2 = vmax.f32 %v2695_v41, %v3891_v52  ;;  %6720 = vmatmul.mubr.f32.gmra.mrb[120].mxu0 %v2411_v38  ;;  %v2165_v13 = vmul.f32 0.01, %v8453_v58  ;;  %v223_v45 = vld [vmem:[%s10759_s0 + $0x628] sm:$0xff] }
 0x180   :  { %v8457_v62 = vadd.f32 %v8403_v63, %v1659_v55  ;;  %v2700_v0 = vadd.f32 %v8323_v34, %v2699_v61  ;;  %6962 = vmatmul.mubr.f32.gmra.mrb[10].mxu1 %v4139_v47  ;;  %v4140_v3 = vmax.f32 %v2690_v49, %v3890_v59  ;;  %v8464_v4 = vadd.f32 %v8403_v63, %v1660_v53  ;;  %v222_v53 = vld [vmem:[%s10759_s0 + $0x620] sm:$0xff] }
 0x181   :  { %v3893_v5 = vmul.f32 0.01, %v2705_v60  ;;  %v925_v6 = vpop.permute.xlu1 %924  ;;  %v920_v7 = vpop.permute.xlu0 %919  ;;  %6722 = vmatprep.mubr.f32.mxu0 %v2412_v56  ;;  %v2414_v12 = vmax.f32 %v1914_v48, %v2164_v42  ;;  %v2415_v28 = vmax.f32 %v8453_v58, %v2165_v13 }
 0x182   :  { %v2166_v9 = vmul.f32 0.01, %v8457_v62  ;;  %v3892_v10 = vmul.f32 0.01, %v2700_v0  ;;  %v1662_v11 = vmul.f32 %v8392_v57, %v925_v6  ;;  %v6565_v14 = vpop.f32.mrb[16].mxu0  ;;  %6964 = vmatprep.mubr.f32.mxu1 %v4140_v3  ;;  %v1661_v15 = vmul.f32 %v8392_v57, %v920_v7  ;;  %1244 = vperm.xlu1 %7387, %v219_v1  }
 0x183   :  { %v2715_v19 = vadd.f32 %v6565_v14, %v8323_v34  ;;  %v2709_v20 = vpop.f32.mrb[17].mxu0  ;;  %1239 = vperm.xlu0 %7386, %v218_v8   ;;  %v2167_v22 = vmul.f32 0.01, %v8464_v4  ;;  %v4143_v23 = vmax.f32 %v2705_v60, %v3893_v5  ;;  %6723 = vmatmul.mubr.f32.gmra.mrb[122].mxu0 %v2413_v16 }
 0x184   :  { %v4142_v17 = vmax.f32 %v2700_v0, %v3892_v10  ;;  %v8475_v18 = vadd.f32 %v8403_v63, %v1662_v11  ;;  %6965 = vmatmul.mubr.f32.gmra.mrb[12].mxu1 %v4141_v2  ;;  %v1918_v24 = vadd.f32 %v8403_v63, %v1661_v15  ;;  %v2710_v26 = vadd.f32 %v8323_v34, %v2709_v20  ;;  %v224_v11 = vld [vmem:[%s10759_s0 + $0x630] sm:$0xff]  ;;  %v227_v20 = vld [vmem:[%s10759_s0 + $0x648] sm:$0xff] }
 0x185   :  { %v935_v27 = vpop.permute.xlu1 %934  ;;  %v930_v29 = vpop.permute.xlu0 %929  ;;  %v3895_v30 = vmul.f32 0.01, %v2715_v19  ;;  %6725 = vmatprep.mubr.f32.mxu0 %v2414_v12  ;;  %v2416_v25 = vmax.f32 %v8457_v62, %v2166_v9  ;;  %v2417_v42 = vmax.f32 %v8464_v4, %v2167_v22  ;;  %v225_v62 = vld [vmem:[%s10759_s0 + $0x638] sm:$0xff] }
 0x186   :  { %v1664_v31 = vmul.f32 %v8392_v57, %v935_v27  ;;  %v6568_v32 = vpop.f32.mrb[18].mxu0  ;;  %6967 = vmatprep.mubr.f32.mxu1 %v4142_v17  ;;  %v1663_v33 = vmul.f32 %v8392_v57, %v930_v29  ;;  %v2168_v36 = vmul.f32 0.01, %v1918_v24  ;;  %v3894_v37 = vmul.f32 0.01, %v2710_v26  ;;  %1254 = vperm.xlu1 %7387, %v221_v21  }
 0x187   :  { %v2725_v39 = vadd.f32 %v6568_v32, %v8323_v34  ;;  %v2719_v40 = vpop.f32.mrb[19].mxu0  ;;  %v2169_v41 = vmul.f32 0.01, %v8475_v18  ;;  %1249 = vperm.xlu0 %7386, %v220_v35   ;;  %6726 = vmatmul.mubr.f32.gmra.mrb[124].mxu0 %v2415_v28  ;;  %v4145_v50 = vmax.f32 %v2715_v19, %v3895_v30  ;;  %v226_v32 = vld [vmem:[%s10759_s0 + $0x640] sm:$0xff] }
 0x188   :  { %v8494_v43 = vadd.f32 %v8403_v63, %v1663_v33  ;;  %v2720_v44 = vadd.f32 %v8323_v34, %v2719_v40  ;;  %6968 = vmatmul.mubr.f32.gmra.mrb[14].mxu1 %v4143_v23  ;;  %v4144_v38 = vmax.f32 %v2710_v26, %v3894_v37  ;;  %v8501_v46 = vadd.f32 %v8403_v63, %v1664_v31 }
 0x189   :  { %v3897_v47 = vmul.f32 0.01, %v2725_v39  ;;  %v945_v48 = vpop.permute.xlu1 %944  ;;  %v940_v49 = vpop.permute.xlu0 %939  ;;  %6728 = vmatprep.mubr.f32.mxu0 %v2416_v25  ;;  %v2418_v54 = vmax.f32 %v1918_v24, %v2168_v36  ;;  %v2419_v0 = vmax.f32 %v8475_v18, %v2169_v41 }
 0x18a   :  { %v2170_v51 = vmul.f32 0.01, %v8494_v43  ;;  %v3896_v52 = vmul.f32 0.01, %v2720_v44  ;;  %v1666_v55 = vmul.f32 %v8392_v57, %v945_v48  ;;  %v6571_v56 = vpop.f32.mrb[20].mxu0  ;;  %6970 = vmatprep.mubr.f32.mxu1 %v4144_v38  ;;  %v1665_v58 = vmul.f32 %v8392_v57, %v940_v49  ;;  %1264 = vperm.xlu1 %7387, %v223_v45  }
 0x18b   :  { %v2735_v60 = vadd.f32 %v6571_v56, %v8323_v34  ;;  %v2729_v61 = vpop.f32.mrb[21].mxu0  ;;  %v2171_v1 = vmul.f32 0.01, %v8501_v46  ;;  %v4147_v2 = vmax.f32 %v2725_v39, %v3897_v47  ;;  %1259 = vperm.xlu0 %7386, %v222_v53   ;;  %6729 = vmatmul.mubr.f32.gmra.mrb[126].mxu0 %v2417_v42  ;;  %v228_v53 = vld [vmem:[%s10759_s0 + $0x650] sm:$0xff] }
 0x18c   :  { %v4146_v59 = vmax.f32 %v2720_v44, %v3896_v52  ;;  %6971 = vmatmul.mubr.f32.gmra.mrb[16].mxu1 %v4145_v50  ;;  %v1922_v3 = vadd.f32 %v8403_v63, %v1665_v58  ;;  %v2730_v5 = vadd.f32 %v8323_v34, %v2729_v61  ;;  %6731 = vmatprep.mubr.f32.mxu0 %v2418_v54 }
 0x18d   :  { %v955_v4 = vpop.permute.xlu1 %954  ;;  %v950_v6 = vpop.permute.xlu0 %949  ;;  %v3899_v7 = vmul.f32 0.01, %v2735_v60  ;;  %v2420_v12 = vmax.f32 %v8494_v43, %v2170_v51  ;;  %v8525_v13 = vadd.f32 %v8403_v63, %v1666_v55  ;;  %v2421_v37 = vmax.f32 %v8501_v46, %v2171_v1  ;;  %v229_v43 = vld [vmem:[%s10759_s0 + $0x658] sm:$0xff] }
 0x18e   :  { %v1668_v8 = vmul.f32 %v8392_v57, %v955_v4  ;;  %v6574_v9 = vpop.f32.mrb[22].mxu0  ;;  %6973 = vmatprep.mubr.f32.mxu1 %v4146_v59  ;;  %v1667_v10 = vmul.f32 %v8392_v57, %v950_v6  ;;  %v2172_v14 = vmul.f32 0.01, %v1922_v3  ;;  %v3898_v15 = vmul.f32 0.01, %v2730_v5  ;;  %1274 = vperm.xlu1 %7387, %v225_v62  }
 0x18f   :  { %v2745_v16 = vadd.f32 %v6574_v9, %v8323_v34  ;;  %v2739_v17 = vpop.f32.mrb[23].mxu0  ;;  %v4149_v21 = vmax.f32 %v2735_v60, %v3899_v7  ;;  %1269 = vperm.xlu0 %7386, %v224_v11   ;;  %6732 = vmatmul.mubr.f32.gmra.mrb[128].mxu0 %v2419_v0  ;;  %v2173_v35 = vmul.f32 0.01, %v8525_v13  ;;  %v231_v0 = vld [vmem:[%s10759_s0 + $0x668] sm:$0xff]  ;;  %v230_v9 = vld [vmem:[%s10759_s0 + $0x660] sm:$0xff] }
 0x190   :  { %v8529_v18 = vadd.f32 %v8403_v63, %v1667_v10  ;;  %v2740_v19 = vadd.f32 %v8323_v34, %v2739_v17  ;;  %6974 = vmatmul.mubr.f32.gmra.mrb[18].mxu1 %v4147_v2  ;;  %v4148_v22 = vmax.f32 %v2730_v5, %v3898_v15  ;;  %v8536_v23 = vadd.f32 %v8403_v63, %v1668_v8 }
 0x191   :  { %v3901_v24 = vmul.f32 0.01, %v2745_v16  ;;  %v965_v26 = vpop.permute.xlu1 %964  ;;  %v960_v27 = vpop.permute.xlu0 %959  ;;  %6734 = vmatprep.mubr.f32.mxu0 %v2420_v12  ;;  %v2422_v33 = vmax.f32 %v1922_v3, %v2172_v14  ;;  %v2423_v59 = vmax.f32 %v8525_v13, %v2173_v35 }
 0x192   :  { %v2174_v29 = vmul.f32 0.01, %v8529_v18  ;;  %v3900_v30 = vmul.f32 0.01, %v2740_v19  ;;  %v1670_v31 = vmul.f32 %v8392_v57, %v965_v26  ;;  %v6577_v25 = vpop.f32.mrb[24].mxu0  ;;  %6976 = vmatprep.mubr.f32.mxu1 %v4148_v22  ;;  %v1669_v36 = vmul.f32 %v8392_v57, %v960_v27  ;;  %1284 = vperm.xlu1 %7387, %v227_v20  }
 0x193   :  { %v2755_v28 = vadd.f32 %v6577_v25, %v8323_v34  ;;  %v2749_v41 = vpop.f32.mrb[25].mxu0  ;;  %v2175_v44 = vmul.f32 0.01, %v8536_v23  ;;  %v4151_v45 = vmax.f32 %v2745_v16, %v3901_v24  ;;  %1279 = vperm.xlu0 %7386, %v226_v32   ;;  %6735 = vmatmul.mubr.f32.gmra.mrb[130].mxu0 %v2421_v37  ;;  %v232_v32 = vld [vmem:[%s10759_s0 + $0x670] sm:$0xff] }
 0x194   :  { %v4150_v39 = vmax.f32 %v2740_v19, %v3900_v30  ;;  %v8547_v40 = vadd.f32 %v8403_v63, %v1670_v31  ;;  %6977 = vmatmul.mubr.f32.gmra.mrb[20].mxu1 %v4149_v21  ;;  %v1926_v38 = vadd.f32 %v8403_v63, %v1669_v36  ;;  %v2750_v47 = vadd.f32 %v8323_v34, %v2749_v41  ;;  %v235_v41 = vld [vmem:[%s10759_s0 + $0x688] sm:$0xff] }
 0x195   :  { %v975_v46 = vpop.permute.xlu1 %974  ;;  %v970_v48 = vpop.permute.xlu0 %969  ;;  %v3903_v49 = vmul.f32 0.01, %v2755_v28  ;;  %6737 = vmatprep.mubr.f32.mxu0 %v2422_v33  ;;  %v2424_v54 = vmax.f32 %v8529_v18, %v2174_v29  ;;  %v2425_v14 = vmax.f32 %v8536_v23, %v2175_v44  ;;  %v233_v18 = vld [vmem:[%s10759_s0 + $0x678] sm:$0xff] }
 0x196   :  { %v1672_v50 = vmul.f32 %v8392_v57, %v975_v46  ;;  %v6580_v51 = vpop.f32.mrb[26].mxu0  ;;  %6979 = vmatprep.mubr.f32.mxu1 %v4150_v39  ;;  %v1671_v52 = vmul.f32 %v8392_v57, %v970_v48  ;;  %v2176_v55 = vmul.f32 0.01, %v1926_v38  ;;  %v3902_v56 = vmul.f32 0.01, %v2750_v47  ;;  %1294 = vperm.xlu1 %7387, %v229_v43  }
 0x197   :  { %v2765_v58 = vadd.f32 %v6580_v51, %v8323_v34  ;;  %v2759_v42 = vpop.f32.mrb[27].mxu0  ;;  %v2177_v60 = vmul.f32 0.01, %v8547_v40  ;;  %1289 = vperm.xlu0 %7386, %v228_v53   ;;  %6738 = vmatmul.mubr.f32.gmra.mrb[132].mxu0 %v2423_v59  ;;  %v4153_v6 = vmax.f32 %v2755_v28, %v3903_v49  ;;  %v234_v51 = vld [vmem:[%s10759_s0 + $0x680] sm:$0xff] }
 0x198   :  { %v8566_v61 = vadd.f32 %v8403_v63, %v1671_v52  ;;  %v2760_v62 = vadd.f32 %v8323_v34, %v2759_v42  ;;  %6980 = vmatmul.mubr.f32.gmra.mrb[22].mxu1 %v4151_v45  ;;  %v4152_v1 = vmax.f32 %v2750_v47, %v3902_v56  ;;  %v8573_v2 = vadd.f32 %v8403_v63, %v1672_v50 }
 0x199   :  { %v3905_v3 = vmul.f32 0.01, %v2765_v58  ;;  %v985_v5 = vpop.permute.xlu1 %984  ;;  %v980_v4 = vpop.permute.xlu0 %979  ;;  %6740 = vmatprep.mubr.f32.mxu0 %v2424_v54  ;;  %v2426_v10 = vmax.f32 %v1926_v38, %v2176_v55  ;;  %v2427_v19 = vmax.f32 %v8547_v40, %v2177_v60 }
 0x19a   :  { %v2178_v7 = vmul.f32 0.01, %v8566_v61  ;;  %v3904_v8 = vmul.f32 0.01, %v2760_v62  ;;  %v1674_v11 = vmul.f32 %v8392_v57, %v985_v5  ;;  %v6583_v12 = vpop.f32.mrb[28].mxu0  ;;  %6982 = vmatprep.mubr.f32.mxu1 %v4152_v1  ;;  %v1673_v13 = vmul.f32 %v8392_v57, %v980_v4  ;;  %1304 = vperm.xlu1 %7387, %v231_v0  }
 0x19b   :  { %v2775_v16 = vadd.f32 %v6583_v12, %v8323_v34  ;;  %v2769_v17 = vpop.f32.mrb[29].mxu0  ;;  %v2179_v20 = vmul.f32 0.01, %v8573_v2  ;;  %v4155_v21 = vmax.f32 %v2765_v58, %v3905_v3  ;;  %1299 = vperm.xlu0 %7386, %v230_v9   ;;  %6741 = vmatmul.mubr.f32.gmra.mrb[134].mxu0 %v2425_v14  ;;  %v236_v9 = vld [vmem:[%s10759_s0 + $0x690] sm:$0xff] }
 0x19c   :  { %v4154_v15 = vmax.f32 %v2760_v62, %v3904_v8  ;;  %6983 = vmatmul.mubr.f32.gmra.mrb[24].mxu1 %v4153_v6  ;;  %v1930_v22 = vadd.f32 %v8403_v63, %v1673_v13  ;;  %v2770_v24 = vadd.f32 %v8323_v34, %v2769_v17  ;;  %6743 = vmatprep.mubr.f32.mxu0 %v2426_v10 }
 0x19d   :  { %v995_v23 = vpop.permute.xlu1 %994  ;;  %v990_v26 = vpop.permute.xlu0 %989  ;;  %v3907_v27 = vmul.f32 0.01, %v2775_v16  ;;  %v2428_v33 = vmax.f32 %v8566_v61, %v2178_v7  ;;  %v8597_v35 = vadd.f32 %v8403_v63, %v1674_v11  ;;  %v2429_v56 = vmax.f32 %v8573_v2, %v2179_v20  ;;  %v237_v61 = vld [vmem:[%s10759_s0 + $0x698] sm:$0xff] }
 0x19e   :  { %v1676_v29 = vmul.f32 %v8392_v57, %v995_v23  ;;  %v6586_v30 = vpop.f32.mrb[30].mxu0  ;;  %6985 = vmatprep.mubr.f32.mxu1 %v4154_v15  ;;  %v1675_v31 = vmul.f32 %v8392_v57, %v990_v26  ;;  %v2180_v25 = vmul.f32 0.01, %v1930_v22  ;;  %v3906_v36 = vmul.f32 0.01, %v2770_v24  ;;  %1314 = vperm.xlu1 %7387, %v233_v18  }
 0x19f   :  { %v2785_v37 = vadd.f32 %v6586_v30, %v8323_v34  ;;  %v2779_v39 = vpop.f32.mrb[31].mxu0  ;;  %v4157_v43 = vmax.f32 %v2775_v16, %v3907_v27  ;;  %1309 = vperm.xlu0 %7386, %v232_v32   ;;  %6744 = vmatmul.mubr.f32.gmra.mrb[136].mxu0 %v2427_v19  ;;  %v2181_v53 = vmul.f32 0.01, %v8597_v35  ;;  %v239_v19 = vld [vmem:[%s10759_s0 + $0x6a8] sm:$0xff]  ;;  %v238_v30 = vld [vmem:[%s10759_s0 + $0x6a0] sm:$0xff] }
 0x1a0   :  { %v8601_v40 = vadd.f32 %v8403_v63, %v1675_v31  ;;  %v2780_v28 = vadd.f32 %v8323_v34, %v2779_v39  ;;  %6986 = vmatmul.mubr.f32.gmra.mrb[26].mxu1 %v4155_v21  ;;  %v4156_v44 = vmax.f32 %v2770_v24, %v3906_v36  ;;  %v8608_v45 = vadd.f32 %v8403_v63, %v1676_v29 }
 0x1a1   :  { %v3909_v38 = vmul.f32 0.01, %v2785_v37  ;;  %v1005_v47 = vpop.permute.xlu1 %1004  ;;  %v1000_v46 = vpop.permute.xlu0 %999  ;;  %6746 = vmatprep.mubr.f32.mxu0 %v2428_v33  ;;  %v2430_v52 = vmax.f32 %v1930_v22, %v2180_v25  ;;  %v2431_v15 = vmax.f32 %v8597_v35, %v2181_v53 }
 0x1a2   :  { %v2182_v48 = vmul.f32 0.01, %v8601_v40  ;;  %v3908_v49 = vmul.f32 0.01, %v2780_v28  ;;  %v1678_v50 = vmul.f32 %v8392_v57, %v1005_v47  ;;  %v6589_v54 = vpop.f32.mrb[32].mxu0  ;;  %6988 = vmatprep.mubr.f32.mxu1 %v4156_v44  ;;  %v1677_v55 = vmul.f32 %v8392_v57, %v1000_v46  ;;  %1324 = vperm.xlu1 %7387, %v235_v41  }
 0x1a3   :  { %v2795_v59 = vadd.f32 %v6589_v54, %v8323_v34  ;;  %v2789_v60 = vpop.f32.mrb[33].mxu0  ;;  %v2183_v62 = vmul.f32 0.01, %v8608_v45  ;;  %v4159_v0 = vmax.f32 %v2785_v37, %v3909_v38  ;;  %1319 = vperm.xlu0 %7386, %v234_v51   ;;  %6747 = vmatmul.mubr.f32.gmra.mrb[138].mxu0 %v2429_v56  ;;  %v240_v51 = vld [vmem:[%s10759_s0 + $0x6b0] sm:$0xff] }
 0x1a4   :  { %v4158_v58 = vmax.f32 %v2780_v28, %v3908_v49  ;;  %v8619_v42 = vadd.f32 %v8403_v63, %v1678_v50  ;;  %6989 = vmatmul.mubr.f32.gmra.mrb[28].mxu1 %v4157_v43  ;;  %v1934_v1 = vadd.f32 %v8403_v63, %v1677_v55  ;;  %v2790_v3 = vadd.f32 %v8323_v34, %v2789_v60  ;;  %v243_v60 = vld [vmem:[%s10759_s0 + $0x6c8] sm:$0xff] }
 0x1a5   :  { %v1015_v2 = vpop.permute.xlu1 %1014  ;;  %v1010_v5 = vpop.permute.xlu0 %1009  ;;  %v3911_v4 = vmul.f32 0.01, %v2795_v59  ;;  %6749 = vmatprep.mubr.f32.mxu0 %v2430_v52  ;;  %v2432_v10 = vmax.f32 %v8601_v40, %v2182_v48  ;;  %v2433_v25 = vmax.f32 %v8608_v45, %v2183_v62  ;;  %v241_v40 = vld [vmem:[%s10759_s0 + $0x6b8] sm:$0xff] }
 0x1a6   :  { %v1680_v6 = vmul.f32 %v8392_v57, %v1015_v2  ;;  %v6592_v7 = vpop.f32.mrb[34].mxu0  ;;  %6991 = vmatprep.mubr.f32.mxu1 %v4158_v58  ;;  %v1679_v8 = vmul.f32 %v8392_v57, %v1010_v5  ;;  %v2184_v11 = vmul.f32 0.01, %v1934_v1  ;;  %v3910_v12 = vmul.f32 0.01, %v2790_v3  ;;  %1334 = vperm.xlu1 %7387, %v237_v61  }
 0x1a7   :  { %v2805_v13 = vadd.f32 %v6592_v7, %v8323_v34  ;;  %v2799_v14 = vpop.f32.mrb[35].mxu0  ;;  %v2185_v16 = vmul.f32 0.01, %v8619_v42  ;;  %1329 = vperm.xlu0 %7386, %v236_v9   ;;  %6750 = vmatmul.mubr.f32.gmra.mrb[140].mxu0 %v2431_v15  ;;  %v4161_v26 = vmax.f32 %v2795_v59, %v3911_v4 }
 0x1a8   :  { %v8638_v17 = vadd.f32 %v8403_v63, %v1679_v8  ;;  %v2800_v18 = vadd.f32 %v8323_v34, %v2799_v14  ;;  %6992 = vmatmul.mubr.f32.gmra.mrb[30].mxu1 %v4159_v0  ;;  %v4160_v20 = vmax.f32 %v2790_v3, %v3910_v12  ;;  %v8645_v21 = vadd.f32 %v8403_v63, %v1680_v6  ;;  %v242_v6 = vld [vmem:[%s10759_s0 + $0x6c0] sm:$0xff] }
 0x1a9   :  { %v3913_v22 = vmul.f32 0.01, %v2805_v13  ;;  %v1025_v24 = vpop.permute.xlu1 %1024  ;;  %v1020_v23 = vpop.permute.xlu0 %1019  ;;  %6752 = vmatprep.mubr.f32.mxu0 %v2432_v10  ;;  %v2434_v31 = vmax.f32 %v1934_v1, %v2184_v11  ;;  %v2435_v28 = vmax.f32 %v8619_v42, %v2185_v16  ;;  %v8696_v14 = vld [vmem:[%s10764_s4] ss:$0 sm:$0xff] }
 0x1aa   :  { %v2186_v27 = vmul.f32 0.01, %v8638_v17  ;;  %v3912_v29 = vmul.f32 0.01, %v2800_v18  ;;  %v1682_v32 = vmul.f32 %v8392_v57, %v1025_v24  ;;  %v6595_v33 = vpop.f32.mrb[36].mxu0  ;;  %6994 = vmatprep.mubr.f32.mxu1 %v4160_v20  ;;  %v1681_v35 = vmul.f32 %v8392_v57, %v1020_v23  ;;  %1344 = vperm.xlu1 %7387, %v239_v19  }
 0x1ab   :  { %v2815_v37 = vadd.f32 %v6595_v33, %v8323_v34  ;;  %v2809_v39 = vpop.f32.mrb[37].mxu0  ;;  %v2187_v41 = vmul.f32 0.01, %v8645_v21  ;;  %v4163_v43 = vmax.f32 %v2805_v13, %v3913_v22  ;;  %1339 = vperm.xlu0 %7386, %v238_v30   ;;  %6753 = vmatmul.mubr.f32.gmra.mrb[142].mxu0 %v2433_v25  ;;  %v244_v30 = vld [vmem:[%s10759_s0 + $0x6d0] sm:$0xff] }
 0x1ac   :  { %v4162_v36 = vmax.f32 %v2800_v18, %v3912_v29  ;;  %6995 = vmatmul.mubr.f32.gmra.mrb[32].mxu1 %v4161_v26  ;;  %v1938_v44 = vadd.f32 %v8403_v63, %v1681_v35  ;;  %v2810_v38 = vadd.f32 %v8323_v34, %v2809_v39  ;;  %6755 = vmatprep.mubr.f32.mxu0 %v2434_v31 }
 0x1ad   :  { %v1035_v45 = vpop.permute.xlu1 %1034  ;;  %v1030_v47 = vpop.permute.xlu0 %1029  ;;  %v3915_v46 = vmul.f32 0.01, %v2815_v37  ;;  %v2436_v52 = vmax.f32 %v8638_v17, %v2186_v27  ;;  %v8669_v53 = vadd.f32 %v8403_v63, %v1682_v32  ;;  %v2437_v11 = vmax.f32 %v8645_v21, %v2187_v41  ;;  %v245_v17 = vld [vmem:[%s10759_s0 + $0x6d8] sm:$0xff] }
 0x1ae   :  { %v1684_v48 = vmul.f32 %v8392_v57, %v1035_v45  ;;  %v6598_v49 = vpop.f32.mrb[38].mxu0  ;;  %6997 = vmatprep.mubr.f32.mxu1 %v4162_v36  ;;  %v1683_v50 = vmul.f32 %v8392_v57, %v1030_v47  ;;  %v2188_v54 = vmul.f32 0.01, %v1938_v44  ;;  %v3914_v55 = vmul.f32 0.01, %v2810_v38  ;;  %1354 = vperm.xlu1 %7387, %v241_v40  }
 0x1af   :  { %v2825_v56 = vadd.f32 %v6598_v49, %v8323_v34  ;;  %v2819_v58 = vpop.f32.mrb[39].mxu0  ;;  %v4165_v61 = vmax.f32 %v2815_v37, %v3915_v46  ;;  %1349 = vperm.xlu0 %7386, %v240_v51   ;;  %6756 = vmatmul.mubr.f32.gmra.mrb[144].mxu0 %v2435_v28  ;;  %v2189_v8 = vmul.f32 0.01, %v8669_v53  ;;  %v247_v28 = vld [vmem:[%s10759_s0 + $0x6e8] sm:$0xff]  ;;  %v246_v49 = vld [vmem:[%s10759_s0 + $0x6e0] sm:$0xff] }
 0x1b0   :  { %v8673_v42 = vadd.f32 %v8403_v63, %v1683_v50  ;;  %v2820_v59 = vadd.f32 %v8323_v34, %v2819_v58  ;;  %6998 = vmatmul.mubr.f32.gmra.mrb[34].mxu1 %v4163_v43  ;;  %v4164_v62 = vmax.f32 %v2810_v38, %v3914_v55  ;;  %v8680_v0 = vadd.f32 %v8403_v63, %v1684_v48 }
 0x1b1   :  { %v3917_v1 = vmul.f32 0.01, %v2825_v56  ;;  %v1045_v3 = vpop.permute.xlu1 %1044  ;;  %v1040_v2 = vpop.permute.xlu0 %1039  ;;  %6758 = vmatprep.mubr.f32.mxu0 %v2436_v52  ;;  %v2438_v7 = vmax.f32 %v1938_v44, %v2188_v54  ;;  %v2439_v36 = vmax.f32 %v8669_v53, %v2189_v8 }
 0x1b2   :  { %v2190_v5 = vmul.f32 0.01, %v8673_v42  ;;  %v3916_v4 = vmul.f32 0.01, %v2820_v59  ;;  %v1686_v34 = vmul.f32 %v8392_v57, %v1045_v3  ;;  %v6601_v9 = vpop.f32.mrb[40].mxu0  ;;  %7000 = vmatprep.mubr.f32.mxu1 %v4164_v62  ;;  %v1685_v10 = vmul.f32 %v8392_v57, %v1040_v2  ;;  %1364 = vperm.xlu1 %7387, %v243_v60  }
 0x1b3   :  { %v2835_v15 = vadd.f32 %v8696_v14, %v6601_v9  ;;  %v2829_v16 = vpop.f32.mrb[41].mxu0  ;;  %v2191_v18 = vmul.f32 0.01, %v8680_v0  ;;  %v4167_v19 = vmax.f32 %v2825_v56, %v3917_v1  ;;  %1359 = vperm.xlu0 %7386, %v242_v6   ;;  %6759 = vmatmul.mubr.f32.gmra.mrb[146].mxu0 %v2437_v11  ;;  %v248_v6 = vld [vmem:[%s10759_s0 + $0x6f0] sm:$0xff] }
 0x1b4   :  { %v4166_v12 = vmax.f32 %v2820_v59, %v3916_v4  ;;  %v8691_v13 = vadd.f32 %v8403_v63, %v1686_v34  ;;  %7001 = vmatmul.mubr.f32.gmra.mrb[36].mxu1 %v4165_v61  ;;  %v1942_v20 = vadd.f32 %v8403_v63, %v1685_v10  ;;  %v2830_v21 = vadd.f32 %v8696_v14, %v2829_v16 }
 0x1b5   :  { %v1055_v22 = vpop.permute.xlu1 %1054  ;;  %v1050_v24 = vpop.permute.xlu0 %1049  ;;  %v3919_v23 = vmul.f32 0.01, %v2835_v15  ;;  %6761 = vmatprep.mubr.f32.mxu0 %v2438_v7  ;;  %v2440_v31 = vmax.f32 %v8673_v42, %v2190_v5  ;;  %v2441_v54 = vmax.f32 %v8680_v0, %v2191_v18  ;;  %v249_v42 = vld [vmem:[%s10759_s0 + $0x6f8] sm:$0xff] }
 0x1b6   :  { %v1688_v26 = vmul.f32 %v8392_v57, %v1055_v22  ;;  %v6604_v27 = vpop.f32.mrb[42].mxu0  ;;  %7003 = vmatprep.mubr.f32.mxu1 %v4166_v12  ;;  %v1687_v29 = vmul.f32 %v8392_v57, %v1050_v24  ;;  %v2192_v32 = vmul.f32 0.01, %v1942_v20  ;;  %v3918_v33 = vmul.f32 0.01, %v2830_v21  ;;  %1374 = vperm.xlu1 %7387, %v245_v17  }
 0x1b7   :  { %v2845_v35 = vadd.f32 %v8696_v14, %v6604_v27  ;;  %v2839_v25 = vpop.f32.mrb[43].mxu0  ;;  %v2193_v37 = vmul.f32 0.01, %v8691_v13  ;;  %1369 = vperm.xlu0 %7386, %v244_v30   ;;  %6762 = vmatmul.mubr.f32.gmra.mrb[148].mxu0 %v2439_v36  ;;  %v4169_v47 = vmax.f32 %v2835_v15, %v3919_v23  ;;  %v251_v15 = vld [vmem:[%s10759_s0 + $0x708] sm:$0xff]  ;;  %v8763_v23 = vld [vmem:[%s10761_s1] ss:$0 sm:$0xff] }
 0x1b8   :  { %v8715_v39 = vadd.f32 %v8403_v63, %v1687_v29  ;;  %v2840_v40 = vadd.f32 %v8696_v14, %v2839_v25  ;;  %7004 = vmatmul.mubr.f32.gmra.mrb[38].mxu1 %v4167_v19  ;;  %v4168_v41 = vmax.f32 %v2830_v21, %v3918_v33  ;;  %v8722_v43 = vadd.f32 %v8403_v63, %v1688_v26 }
 0x1b9   :  { %v3921_v44 = vmul.f32 0.01, %v2845_v35  ;;  %v1065_v38 = vpop.permute.xlu1 %1064  ;;  %v1060_v45 = vpop.permute.xlu0 %1059  ;;  %6764 = vmatprep.mubr.f32.mxu0 %v2440_v31  ;;  %v2442_v50 = vmax.f32 %v1942_v20, %v2192_v32  ;;  %v2443_v59 = vmax.f32 %v8691_v13, %v2193_v37 }
 0x1ba   :  { %v2194_v46 = vmul.f32 0.01, %v8715_v39  ;;  %v3920_v48 = vmul.f32 0.01, %v2840_v40  ;;  %v1690_v51 = vmul.f32 %v8392_v57, %v1065_v38  ;;  %v6607_v52 = vpop.f32.mrb[44].mxu0  ;;  %7006 = vmatprep.mubr.f32.mxu1 %v4168_v41  ;;  %v1689_v53 = vmul.f32 %v8392_v57, %v1060_v45  ;;  %1384 = vperm.xlu1 %7387, %v247_v28  }
 0x1bb   :  { %v2855_v56 = vadd.f32 %v8696_v14, %v6607_v52  ;;  %v2849_v58 = vpop.f32.mrb[45].mxu0  ;;  %v2195_v60 = vmul.f32 0.01, %v8722_v43  ;;  %v4171_v61 = vmax.f32 %v2845_v35, %v3921_v44  ;;  %1379 = vperm.xlu0 %7386, %v246_v49   ;;  %6765 = vmatmul.mubr.f32.gmra.mrb[150].mxu0 %v2441_v54  ;;  %v8775_v35 = vld [vmem:[%s10762_s2] ss:$0 sm:$0xff]  ;;  %v252_v49 = vld [vmem:[%s10759_s0 + $0x710] sm:$0xff] }
 0x1bc   :  { %v4170_v55 = vmax.f32 %v2840_v40, %v3920_v48  ;;  %7007 = vmatmul.mubr.f32.gmra.mrb[40].mxu1 %v4169_v47  ;;  %v1946_v62 = vadd.f32 %v8403_v63, %v1689_v53  ;;  %v2850_v1 = vadd.f32 %v8696_v14, %v2849_v58  ;;  %6767 = vmatprep.mubr.f32.mxu0 %v2442_v50 }
 0x1bd   :  { %v1075_v0 = vpop.permute.xlu1 %1074  ;;  %v1070_v3 = vpop.permute.xlu0 %1069  ;;  %v3923_v2 = vmul.f32 0.01, %v2855_v56  ;;  %v2444_v7 = vmax.f32 %v8715_v39, %v2194_v46  ;;  %v8746_v8 = vadd.f32 %v8403_v63, %v1690_v51  ;;  %v2445_v32 = vmax.f32 %v8722_v43, %v2195_v60  ;;  %v253_v39 = vld [vmem:[%s10759_s0 + $0x718] sm:$0xff] }
 0x1be   :  { %v1692_v5 = vmul.f32 %v8392_v57, %v1075_v0  ;;  %v6610_v4 = vpop.f32.mrb[46].mxu0  ;;  %7009 = vmatprep.mubr.f32.mxu1 %v4170_v55  ;;  %v1691_v34 = vmul.f32 %v8392_v57, %v1070_v3  ;;  %v2196_v9 = vmul.f32 0.01, %v1946_v62  ;;  %v3922_v10 = vmul.f32 0.01, %v2850_v1  ;;  %1394 = vperm.xlu1 %7387, %v249_v42  }
 0x1bf   :  { %v2865_v11 = vadd.f32 %v8696_v14, %v6610_v4  ;;  %v2859_v12 = vpop.f32.mrb[47].mxu0  ;;  %v4173_v16 = vmax.f32 %v2855_v56, %v3923_v2  ;;  %1389 = vperm.xlu0 %7386, %v248_v6   ;;  %6768 = vmatmul.mubr.f32.gmra.mrb[152].mxu0 %v2443_v59  ;;  %v2197_v29 = vmul.f32 0.01, %v8746_v8  ;;  %v255_v59 = vld [vmem:[%s10759_s0 + $0x728] sm:$0xff]  ;;  %v254_v4 = vld [vmem:[%s10759_s0 + $0x720] sm:$0xff] }
 0x1c0   :  { %v8750_v13 = vadd.f32 %v8403_v63, %v1691_v34  ;;  %v2860_v57 = vadd.f32 %v8696_v14, %v2859_v12  ;;  %7010 = vmatmul.mubr.f32.gmra.mrb[42].mxu1 %v4171_v61  ;;  %v4172_v17 = vmax.f32 %v2850_v1, %v3922_v10  ;;  %v8757_v18 = vadd.f32 %v8403_v63, %v1692_v5  ;;  %v250_v63 = vld [vmem:[%s10759_s0 + $0x700] sm:$0xff] }
 0x1c1   :  { %v3925_v19 = vmul.f32 0.01, %v2865_v11  ;;  %v1085_v20 = vpop.permute.xlu1 %1084  ;;  %v1080_v21 = vpop.permute.xlu0 %1079  ;;  %6770 = vmatprep.mubr.f32.mxu0 %v2444_v7  ;;  %v2446_v27 = vmax.f32 %v1946_v62, %v2196_v9  ;;  %v2447_v55 = vmax.f32 %v8746_v8, %v2197_v29 }
 0x1c2   :  { %v2198_v22 = vmul.f32 0.01, %v8750_v13  ;;  %v3924_v24 = vmul.f32 0.01, %v2860_v57  ;;  %v1694_v26 = vmul.f32 %v8763_v23, %v1085_v20  ;;  %v6613_v30 = vpop.f32.mrb[48].mxu0  ;;  %7012 = vmatprep.mubr.f32.mxu1 %v4172_v17  ;;  %v1693_v31 = vmul.f32 %v8763_v23, %v1080_v21  ;;  %1404 = vperm.xlu1 %7387, %v251_v15  }
 0x1c3   :  { %v2875_v36 = vadd.f32 %v8696_v14, %v6613_v30  ;;  %v2869_v37 = vpop.f32.mrb[49].mxu0  ;;  %v2199_v40 = vmul.f32 0.01, %v8757_v18  ;;  %v4175_v28 = vmax.f32 %v2865_v11, %v3925_v19  ;;  %1399 = vperm.xlu0 %7386, %v250_v63   ;;  %6771 = vmatmul.mubr.f32.gmra.mrb[154].mxu0 %v2445_v32  ;;  %v256_v63 = vld [vmem:[%s10759_s0 + $0x730] sm:$0xff] }
 0x1c4   :  { %v4174_v33 = vmax.f32 %v2860_v57, %v3924_v24  ;;  %v8778_v25 = vadd.f32 %v8775_v35, %v1694_v26  ;;  %7013 = vmatmul.mubr.f32.gmra.mrb[44].mxu1 %v4173_v16  ;;  %v1950_v41 = vadd.f32 %v8775_v35, %v1693_v31  ;;  %v2870_v43 = vadd.f32 %v8696_v14, %v2869_v37  ;;  %v259_v37 = vld [vmem:[%s10759_s0 + $0x748] sm:$0xff] }
 0x1c5   :  { %v1095_v44 = vpop.permute.xlu1 %1094  ;;  %v1090_v38 = vpop.permute.xlu0 %1089  ;;  %v3927_v45 = vmul.f32 0.01, %v2875_v36  ;;  %6773 = vmatprep.mubr.f32.mxu0 %v2446_v27  ;;  %v2448_v50 = vmax.f32 %v8750_v13, %v2198_v22  ;;  %v2449_v9 = vmax.f32 %v8757_v18, %v2199_v40  ;;  %v257_v13 = vld [vmem:[%s10759_s0 + $0x738] sm:$0xff] }
 0x1c6   :  { %v1696_v47 = vmul.f32 %v8763_v23, %v1095_v44  ;;  %v6616_v46 = vpop.f32.mrb[50].mxu0  ;;  %7015 = vmatprep.mubr.f32.mxu1 %v4174_v33  ;;  %v1695_v48 = vmul.f32 %v8763_v23, %v1090_v38  ;;  %v2200_v51 = vmul.f32 0.01, %v1950_v41  ;;  %v3926_v52 = vmul.f32 0.01, %v2870_v43  ;;  %1414 = vperm.xlu1 %7387, %v253_v39  }
 0x1c7   :  { %v2885_v53 = vadd.f32 %v8696_v14, %v6616_v46  ;;  %v2879_v54 = vpop.f32.mrb[51].mxu0  ;;  %v2201_v56 = vmul.f32 0.01, %v8778_v25  ;;  %1409 = vperm.xlu0 %7386, %v252_v49   ;;  %6774 = vmatmul.mubr.f32.gmra.mrb[156].mxu0 %v2447_v55  ;;  %v4177_v3 = vmax.f32 %v2875_v36, %v3927_v45  ;;  %v258_v46 = vld [vmem:[%s10759_s0 + $0x740] sm:$0xff] }
 0x1c8   :  { %v8797_v58 = vadd.f32 %v8775_v35, %v1695_v48  ;;  %v2880_v42 = vadd.f32 %v8696_v14, %v2879_v54  ;;  %7016 = vmatmul.mubr.f32.gmra.mrb[46].mxu1 %v4175_v28  ;;  %v4176_v60 = vmax.f32 %v2870_v43, %v3926_v52  ;;  %v8804_v61 = vadd.f32 %v8775_v35, %v1696_v47 }
 0x1c9   :  { %v3929_v62 = vmul.f32 0.01, %v2885_v53  ;;  %v1105_v1 = vpop.permute.xlu1 %1104  ;;  %v1100_v0 = vpop.permute.xlu0 %1099  ;;  %6776 = vmatprep.mubr.f32.mxu0 %v2448_v50  ;;  %v2450_v34 = vmax.f32 %v1950_v41, %v2200_v51  ;;  %v2451_v57 = vmax.f32 %v8778_v25, %v2201_v56 }
 0x1ca   :  { %v2202_v2 = vmul.f32 0.01, %v8797_v58  ;;  %v3928_v5 = vmul.f32 0.01, %v2880_v42  ;;  %v1698_v6 = vmul.f32 %v8763_v23, %v1105_v1  ;;  %v6619_v7 = vpop.f32.mrb[52].mxu0  ;;  %7018 = vmatprep.mubr.f32.mxu1 %v4176_v60  ;;  %v1697_v8 = vmul.f32 %v8763_v23, %v1100_v0  ;;  %1424 = vperm.xlu1 %7387, %v255_v59  }
 0x1cb   :  { %v2895_v11 = vadd.f32 %v8696_v14, %v6619_v7  ;;  %v2889_v12 = vpop.f32.mrb[53].mxu0  ;;  %v2203_v15 = vmul.f32 0.01, %v8804_v61  ;;  %v4179_v16 = vmax.f32 %v2885_v53, %v3929_v62  ;;  %1419 = vperm.xlu0 %7386, %v254_v4   ;;  %6777 = vmatmul.mubr.f32.gmra.mrb[158].mxu0 %v2449_v9  ;;  %v260_v4 = vld [vmem:[%s10759_s0 + $0x750] sm:$0xff] }
 0x1cc   :  { %v4178_v10 = vmax.f32 %v2880_v42, %v3928_v5  ;;  %7019 = vmatmul.mubr.f32.gmra.mrb[48].mxu1 %v4177_v3  ;;  %v1954_v17 = vadd.f32 %v8775_v35, %v1697_v8  ;;  %v2890_v19 = vadd.f32 %v8696_v14, %v2889_v12  ;;  %6779 = vmatprep.mubr.f32.mxu0 %v2450_v34 }
 0x1cd   :  { %v1115_v18 = vpop.permute.xlu1 %1114  ;;  %v1110_v20 = vpop.permute.xlu0 %1109  ;;  %v3931_v21 = vmul.f32 0.01, %v2895_v11  ;;  %v2452_v27 = vmax.f32 %v8797_v58, %v2202_v2  ;;  %v8828_v29 = vadd.f32 %v8775_v35, %v1698_v6  ;;  %v2453_v52 = vmax.f32 %v8804_v61, %v2203_v15  ;;  %v261_v58 = vld [vmem:[%s10759_s0 + $0x758] sm:$0xff] }
 0x1ce   :  { %v1700_v22 = vmul.f32 %v8763_v23, %v1115_v18  ;;  %v6622_v24 = vpop.f32.mrb[54].mxu0  ;;  %7021 = vmatprep.mubr.f32.mxu1 %v4178_v10  ;;  %v1699_v26 = vmul.f32 %v8763_v23, %v1110_v20  ;;  %v2204_v30 = vmul.f32 0.01, %v1954_v17  ;;  %v3930_v31 = vmul.f32 0.01, %v2890_v19  ;;  %1434 = vperm.xlu1 %7387, %v257_v13  }
 0x1cf   :  { %v2905_v32 = vadd.f32 %v8696_v14, %v6622_v24  ;;  %v2899_v33 = vpop.f32.mrb[55].mxu0  ;;  %v4181_v39 = vmax.f32 %v2895_v11, %v3931_v21  ;;  %1429 = vperm.xlu0 %7386, %v256_v63   ;;  %6780 = vmatmul.mubr.f32.gmra.mrb[160].mxu0 %v2451_v57  ;;  %v2205_v49 = vmul.f32 0.01, %v8828_v29  ;;  %v263_v57 = vld [vmem:[%s10759_s0 + $0x768] sm:$0xff]  ;;  %v262_v24 = vld [vmem:[%s10759_s0 + $0x760] sm:$0xff] }
 0x1d0   :  { %v8832_v25 = vadd.f32 %v8775_v35, %v1699_v26  ;;  %v2900_v36 = vadd.f32 %v8696_v14, %v2899_v33  ;;  %7022 = vmatmul.mubr.f32.gmra.mrb[50].mxu1 %v4179_v16  ;;  %v4180_v40 = vmax.f32 %v2890_v19, %v3930_v31  ;;  %v8839_v28 = vadd.f32 %v8775_v35, %v1700_v22 }
 0x1d1   :  { %v3933_v41 = vmul.f32 0.01, %v2905_v32  ;;  %v1125_v43 = vpop.permute.xlu1 %1124  ;;  %v1120_v44 = vpop.permute.xlu0 %1119  ;;  %6782 = vmatprep.mubr.f32.mxu0 %v2452_v27  ;;  %v2454_v48 = vmax.f32 %v1954_v17, %v2204_v30  ;;  %v2455_v10 = vmax.f32 %v8828_v29, %v2205_v49 }
 0x1d2   :  { %v2206_v38 = vmul.f32 0.01, %v8832_v25  ;;  %v3932_v45 = vmul.f32 0.01, %v2900_v36  ;;  %v1702_v47 = vmul.f32 %v8763_v23, %v1125_v43  ;;  %v6625_v50 = vpop.f32.mrb[56].mxu0  ;;  %7024 = vmatprep.mubr.f32.mxu1 %v4180_v40  ;;  %v1701_v51 = vmul.f32 %v8763_v23, %v1120_v44  ;;  %1444 = vperm.xlu1 %7387, %v259_v37  }
 0x1d3   :  { %v2915_v55 = vadd.f32 %v8696_v14, %v6625_v50  ;;  %v2909_v56 = vpop.f32.mrb[57].mxu0  ;;  %v2207_v42 = vmul.f32 0.01, %v8839_v28  ;;  %v4183_v59 = vmax.f32 %v2905_v32, %v3933_v41  ;;  %1439 = vperm.xlu0 %7386, %v258_v46   ;;  %6783 = vmatmul.mubr.f32.gmra.mrb[162].mxu0 %v2453_v52  ;;  %v264_v46 = vld [vmem:[%s10759_s0 + $0x770] sm:$0xff] }
 0x1d4   :  { %v4182_v53 = vmax.f32 %v2900_v36, %v3932_v45  ;;  %v8850_v54 = vadd.f32 %v8775_v35, %v1702_v47  ;;  %7025 = vmatmul.mubr.f32.gmra.mrb[52].mxu1 %v4181_v39  ;;  %v1958_v60 = vadd.f32 %v8775_v35, %v1701_v51  ;;  %v2910_v62 = vadd.f32 %v8696_v14, %v2909_v56  ;;  %v267_v56 = vld [vmem:[%s10759_s0 + $0x788] sm:$0xff] }
 0x1d5   :  { %v1135_v61 = vpop.permute.xlu1 %1134  ;;  %v1130_v1 = vpop.permute.xlu0 %1129  ;;  %v3935_v0 = vmul.f32 0.01, %v2915_v55  ;;  %6785 = vmatprep.mubr.f32.mxu0 %v2454_v48  ;;  %v2456_v34 = vmax.f32 %v8832_v25, %v2206_v38  ;;  %v2457_v30 = vmax.f32 %v8839_v28, %v2207_v42  ;;  %v265_v25 = vld [vmem:[%s10759_s0 + $0x778] sm:$0xff] }
 0x1d6   :  { %v1704_v3 = vmul.f32 %v8763_v23, %v1135_v61  ;;  %v6628_v2 = vpop.f32.mrb[58].mxu0  ;;  %7027 = vmatprep.mubr.f32.mxu1 %v4182_v53  ;;  %v1703_v5 = vmul.f32 %v8763_v23, %v1130_v1  ;;  %v2208_v6 = vmul.f32 0.01, %v1958_v60  ;;  %v3934_v7 = vmul.f32 0.01, %v2910_v62  ;;  %1454 = vperm.xlu1 %7387, %v261_v58  }
 0x1d7   :  { %v2925_v8 = vadd.f32 %v8696_v14, %v6628_v2  ;;  %v2919_v9 = vpop.f32.mrb[59].mxu0  ;;  %v2209_v11 = vmul.f32 0.01, %v8850_v54  ;;  %1449 = vperm.xlu0 %7386, %v260_v4   ;;  %6786 = vmatmul.mubr.f32.gmra.mrb[164].mxu0 %v2455_v10  ;;  %v4185_v20 = vmax.f32 %v2915_v55, %v3935_v0  ;;  %v266_v2 = vld [vmem:[%s10759_s0 + $0x780] sm:$0xff] }
 0x1d8   :  { %v8869_v12 = vadd.f32 %v8775_v35, %v1703_v5  ;;  %v2920_v13 = vadd.f32 %v8696_v14, %v2919_v9  ;;  %7028 = vmatmul.mubr.f32.gmra.mrb[54].mxu1 %v4183_v59  ;;  %v4184_v15 = vmax.f32 %v2910_v62, %v3934_v7  ;;  %v8876_v16 = vadd.f32 %v8775_v35, %v1704_v3 }
 0x1d9   :  { %v3937_v17 = vmul.f32 0.01, %v2925_v8  ;;  %v1145_v19 = vpop.permute.xlu1 %1144  ;;  %v1140_v18 = vpop.permute.xlu0 %1139  ;;  %6788 = vmatprep.mubr.f32.mxu0 %v2456_v34  ;;  %v2458_v26 = vmax.f32 %v1958_v60, %v2208_v6  ;;  %v2459_v36 = vmax.f32 %v8850_v54, %v2209_v11 }
 0x1da   :  { %v2210_v21 = vmul.f32 0.01, %v8869_v12  ;;  %v3936_v22 = vmul.f32 0.01, %v2920_v13  ;;  %v1706_v63 = vmul.f32 %v8763_v23, %v1145_v19  ;;  %v6631_v27 = vpop.f32.mrb[60].mxu0  ;;  %7030 = vmatprep.mubr.f32.mxu1 %v4184_v15  ;;  %v1705_v29 = vmul.f32 %v8763_v23, %v1140_v18  ;;  %1464 = vperm.xlu1 %7387, %v263_v57  }
 0x1db   :  { %v2935_v32 = vadd.f32 %v8696_v14, %v6631_v27  ;;  %v2929_v33 = vpop.f32.mrb[61].mxu0  ;;  %v2211_v37 = vmul.f32 0.01, %v8876_v16  ;;  %v4187_v39 = vmax.f32 %v2925_v8, %v3937_v17  ;;  %1459 = vperm.xlu0 %7386, %v262_v24   ;;  %6789 = vmatmul.mubr.f32.gmra.mrb[166].mxu0 %v2457_v30  ;;  %v268_v24 = vld [vmem:[%s10759_s0 + $0x790] sm:$0xff] }
 0x1dc   :  { %v4186_v31 = vmax.f32 %v2920_v13, %v3936_v22  ;;  %7031 = vmatmul.mubr.f32.gmra.mrb[56].mxu1 %v4185_v20  ;;  %v1962_v40 = vadd.f32 %v8775_v35, %v1705_v29  ;;  %v2930_v41 = vadd.f32 %v8696_v14, %v2929_v33  ;;  %6791 = vmatprep.mubr.f32.mxu0 %v2458_v26 }
 0x1dd   :  { %v1155_v28 = vpop.permute.xlu1 %1154  ;;  %v1150_v43 = vpop.permute.xlu0 %1149  ;;  %v3939_v44 = vmul.f32 0.01, %v2935_v32  ;;  %v2460_v48 = vmax.f32 %v8869_v12, %v2210_v21  ;;  %v8900_v49 = vadd.f32 %v8775_v35, %v1706_v63  ;;  %v2461_v7 = vmax.f32 %v8876_v16, %v2211_v37  ;;  %v269_v12 = vld [vmem:[%s10759_s0 + $0x798] sm:$0xff]  ;;  %v271_v37 = vld [vmem:[%s10759_s0 + $0x7a8] sm:$0xff] }
 0x1de   :  { %v1708_v38 = vmul.f32 %v8763_v23, %v1155_v28  ;;  %v6634_v45 = vpop.f32.mrb[62].mxu0  ;;  %7033 = vmatprep.mubr.f32.mxu1 %v4186_v31  ;;  %v1707_v47 = vmul.f32 %v8763_v23, %v1150_v43  ;;  %v2212_v50 = vmul.f32 0.01, %v1962_v40  ;;  %v3938_v51 = vmul.f32 0.01, %v2930_v41  ;;  %1474 = vperm.xlu1 %7387, %v265_v25  }
 0x1df   :  { %v2945_v52 = vadd.f32 %v8696_v14, %v6634_v45  ;;  %v2939_v53 = vpop.f32.mrb[63].mxu0  ;;  %v4189_v58 = vmax.f32 %v2935_v32, %v3939_v44  ;;  %1469 = vperm.xlu0 %7386, %v264_v46   ;;  %6792 = vmatmul.mubr.f32.gmra.mrb[168].mxu0 %v2459_v36  ;;  %v2213_v4 = vmul.f32 0.01, %v8900_v49 }
 0x1e0   :  { %v8904_v54 = vadd.f32 %v8775_v35, %v1707_v47  ;;  %v2940_v55 = vadd.f32 %v8696_v14, %v2939_v53  ;;  %7034 = vmatmul.mubr.f32.gmra.mrb[58].mxu1 %v4187_v39  ;;  %v4188_v42 = vmax.f32 %v2930_v41, %v3938_v51  ;;  %v8911_v59 = vadd.f32 %v8775_v35, %v1708_v38  ;;  %v270_v47 = vld [vmem:[%s10759_s0 + $0x7a0] sm:$0xff] }
 0x1e1   :  { %v3941_v60 = vmul.f32 0.01, %v2945_v52  ;;  %v1165_v62 = vpop.permute.xlu1 %1164  ;;  %v1160_v61 = vpop.permute.xlu0 %1159  ;;  %6794 = vmatprep.mubr.f32.mxu0 %v2460_v48  ;;  %v2462_v5 = vmax.f32 %v1962_v40, %v2212_v50  ;;  %v2463_v31 = vmax.f32 %v8900_v49, %v2213_v4 }
 0x1e2   :  { %v2214_v1 = vmul.f32 0.01, %v8904_v54  ;;  %v3940_v0 = vmul.f32 0.01, %v2940_v55  ;;  %v1710_v3 = vmul.f32 %v8763_v23, %v1165_v62  ;;  %v6637_v34 = vpop.f32.mrb[64].mxu0  ;;  %7036 = vmatprep.mubr.f32.mxu1 %v4188_v42  ;;  %v1709_v6 = vmul.f32 %v8763_v23, %v1160_v61  ;;  %1484 = vperm.xlu1 %7387, %v267_v56  }
 0x1e3   :  { %v2955_v10 = vadd.f32 %v8696_v14, %v6637_v34  ;;  %v2949_v11 = vpop.f32.mrb[65].mxu0  ;;  %v2215_v13 = vmul.f32 0.01, %v8911_v59  ;;  %v4191_v57 = vmax.f32 %v2945_v52, %v3941_v60  ;;  %1479 = vperm.xlu0 %7386, %v266_v2   ;;  %6795 = vmatmul.mubr.f32.gmra.mrb[170].mxu0 %v2461_v7  ;;  %v272_v2 = vld [vmem:[%s10759_s0 + $0x7b0] sm:$0xff] }
 0x1e4   :  { %v4190_v8 = vmax.f32 %v2940_v55, %v3940_v0  ;;  %v8922_v9 = vadd.f32 %v8775_v35, %v1710_v3  ;;  %7037 = vmatmul.mubr.f32.gmra.mrb[60].mxu1 %v4189_v58  ;;  %v1966_v15 = vadd.f32 %v8775_v35, %v1709_v6  ;;  %v2950_v17 = vadd.f32 %v8696_v14, %v2949_v11  ;;  %v273_v55 = vld [vmem:[%s10759_s0 + $0x7b8] sm:$0xff] }
 0x1e5   :  { %v1175_v16 = vpop.permute.xlu1 %1174  ;;  %v1170_v19 = vpop.permute.xlu0 %1169  ;;  %v3943_v18 = vmul.f32 0.01, %v2955_v10  ;;  %6797 = vmatprep.mubr.f32.mxu0 %v2462_v5  ;;  %v2464_v26 = vmax.f32 %v8904_v54, %v2214_v1  ;;  %v2465_v50 = vmax.f32 %v8911_v59, %v2215_v13 }
 0x1e6   :  { %v1712_v20 = vmul.f32 %v8763_v23, %v1175_v16  ;;  %v6640_v21 = vpop.f32.mrb[66].mxu0  ;;  %7039 = vmatprep.mubr.f32.mxu1 %v4190_v8  ;;  %v1711_v22 = vmul.f32 %v8763_v23, %v1170_v19  ;;  %v2216_v63 = vmul.f32 0.01, %v1966_v15  ;;  %v3942_v27 = vmul.f32 0.01, %v2950_v17  ;;  %1494 = vperm.xlu1 %7387, %v269_v12  }
 0x1e7   :  { %v2965_v29 = vadd.f32 %v8696_v14, %v6640_v21  ;;  %v2959_v30 = vpop.f32.mrb[67].mxu0  ;;  %v2217_v32 = vmul.f32 0.01, %v8922_v9  ;;  %v4193_v39 = vmax.f32 %v2955_v10, %v3943_v18  ;;  %1489 = vperm.xlu0 %7386, %v268_v24   ;;  %6798 = vmatmul.mubr.f32.gmra.mrb[172].mxu0 %v2463_v31  ;;  %v275_v10 = vld [vmem:[%s10759_s0 + $0x7c8] sm:$0xff] }
 0x1e8   :  { %v8941_v33 = vadd.f32 %v8775_v35, %v1712_v20  ;;  %v8944_v25 = vadd.f32 %v8775_v35, %v1711_v22  ;;  %v2960_v36 = vadd.f32 %v8696_v14, %v2959_v30  ;;  %7040 = vmatmul.mubr.f32.gmra.mrb[62].mxu1 %v4191_v57  ;;  %v4192_v40 = vmax.f32 %v2950_v17, %v3942_v27  ;;  %v274_v22 = vld [vmem:[%s10759_s0 + $0x7c0] sm:$0xff] }
 0x1e9   :  { %v3945_v41 = vmul.f32 0.01, %v2965_v29  ;;  %v1185_v28 = vpop.permute.xlu1 %1184  ;;  %v1180_v43 = vpop.permute.xlu0 %1179  ;;  %6800 = vmatprep.mubr.f32.mxu0 %v2464_v26  ;;  %v2466_v46 = vmax.f32 %v1966_v15, %v2216_v63  ;;  %v2467_v56 = vmax.f32 %v8922_v9, %v2217_v32 }
 0x1ea   :  { %v2218_v44 = vmul.f32 0.01, %v8944_v25  ;;  %v3944_v38 = vmul.f32 0.01, %v2960_v36  ;;  %v1714_v45 = vmul.f32 %v8763_v23, %v1185_v28  ;;  %v6643_v48 = vpop.f32.mrb[68].mxu0  ;;  %7042 = vmatprep.mubr.f32.mxu1 %v4192_v40  ;;  %v1713_v49 = vmul.f32 %v8763_v23, %v1180_v43  ;;  %1504 = vperm.xlu1 %7387, %v271_v37  }
 0x1eb   :  { %v2219_v51 = vmul.f32 0.01, %v8941_v33  ;;  %v2975_v53 = vadd.f32 %v8696_v14, %v6643_v48  ;;  %v2969_v54 = vpop.f32.mrb[69].mxu0  ;;  %v4195_v58 = vmax.f32 %v2965_v29, %v3945_v41  ;;  %1499 = vperm.xlu0 %7386, %v270_v47   ;;  %6801 = vmatmul.mubr.f32.gmra.mrb[174].mxu0 %v2465_v50 }
 0x1ec   :  { %v4194_v52 = vmax.f32 %v2960_v36, %v3944_v38  ;;  %7043 = vmatmul.mubr.f32.gmra.mrb[64].mxu1 %v4193_v39  ;;  %v1970_v42 = vadd.f32 %v8775_v35, %v1713_v49  ;;  %v2970_v60 = vadd.f32 %v8696_v14, %v2969_v54  ;;  %v8966_v62 = vadd.f32 %v8775_v35, %v1714_v45 }
 0x1ed   :  { %v1195_v59 = vpop.permute.xlu1 %1194  ;;  %v3947_v61 = vmul.f32 0.01, %v2975_v53  ;;  %6803 = vmatprep.mubr.f32.mxu0 %v2466_v46  ;;  %v2468_v5 = vmax.f32 %v8944_v25, %v2218_v44  ;;  %v2469_v11 = vmax.f32 %v8941_v33, %v2219_v51 }
 0x1ee   :  { %v1716_v1 = vmul.f32 %v8763_v23, %v1195_v59  ;;  %v6646_v0 = vpop.f32.mrb[70].mxu0  ;;  %7045 = vmatprep.mubr.f32.mxu1 %v4194_v52  ;;  %v1190_v3 = vpop.permute.xlu0 %1189  ;;  %v2220_v4 = vmul.f32 0.01, %v1970_v42  ;;  %v3946_v34 = vmul.f32 0.01, %v2970_v60  ;;  %1514 = vperm.xlu1 %7387, %v273_v55  }
 0x1ef   :  { %v2985_v6 = vadd.f32 %v8696_v14, %v6646_v0  ;;  %v1715_v7 = vmul.f32 %v8763_v23, %v1190_v3  ;;  %v2979_v8 = vpop.f32.mrb[71].mxu0  ;;  %1509 = vperm.xlu0 %7386, %v272_v2   ;;  %6804 = vmatmul.mubr.f32.gmra.mrb[176].mxu0 %v2467_v56  ;;  %v4197_v16 = vmax.f32 %v2975_v53, %v3947_v61  ;;  %v2221_v26 = vmul.f32 0.01, %v8966_v62 }
 0x1f0   :  { %v2980_v9 = vadd.f32 %v8696_v14, %v2979_v8  ;;  %7046 = vmatmul.mubr.f32.gmra.mrb[66].mxu1 %v4195_v58  ;;  %v4196_v12 = vmax.f32 %v2970_v60, %v3946_v34  ;;  %v8981_v13 = vadd.f32 %v8775_v35, %v1716_v1  ;;  %6806 = vmatprep.mubr.f32.mxu0 %v2468_v5 }
 0x1f1   :  { %v3949_v57 = vmul.f32 0.01, %v2985_v6  ;;  %v1972_v15 = vadd.f32 %v8775_v35, %v1715_v7  ;;  %v1205_v17 = vpop.permute.xlu1 %1204  ;;  %v2470_v24 = vmax.f32 %v1970_v42, %v2220_v4  ;;  %v2471_v49 = vmax.f32 %v8966_v62, %v2221_v26 }
 0x1f2   :  { %v3948_v19 = vmul.f32 0.01, %v2980_v9  ;;  %v1718_v18 = vmul.f32 %v8763_v23, %v1205_v17  ;;  %v6649_v20 = vpop.f32.mrb[72].mxu0  ;;  %v1200_v21 = vpop.permute.xlu0 %1199  ;;  %7048 = vmatprep.mubr.f32.mxu1 %v4196_v12  ;;  %1524 = vperm.xlu1 %7387, %v275_v10   ;;  %v2223_v33 = vmul.f32 0.01, %v8981_v13 }
 0x1f3   :  { %v2222_v63 = vmul.f32 0.01, %v1972_v15  ;;  %v2995_v27 = vadd.f32 %v8696_v14, %v6649_v20  ;;  %v1717_v29 = vmul.f32 %v8763_v23, %v1200_v21  ;;  %v2989_v30 = vpop.f32.mrb[73].mxu0  ;;  %v4199_v25 = vmax.f32 %v2985_v6, %v3949_v57  ;;  %1519 = vperm.xlu0 %7386, %v274_v22   ;;  %6807 = vmatmul.mubr.f32.gmra.mrb[178].mxu0 %v2469_v11 }
 0x1f4   :  { %v4198_v31 = vmax.f32 %v2980_v9, %v3948_v19  ;;  %v2990_v32 = vadd.f32 %v8696_v14, %v2989_v30  ;;  %7049 = vmatmul.mubr.f32.gmra.mrb[68].mxu1 %v4197_v16  ;;  %v8994_v36 = vadd.f32 %v8775_v35, %v1718_v18  ;;  %6809 = vmatprep.mubr.f32.mxu0 %v2470_v24 }
 0x1f5   :  { %v1974_v37 = vadd.f32 %v8775_v35, %v1717_v29  ;;  %v1215_v39 = vpop.permute.xlu1 %1214  ;;  %v3951_v40 = vmul.f32 0.01, %v2995_v27  ;;  %v2472_v38 = vmax.f32 %v1972_v15, %v2222_v63  ;;  %v2473_v56 = vmax.f32 %v8981_v13, %v2223_v33 }
 0x1f6   :  { %v3950_v41 = vmul.f32 0.01, %v2990_v32  ;;  %v1720_v28 = vmul.f32 %v8763_v23, %v1215_v39  ;;  %v6652_v43 = vpop.f32.mrb[74].mxu0  ;;  %7051 = vmatprep.mubr.f32.mxu1 %v4198_v31  ;;  %v1210_v44 = vpop.permute.xlu0 %1209  ;;  %v2225_v52 = vmul.f32 0.01, %v8994_v36 }
 0x1f7   :  { %v2224_v45 = vmul.f32 0.01, %v1974_v37  ;;  %v3005_v47 = vadd.f32 %v8696_v14, %v6652_v43  ;;  %v1719_v46 = vmul.f32 %v8763_v23, %v1210_v44  ;;  %v2999_v48 = vpop.f32.mrb[75].mxu0  ;;  %6810 = vmatmul.mubr.f32.gmra.mrb[180].mxu0 %v2471_v49  ;;  %v4201_v58 = vmax.f32 %v2995_v27, %v3951_v40 }
 0x1f8   :  { %v4200_v50 = vmax.f32 %v2990_v32, %v3950_v41  ;;  %v3000_v51 = vadd.f32 %v8696_v14, %v2999_v48  ;;  %7052 = vmatmul.mubr.f32.gmra.mrb[70].mxu1 %v4199_v25  ;;  %v9004_v53 = vadd.f32 %v8775_v35, %v1720_v28  ;;  %6812 = vmatprep.mubr.f32.mxu0 %v2472_v38 }
 0x1f9   :  { %v1976_v54 = vadd.f32 %v8775_v35, %v1719_v46  ;;  %v1225_v55 = vpop.permute.xlu1 %1224  ;;  %v3953_v42 = vmul.f32 0.01, %v3005_v47  ;;  %v2474_v61 = vmax.f32 %v1974_v37, %v2224_v45  ;;  %v2475_v8 = vmax.f32 %v8994_v36, %v2225_v52 }
 0x1fa   :  { %v3952_v60 = vmul.f32 0.01, %v3000_v51  ;;  %v6655_v59 = vpop.f32.mrb[76].mxu0  ;;  %7054 = vmatprep.mubr.f32.mxu1 %v4200_v50  ;;  %v1220_v62 = vpop.permute.xlu0 %1219  ;;  %v1722_v0 = vmul.f32 %v8763_v23, %v1225_v55  ;;  %v2227_v6 = vmul.f32 0.01, %v9004_v53 }
 0x1fb   :  { %v2226_v1 = vmul.f32 0.01, %v1976_v54  ;;  %v3015_v3 = vadd.f32 %v8696_v14, %v6655_v59  ;;  %v1721_v2 = vmul.f32 %v8763_v23, %v1220_v62  ;;  %v3009_v5 = vpop.f32.mrb[77].mxu0  ;;  %6813 = vmatmul.mubr.f32.gmra.mrb[182].mxu0 %v2473_v56  ;;  %v4203_v9 = vmax.f32 %v3005_v47, %v3953_v42 }
 0x1fc   :  { %v4202_v4 = vmax.f32 %v3000_v51, %v3952_v60  ;;  %v3010_v34 = vadd.f32 %v8696_v14, %v3009_v5  ;;  %7055 = vmatmul.mubr.f32.gmra.mrb[72].mxu1 %v4201_v58  ;;  %6815 = vmatprep.mubr.f32.mxu0 %v2474_v61  ;;  %v1979_v15 = vadd.f32 %v8775_v35, %v1722_v0 }
 0x1fd   :  { %v1978_v7 = vadd.f32 %v8775_v35, %v1721_v2  ;;  %v3955_v10 = vmul.f32 0.01, %v3015_v3  ;;  %v1235_v12 = vpop.permute.xlu1 %1234  ;;  %v2476_v57 = vmax.f32 %v1976_v54, %v2226_v1  ;;  %v2477_v63 = vmax.f32 %v9004_v53, %v2227_v6 }
 0x1fe   :  { %v3954_v11 = vmul.f32 0.01, %v3010_v34  ;;  %v6658_v13 = vpop.f32.mrb[78].mxu0  ;;  %7057 = vmatprep.mubr.f32.mxu1 %v4202_v4  ;;  %v1724_v16 = vmul.f32 %v8763_v23, %v1235_v12  ;;  %v1230_v18 = vpop.permute.xlu0 %1229  ;;  %v2229_v25 = vmul.f32 0.01, %v1979_v15 }
 0x1ff   :  { %v2228_v17 = vmul.f32 0.01, %v1978_v7  ;;  %v3025_v19 = vadd.f32 %v8696_v14, %v6658_v13  ;;  %v3019_v20 = vpop.f32.mrb[79].mxu0  ;;  %v1723_v22 = vmul.f32 %v8763_v23, %v1230_v18  ;;  %6816 = vmatmul.mubr.f32.gmra.mrb[184].mxu0 %v2475_v8  ;;  %v4205_v27 = vmax.f32 %v3015_v3, %v3955_v10 }
 0x200   :  { %v4204_v21 = vmax.f32 %v3010_v34, %v3954_v11  ;;  %v3020_v24 = vadd.f32 %v8696_v14, %v3019_v20  ;;  %7058 = vmatmul.mubr.f32.gmra.mrb[74].mxu1 %v4203_v9  ;;  %6818 = vmatprep.mubr.f32.mxu0 %v2476_v57  ;;  %v1981_v36 = vadd.f32 %v8775_v35, %v1724_v16 }
 0x201   :  { %v3957_v26 = vmul.f32 0.01, %v3025_v19  ;;  %v1980_v29 = vadd.f32 %v8775_v35, %v1723_v22  ;;  %v1245_v31 = vpop.permute.xlu1 %1244  ;;  %v2478_v33 = vmax.f32 %v1978_v7, %v2228_v17  ;;  %v2479_v58 = vmax.f32 %v1979_v15, %v2229_v25 }
 0x202   :  { %v3956_v30 = vmul.f32 0.01, %v3020_v24  ;;  %v6661_v32 = vpop.f32.mrb[80].mxu0  ;;  %7060 = vmatprep.mubr.f32.mxu1 %v4204_v21  ;;  %v1726_v37 = vmul.f32 %v8763_v23, %v1245_v31  ;;  %v1240_v40 = vpop.permute.xlu0 %1239  ;;  %v2231_v53 = vmul.f32 0.01, %v1981_v36 }
 0x203   :  { %v3035_v39 = vadd.f32 %v8696_v14, %v6661_v32  ;;  %v3029_v41 = vpop.f32.mrb[81].mxu0  ;;  %v2230_v28 = vmul.f32 0.01, %v1980_v29  ;;  %v1725_v44 = vmul.f32 %v8763_v23, %v1240_v40  ;;  %v4207_v45 = vmax.f32 %v3025_v19, %v3957_v26  ;;  %6819 = vmatmul.mubr.f32.gmra.mrb[186].mxu0 %v2477_v63 }
 0x204   :  { %v4206_v43 = vmax.f32 %v3020_v24, %v3956_v30  ;;  %v3030_v38 = vadd.f32 %v8696_v14, %v3029_v41  ;;  %7061 = vmatmul.mubr.f32.gmra.mrb[76].mxu1 %v4205_v27  ;;  %v9028_v47 = vadd.f32 %v8775_v35, %v1726_v37  ;;  %6821 = vmatprep.mubr.f32.mxu0 %v2478_v33  ;;  %v9035_v14 = vld [vmem:[%s10764_s4] ss:$0 sm:$0xff] }
 0x205   :  { %v3959_v46 = vmul.f32 0.01, %v3035_v39  ;;  %v1982_v48 = vadd.f32 %v8775_v35, %v1725_v44  ;;  %v1255_v50 = vpop.permute.xlu1 %1254  ;;  %v2480_v52 = vmax.f32 %v1980_v29, %v2230_v28  ;;  %v2481_v10 = vmax.f32 %v1981_v36, %v2231_v53 }
 0x206   :  { %v3958_v49 = vmul.f32 0.01, %v3030_v38  ;;  %v6664_v51 = vpop.f32.mrb[82].mxu0  ;;  %7063 = vmatprep.mubr.f32.mxu1 %v4206_v43  ;;  %v1728_v54 = vmul.f32 %v8763_v23, %v1255_v50  ;;  %v1250_v59 = vpop.permute.xlu0 %1249  ;;  %v2233_v61 = vmul.f32 0.01, %v9028_v47 }
 0x207   :  { %v3045_v55 = vadd.f32 %v9035_v14, %v6664_v51  ;;  %v3039_v56 = vpop.f32.mrb[83].mxu0  ;;  %v2232_v42 = vmul.f32 0.01, %v1982_v48  ;;  %v1727_v1 = vmul.f32 %v8763_v23, %v1250_v59  ;;  %6822 = vmatmul.mubr.f32.gmra.mrb[188].mxu0 %v2479_v58  ;;  %v4209_v0 = vmax.f32 %v3035_v39, %v3959_v46 }
 0x208   :  { %v4208_v60 = vmax.f32 %v3030_v38, %v3958_v49  ;;  %v3040_v62 = vadd.f32 %v9035_v14, %v3039_v56  ;;  %7064 = vmatmul.mubr.f32.gmra.mrb[78].mxu1 %v4207_v45  ;;  %6824 = vmatprep.mubr.f32.mxu0 %v2480_v52  ;;  %v1985_v6 = vadd.f32 %v8775_v35, %v1728_v54 }
 0x209   :  { %v3961_v3 = vmul.f32 0.01, %v3045_v55  ;;  %v1265_v5 = vpop.permute.xlu1 %1264  ;;  %v2482_v34 = vmax.f32 %v1982_v48, %v2232_v42  ;;  %v1984_v7 = vadd.f32 %v8775_v35, %v1727_v1  ;;  %v2483_v24 = vmax.f32 %v9028_v47, %v2233_v61 }
 0x20a   :  { %v3960_v2 = vmul.f32 0.01, %v3040_v62  ;;  %v6667_v4 = vpop.f32.mrb[84].mxu0  ;;  %7066 = vmatprep.mubr.f32.mxu1 %v4208_v60  ;;  %v1730_v8 = vmul.f32 %v8763_v23, %v1265_v5  ;;  %v1260_v13 = vpop.permute.xlu0 %1259  ;;  %v2235_v26 = vmul.f32 0.01, %v1985_v6 }
 0x20b   :  { %v3049_v9 = vpop.f32.mrb[85].mxu0  ;;  %v3055_v12 = vadd.f32 %v9035_v14, %v6667_v4  ;;  %v2234_v15 = vmul.f32 0.01, %v1984_v7  ;;  %v1729_v16 = vmul.f32 %v8763_v23, %v1260_v13  ;;  %6825 = vmatmul.mubr.f32.gmra.mrb[190].mxu0 %v2481_v10  ;;  %v4211_v19 = vmax.f32 %v3045_v55, %v3961_v3  ;;  %v9071_v3 = vld [vmem:[%s10761_s1] ss:$0 sm:$0xff] }
 0x20c   :  { %v4210_v11 = vmax.f32 %v3040_v62, %v3960_v2  ;;  %v3050_v57 = vadd.f32 %v9035_v14, %v3049_v9  ;;  %7067 = vmatmul.mubr.f32.gmra.mrb[80].mxu1 %v4209_v0  ;;  %v9047_v17 = vadd.f32 %v8775_v35, %v1730_v8  ;;  %6827 = vmatprep.mubr.f32.mxu0 %v2482_v34 }
 0x20d   :  { %v3963_v18 = vmul.f32 0.01, %v3055_v12  ;;  %v1275_v21 = vpop.permute.xlu1 %1274  ;;  %v1986_v63 = vadd.f32 %v8775_v35, %v1729_v16  ;;  %v2484_v25 = vmax.f32 %v1984_v7, %v2234_v15  ;;  %v2485_v48 = vmax.f32 %v1985_v6, %v2235_v26  ;;  %v9081_v15 = vld [vmem:[%s10762_s2] ss:$0 sm:$0xff] }
 0x20e   :  { %v3962_v20 = vmul.f32 0.01, %v3050_v57  ;;  %v6670_v22 = vpop.f32.mrb[86].mxu0  ;;  %7069 = vmatprep.mubr.f32.mxu1 %v4210_v11  ;;  %v1732_v27 = vmul.f32 %v8763_v23, %v1275_v21  ;;  %v1270_v32 = vpop.permute.xlu0 %1269  ;;  %v2237_v36 = vmul.f32 0.01, %v9047_v17 }
 0x20f   :  { %v3065_v29 = vadd.f32 %v9035_v14, %v6670_v22  ;;  %v3059_v30 = vpop.f32.mrb[87].mxu0  ;;  %v2236_v37 = vmul.f32 0.01, %v1986_v63  ;;  %v1731_v39 = vmul.f32 %v8763_v23, %v1270_v32  ;;  %6828 = vmatmul.mubr.f32.gmra.mrb[192].mxu0 %v2483_v24  ;;  %v4213_v40 = vmax.f32 %v3055_v12, %v3963_v18 }
 0x210   :  { %v4212_v31 = vmax.f32 %v3050_v57, %v3962_v20  ;;  %v3060_v33 = vadd.f32 %v9035_v14, %v3059_v30  ;;  %7070 = vmatmul.mubr.f32.gmra.mrb[82].mxu1 %v4211_v19  ;;  %6830 = vmatprep.mubr.f32.mxu0 %v2484_v25  ;;  %v1989_v38 = vadd.f32 %v8775_v35, %v1732_v27 }
 0x211   :  { %v3965_v41 = vmul.f32 0.01, %v3065_v29  ;;  %v1285_v43 = vpop.permute.xlu1 %1284  ;;  %v1988_v45 = vadd.f32 %v8775_v35, %v1731_v39  ;;  %v2486_v53 = vmax.f32 %v1986_v63, %v2236_v37  ;;  %v2487_v61 = vmax.f32 %v9047_v17, %v2237_v36 }
 0x212   :  { %v3964_v28 = vmul.f32 0.01, %v3060_v33  ;;  %v6673_v44 = vpop.f32.mrb[88].mxu0  ;;  %7072 = vmatprep.mubr.f32.mxu1 %v4212_v31  ;;  %v1734_v47 = vmul.f32 %v8763_v23, %v1285_v43  ;;  %v1280_v51 = vpop.permute.xlu0 %1279  ;;  %v2239_v1 = vmul.f32 0.01, %v1989_v38 }
 0x213   :  { %v3069_v46 = vpop.f32.mrb[89].mxu0  ;;  %v3075_v50 = vadd.f32 %v9035_v14, %v6673_v44  ;;  %v2238_v54 = vmul.f32 0.01, %v1988_v45  ;;  %v1733_v56 = vmul.f32 %v8763_v23, %v1280_v51  ;;  %6831 = vmatmul.mubr.f32.gmra.mrb[194].mxu0 %v2485_v48  ;;  %v4215_v58 = vmax.f32 %v3065_v29, %v3965_v41 }
 0x214   :  { %v4214_v49 = vmax.f32 %v3060_v33, %v3964_v28  ;;  %v3070_v52 = vadd.f32 %v9035_v14, %v3069_v46  ;;  %7073 = vmatmul.mubr.f32.gmra.mrb[84].mxu1 %v4213_v40  ;;  %v9063_v55 = vadd.f32 %v8775_v35, %v1734_v47  ;;  %6833 = vmatprep.mubr.f32.mxu0 %v2486_v53 }
 0x215   :  { %v3967_v42 = vmul.f32 0.01, %v3075_v50  ;;  %v1295_v59 = vpop.permute.xlu1 %1294  ;;  %v1990_v0 = vadd.f32 %v8775_v35, %v1733_v56  ;;  %v2488_v7 = vmax.f32 %v1988_v45, %v2238_v54  ;;  %v2489_v20 = vmax.f32 %v1989_v38, %v2239_v1 }
 0x216   :  { %v3966_v60 = vmul.f32 0.01, %v3070_v52  ;;  %v6676_v62 = vpop.f32.mrb[90].mxu0  ;;  %7075 = vmatprep.mubr.f32.mxu1 %v4214_v49  ;;  %v1736_v23 = vmul.f32 %v9071_v3, %v1295_v59  ;;  %v1290_v34 = vpop.permute.xlu0 %1289  ;;  %v2241_v8 = vmul.f32 0.01, %v9063_v55 }
 0x217   :  { %v3085_v2 = vadd.f32 %v9035_v14, %v6676_v62  ;;  %v3079_v5 = vpop.f32.mrb[91].mxu0  ;;  %v2240_v9 = vmul.f32 0.01, %v1990_v0  ;;  %v1735_v35 = vmul.f32 %v9071_v3, %v1290_v34  ;;  %6834 = vmatmul.mubr.f32.gmra.mrb[196].mxu0 %v2487_v61  ;;  %v4217_v10 = vmax.f32 %v3075_v50, %v3967_v42 }
 0x218   :  { %v4216_v4 = vmax.f32 %v3070_v52, %v3966_v60  ;;  %v3080_v6 = vadd.f32 %v9035_v14, %v3079_v5  ;;  %7076 = vmatmul.mubr.f32.gmra.mrb[86].mxu1 %v4215_v58  ;;  %6836 = vmatprep.mubr.f32.mxu0 %v2488_v7  ;;  %v1993_v17 = vadd.f32 %v9081_v15, %v1736_v23 }
 0x219   :  { %v3969_v11 = vmul.f32 0.01, %v3085_v2  ;;  %v1305_v13 = vpop.permute.xlu1 %1304  ;;  %v1992_v16 = vadd.f32 %v9081_v15, %v1735_v35  ;;  %v2490_v63 = vmax.f32 %v1990_v0, %v2240_v9  ;;  %v2491_v37 = vmax.f32 %v9063_v55, %v2241_v8 }
 0x21a   :  { %v3968_v12 = vmul.f32 0.01, %v3080_v6  ;;  %v6679_v57 = vpop.f32.mrb[92].mxu0  ;;  %7078 = vmatprep.mubr.f32.mxu1 %v4216_v4  ;;  %v1738_v19 = vmul.f32 %v9071_v3, %v1305_v13  ;;  %v1300_v24 = vpop.permute.xlu0 %1299  ;;  %v2243_v39 = vmul.f32 0.01, %v1993_v17 }
 0x21b   :  { %v3089_v18 = vpop.f32.mrb[93].mxu0  ;;  %v3095_v22 = vadd.f32 %v9035_v14, %v6679_v57  ;;  %v2242_v27 = vmul.f32 0.01, %v1992_v16  ;;  %v1737_v30 = vmul.f32 %v9071_v3, %v1300_v24  ;;  %6837 = vmatmul.mubr.f32.gmra.mrb[198].mxu0 %v2489_v20  ;;  %v4219_v31 = vmax.f32 %v3085_v2, %v3969_v11 }
 0x21c   :  { %v4218_v21 = vmax.f32 %v3080_v6, %v3968_v12  ;;  %v3090_v26 = vadd.f32 %v9035_v14, %v3089_v18  ;;  %7079 = vmatmul.mubr.f32.gmra.mrb[88].mxu1 %v4217_v10  ;;  %v9089_v29 = vadd.f32 %v9081_v15, %v1738_v19  ;;  %6839 = vmatprep.mubr.f32.mxu0 %v2490_v63 }
 0x21d   :  { %v3971_v32 = vmul.f32 0.01, %v3095_v22  ;;  %v1315_v25 = vpop.permute.xlu1 %1314  ;;  %v1994_v40 = vadd.f32 %v9081_v15, %v1737_v30  ;;  %v2492_v47 = vmax.f32 %v1992_v16, %v2242_v27  ;;  %v2493_v60 = vmax.f32 %v1993_v17, %v2243_v39 }
 0x21e   :  { %v3970_v33 = vmul.f32 0.01, %v3090_v26  ;;  %v6682_v36 = vpop.f32.mrb[94].mxu0  ;;  %7081 = vmatprep.mubr.f32.mxu1 %v4218_v21  ;;  %v1740_v41 = vmul.f32 %v9071_v3, %v1315_v25  ;;  %v1310_v38 = vpop.permute.xlu0 %1309  ;;  %v2245_v46 = vmul.f32 0.01, %v9089_v29 }
 0x21f   :  { %v3105_v28 = vadd.f32 %v9035_v14, %v6682_v36  ;;  %v3099_v43 = vpop.f32.mrb[95].mxu0  ;;  %v2244_v48 = vmul.f32 0.01, %v1994_v40  ;;  %v1739_v49 = vmul.f32 %v9071_v3, %v1310_v38  ;;  %6840 = vmatmul.mubr.f32.gmra.mrb[200].mxu0 %v2491_v37  ;;  %v4221_v50 = vmax.f32 %v3095_v22, %v3971_v32 }
 0x220   :  { %v4220_v44 = vmax.f32 %v3090_v26, %v3970_v33  ;;  %v3100_v45 = vadd.f32 %v9035_v14, %v3099_v43  ;;  %7082 = vmatmul.mubr.f32.gmra.mrb[90].mxu1 %v4219_v31  ;;  %6842 = vmatprep.mubr.f32.mxu0 %v2492_v47  ;;  %v1997_v55 = vadd.f32 %v9081_v15, %v1740_v41 }
 0x221   :  { %v3973_v51 = vmul.f32 0.01, %v3105_v28  ;;  %v1325_v53 = vpop.permute.xlu1 %1324  ;;  %v1996_v56 = vadd.f32 %v9081_v15, %v1739_v49  ;;  %v2494_v0 = vmax.f32 %v1994_v40, %v2244_v48  ;;  %v2495_v9 = vmax.f32 %v9089_v29, %v2245_v46 }
 0x222   :  { %v3972_v52 = vmul.f32 0.01, %v3100_v45  ;;  %v6685_v54 = vpop.f32.mrb[96].mxu0  ;;  %7084 = vmatprep.mubr.f32.mxu1 %v4220_v44  ;;  %v1742_v58 = vmul.f32 %v9071_v3, %v1325_v53  ;;  %v1320_v61 = vpop.permute.xlu0 %1319  ;;  %v2247_v35 = vmul.f32 0.01, %v1997_v55 }
 0x223   :  { %v3109_v42 = vpop.f32.mrb[97].mxu0  ;;  %v3115_v62 = vadd.f32 %v9035_v14, %v6685_v54  ;;  %v2246_v23 = vmul.f32 0.01, %v1996_v56  ;;  %v1741_v5 = vmul.f32 %v9071_v3, %v1320_v61  ;;  %6843 = vmatmul.mubr.f32.gmra.mrb[202].mxu0 %v2493_v60  ;;  %v4223_v4 = vmax.f32 %v3105_v28, %v3973_v51 }
 0x224   :  { %v4222_v59 = vmax.f32 %v3100_v45, %v3972_v52  ;;  %v3110_v1 = vadd.f32 %v9035_v14, %v3109_v42  ;;  %7085 = vmatmul.mubr.f32.gmra.mrb[92].mxu1 %v4221_v50  ;;  %v9105_v2 = vadd.f32 %v9081_v15, %v1742_v58  ;;  %6845 = vmatprep.mubr.f32.mxu0 %v2494_v0 }
 0x225   :  { %v3975_v34 = vmul.f32 0.01, %v3115_v62  ;;  %v1335_v7 = vpop.permute.xlu1 %1334  ;;  %v1998_v10 = vadd.f32 %v9081_v15, %v1741_v5  ;;  %v2496_v19 = vmax.f32 %v1996_v56, %v2246_v23  ;;  %v2497_v33 = vmax.f32 %v1997_v55, %v2247_v35 }
 0x226   :  { %v3974_v6 = vmul.f32 0.01, %v3110_v1  ;;  %v6688_v8 = vpop.f32.mrb[98].mxu0  ;;  %7087 = vmatprep.mubr.f32.mxu1 %v4222_v59  ;;  %v1744_v11 = vmul.f32 %v9071_v3, %v1335_v7  ;;  %v1330_v17 = vpop.permute.xlu0 %1329  ;;  %v2249_v18 = vmul.f32 0.01, %v9105_v2 }
 0x227   :  { %v3125_v12 = vadd.f32 %v9035_v14, %v6688_v8  ;;  %v3119_v13 = vpop.f32.mrb[99].mxu0  ;;  %v2248_v20 = vmul.f32 0.01, %v1998_v10  ;;  %v1743_v21 = vmul.f32 %v9071_v3, %v1330_v17  ;;  %6846 = vmatmul.mubr.f32.gmra.mrb[204].mxu0 %v2495_v9  ;;  %v4225_v22 = vmax.f32 %v3115_v62, %v3975_v34 }
 0x228   :  { %v4224_v57 = vmax.f32 %v3110_v1, %v3974_v6  ;;  %v3120_v16 = vadd.f32 %v9035_v14, %v3119_v13  ;;  %7088 = vmatmul.mubr.f32.gmra.mrb[94].mxu1 %v4223_v4  ;;  %6848 = vmatprep.mubr.f32.mxu0 %v2496_v19  ;;  %v2001_v29 = vadd.f32 %v9081_v15, %v1744_v11 }
 0x229   :  { %v3977_v24 = vmul.f32 0.01, %v3125_v12  ;;  %v1345_v63 = vpop.permute.xlu1 %1344  ;;  %v2000_v30 = vadd.f32 %v9081_v15, %v1743_v21  ;;  %v2498_v40 = vmax.f32 %v1998_v10, %v2248_v20  ;;  %v2499_v48 = vmax.f32 %v9105_v2, %v2249_v18 }
 0x22a   :  { %v3976_v26 = vmul.f32 0.01, %v3120_v16  ;;  %v6691_v27 = vpop.f32.mrb[100].mxu0  ;;  %7090 = vmatprep.mubr.f32.mxu1 %v4224_v57  ;;  %v1746_v31 = vmul.f32 %v9071_v3, %v1345_v63  ;;  %v1340_v37 = vpop.permute.xlu0 %1339  ;;  %v2251_v49 = vmul.f32 0.01, %v2001_v29 }
 0x22b   :  { %v3129_v32 = vpop.f32.mrb[101].mxu0  ;;  %v3135_v36 = vadd.f32 %v9035_v14, %v6691_v27  ;;  %v2250_v41 = vmul.f32 0.01, %v2000_v30  ;;  %v1745_v43 = vmul.f32 %v9071_v3, %v1340_v37  ;;  %6849 = vmatmul.mubr.f32.gmra.mrb[206].mxu0 %v2497_v33  ;;  %v4227_v44 = vmax.f32 %v3125_v12, %v3977_v24 }
 0x22c   :  { %v4226_v25 = vmax.f32 %v3120_v16, %v3976_v26  ;;  %v3130_v39 = vadd.f32 %v9035_v14, %v3129_v32  ;;  %7091 = vmatmul.mubr.f32.gmra.mrb[96].mxu1 %v4225_v22  ;;  %v9121_v28 = vadd.f32 %v9081_v15, %v1746_v31  ;;  %6851 = vmatprep.mubr.f32.mxu0 %v2498_v40 }
 0x22d   :  { %v3979_v38 = vmul.f32 0.01, %v3135_v36  ;;  %v1355_v47 = vpop.permute.xlu1 %1354  ;;  %v2002_v50 = vadd.f32 %v9081_v15, %v1745_v43  ;;  %v2500_v58 = vmax.f32 %v2000_v30, %v2250_v41  ;;  %v2501_v6 = vmax.f32 %v2001_v29, %v2251_v49 }
 0x22e   :  { %v3978_v45 = vmul.f32 0.01, %v3130_v39  ;;  %v6694_v46 = vpop.f32.mrb[102].mxu0  ;;  %7093 = vmatprep.mubr.f32.mxu1 %v4226_v25  ;;  %v1748_v51 = vmul.f32 %v9071_v3, %v1355_v47  ;;  %v1350_v55 = vpop.permute.xlu0 %1349  ;;  %v2253_v42 = vmul.f32 0.01, %v9121_v28 }
 0x22f   :  { %v3145_v52 = vadd.f32 %v9035_v14, %v6694_v46  ;;  %v3139_v53 = vpop.f32.mrb[103].mxu0  ;;  %v2252_v60 = vmul.f32 0.01, %v2002_v50  ;;  %v1747_v59 = vmul.f32 %v9071_v3, %v1350_v55  ;;  %6852 = vmatmul.mubr.f32.gmra.mrb[208].mxu0 %v2499_v48  ;;  %v4229_v62 = vmax.f32 %v3135_v36, %v3979_v38  ;;  %v9164_v55 = vld [vmem:[%s10765_s6] ss:$0 sm:$0xff] }
 0x230   :  { %v4228_v54 = vmax.f32 %v3130_v39, %v3978_v45  ;;  %v3140_v56 = vadd.f32 %v9035_v14, %v3139_v53  ;;  %7094 = vmatmul.mubr.f32.gmra.mrb[98].mxu1 %v4227_v44  ;;  %6854 = vmatprep.mubr.f32.mxu0 %v2500_v58  ;;  %v2005_v2 = vadd.f32 %v9081_v15, %v1748_v51 }
 0x231   :  { %v3981_v61 = vmul.f32 0.01, %v3145_v52  ;;  %v1365_v0 = vpop.permute.xlu1 %1364  ;;  %v2004_v5 = vadd.f32 %v9081_v15, %v1747_v59  ;;  %v2502_v10 = vmax.f32 %v2002_v50, %v2252_v60  ;;  %v2503_v20 = vmax.f32 %v9121_v28, %v2253_v42 }
 0x232   :  { %v3980_v1 = vmul.f32 0.01, %v3140_v56  ;;  %v6697_v23 = vpop.f32.mrb[104].mxu0  ;;  %7096 = vmatprep.mubr.f32.mxu1 %v4228_v54  ;;  %v1750_v4 = vmul.f32 %v9071_v3, %v1365_v0  ;;  %v1360_v9 = vpop.permute.xlu0 %1359  ;;  %v2255_v21 = vmul.f32 0.01, %v2005_v2 }
 0x233   :  { %v3149_v34 = vpop.f32.mrb[105].mxu0  ;;  %v3155_v8 = vadd.f32 %v9035_v14, %v6697_v23  ;;  %v2254_v11 = vmul.f32 0.01, %v2004_v5  ;;  %v1749_v13 = vmul.f32 %v9071_v3, %v1360_v9  ;;  %6855 = vmatmul.mubr.f32.gmra.mrb[210].mxu0 %v2501_v6  ;;  %v4231_v57 = vmax.f32 %v3145_v52, %v3981_v61 }
 0x234   :  { %v4230_v7 = vmax.f32 %v3140_v56, %v3980_v1  ;;  %v3150_v35 = vadd.f32 %v9035_v14, %v3149_v34  ;;  %7097 = vmatmul.mubr.f32.gmra.mrb[100].mxu1 %v4229_v62  ;;  %v9137_v12 = vadd.f32 %v9081_v15, %v1750_v4  ;;  %6857 = vmatprep.mubr.f32.mxu0 %v2502_v10 }
 0x235   :  { %v3983_v17 = vmul.f32 0.01, %v3155_v8  ;;  %v1375_v19 = vpop.permute.xlu1 %1374  ;;  %v2006_v22 = vadd.f32 %v9081_v15, %v1749_v13  ;;  %v2504_v31 = vmax.f32 %v2004_v5, %v2254_v11  ;;  %v2505_v45 = vmax.f32 %v2005_v2, %v2255_v21 }
 0x236   :  { %v3982_v16 = vmul.f32 0.01, %v3150_v35  ;;  %v6700_v18 = vpop.f32.mrb[106].mxu0  ;;  %7099 = vmatprep.mubr.f32.mxu1 %v4230_v7  ;;  %v1752_v24 = vmul.f32 %v9071_v3, %v1375_v19  ;;  %v1370_v29 = vpop.permute.xlu0 %1369  ;;  %v2257_v32 = vmul.f32 0.01, %v9137_v12 }
 0x237   :  { %v3165_v26 = vadd.f32 %v9035_v14, %v6700_v18  ;;  %v3159_v63 = vpop.f32.mrb[107].mxu0  ;;  %v2256_v33 = vmul.f32 0.01, %v2006_v22  ;;  %v1751_v36 = vmul.f32 %v9071_v3, %v1370_v29  ;;  %6858 = vmatmul.mubr.f32.gmra.mrb[212].mxu0 %v2503_v20  ;;  %v4233_v37 = vmax.f32 %v3155_v8, %v3983_v17 }
 0x238   :  { %v4232_v27 = vmax.f32 %v3150_v35, %v3982_v16  ;;  %v3160_v30 = vadd.f32 %v9035_v14, %v3159_v63  ;;  %7100 = vmatmul.mubr.f32.gmra.mrb[102].mxu1 %v4231_v57  ;;  %v9147_v25 = vadd.f32 %v9081_v15, %v1752_v24  ;;  %6860 = vmatprep.mubr.f32.mxu0 %v2504_v31 }
 0x239   :  { %v3985_v39 = vmul.f32 0.01, %v3165_v26  ;;  %v1385_v41 = vpop.permute.xlu1 %1384  ;;  %v2008_v43 = vadd.f32 %v9081_v15, %v1751_v36  ;;  %v2506_v50 = vmax.f32 %v2006_v22, %v2256_v33  ;;  %v2507_v62 = vmax.f32 %v9137_v12, %v2257_v32 }
 0x23a   :  { %v3984_v40 = vmul.f32 0.01, %v3160_v30  ;;  %v6703_v28 = vpop.f32.mrb[108].mxu0  ;;  %7102 = vmatprep.mubr.f32.mxu1 %v4232_v27  ;;  %v1754_v44 = vmul.f32 %v9071_v3, %v1385_v41  ;;  %v1380_v48 = vpop.permute.xlu0 %1379  ;;  %v2259_v51 = vmul.f32 0.01, %v9147_v25 }
 0x23b   :  { %v3169_v38 = vpop.f32.mrb[109].mxu0  ;;  %v9153_v46 = vadd.f32 %v9035_v14, %v6703_v28  ;;  %v2258_v52 = vmul.f32 0.01, %v2008_v43  ;;  %v1753_v54 = vmul.f32 %v9071_v3, %v1380_v48  ;;  %6861 = vmatmul.mubr.f32.gmra.mrb[214].mxu0 %v2505_v45  ;;  %v4235_v56 = vmax.f32 %v3165_v26, %v3985_v39 }
 0x23c   :  { %v4234_v47 = vmax.f32 %v3160_v30, %v3984_v40  ;;  %v3170_v49 = vadd.f32 %v9035_v14, %v3169_v38  ;;  %7103 = vmatmul.mubr.f32.gmra.mrb[104].mxu1 %v4233_v37  ;;  %v9158_v53 = vadd.f32 %v9081_v15, %v1754_v44  ;;  %6863 = vmatprep.mubr.f32.mxu0 %v2506_v50 }
 0x23d   :  { %v3987_v58 = vmul.f32 0.01, %v9153_v46  ;;  %v1395_v60 = vpop.permute.xlu1 %1394  ;;  %v2010_v1 = vadd.f32 %v9081_v15, %v1753_v54  ;;  %v2509_v11 = vmax.f32 %v9147_v25, %v2259_v51  ;;  %v2508_v17 = vmax.f32 %v2008_v43, %v2258_v52 }
 0x23e   :  { %v3986_v42 = vmul.f32 0.01, %v3170_v49  ;;  %v6706_v59 = vpop.f32.mrb[110].mxu0  ;;  %7105 = vmatprep.mubr.f32.mxu1 %v4234_v47  ;;  %v9169_v61 = vmul.f32 0.01, %v9158_v53  ;;  %v1756_v0 = vmul.f32 %v9071_v3, %v1395_v60  ;;  %v1390_v6 = vpop.permute.xlu0 %1389 }
 0x23f   :  { %v9174_v23 = vadd.f32 %v9035_v14, %v6706_v59  ;;  %v6948_v2 = vpop.f32.mrb[0].mxu1  ;;  %v3179_v5 = vpop.f32.mrb[111].mxu0  ;;  %v2260_v9 = vmul.f32 0.01, %v2010_v1  ;;  %v1755_v10 = vmul.f32 %v9071_v3, %v1390_v6  ;;  %6864 = vmatmul.mubr.f32.gmra.mrb[216].mxu0 %v2507_v62  ;;  %v4237_v18 = vmax.f32 %v9153_v46, %v3987_v58 }
 0x240   :  { %v4236_v4 = vmax.f32 %v3170_v49, %v3986_v42  ;;  %v4473_v34 = vadd.f32 %v6948_v2, %v9164_v55  ;;  %v3180_v7 = vadd.f32 %v9035_v14, %v3179_v5  ;;  %v4467_v8 = vpop.f32.mrb[1].mxu1  ;;  %7106 = vmatmul.mubr.f32.gmra.mrb[106].mxu1 %v4235_v56  ;;  %v9179_v35 = vadd.f32 %v9081_v15, %v1756_v0 }
 0x241   :  { %v3989_v12 = vmul.f32 0.01, %v9174_v23  ;;  %v4468_v57 = vadd.f32 %v9164_v55, %v4467_v8  ;;  %v1405_v16 = vpop.permute.xlu1 %1404  ;;  %v2012_v20 = vadd.f32 %v9081_v15, %v1755_v10  ;;  %v2511_v26 = vmax.f32 %v9158_v53, %v9169_v61  ;;  %6866 = vmatprep.mubr.f32.mxu0 %v2508_v17 }
 0x242   :  { %5718 = vst.msk [vmem:[%s10766_s7 + $0x8] sm:$0xff] %vm5716_vm0, %v4473_v34  ;;  %v3988_v13 = vmul.f32 0.01, %v3180_v7  ;;  %v6709_v19 = vpop.f32.mrb[112].mxu0  ;;  %7108 = vmatprep.mubr.f32.mxu1 %v4236_v4  ;;  %v1758_v21 = vmul.f32 %v9071_v3, %v1405_v16  ;;  %v1400_v30 = vpop.permute.xlu0 %1399  ;;  %v2263_v33 = vmul.f32 0.01, %v9179_v35  ;;  %v2510_v28 = vmax.f32 %v2010_v1, %v2260_v9 }
 0x243   :  { %v6951_v22 = vpop.f32.mrb[2].mxu1  ;;  %v3189_v24 = vpop.f32.mrb[113].mxu0  ;;  %5717 = vst.msk [vmem:[%s10766_s7] sm:$0xff] %vm5716_vm0, %v4468_v57  ;;  %v9199_v27 = vadd.f32 %v9035_v14, %v6709_v19  ;;  %v2262_v25 = vmul.f32 0.01, %v2012_v20  ;;  %v1757_v36 = vmul.f32 %v9071_v3, %v1400_v30  ;;  %6867 = vmatmul.mubr.f32.gmra.mrb[218].mxu0 %v2509_v11  ;;  %v4239_v39 = vmax.f32 %v9174_v23, %v3989_v12 }
 0x244   :  { %v4238_v63 = vmax.f32 %v3180_v7, %v3988_v13  ;;  %v4483_v29 = vadd.f32 %v6951_v22, %v9164_v55  ;;  %v3190_v31 = vadd.f32 %v9035_v14, %v3189_v24  ;;  %v4477_v32 = vpop.f32.mrb[3].mxu1  ;;  %7109 = vmatmul.mubr.f32.gmra.mrb[108].mxu1 %v4237_v18  ;;  %v9208_v40 = vadd.f32 %v9081_v15, %v1758_v21 }
 0x245   :  { %v4478_v37 = vadd.f32 %v9164_v55, %v4477_v32  ;;  %v1415_v43 = vpop.permute.xlu1 %1414  ;;  %v3991_v44 = vmul.f32 0.01, %v9199_v27  ;;  %v2014_v38 = vadd.f32 %v9081_v15, %v1757_v36  ;;  %v2512_v48 = vmax.f32 %v2012_v20, %v2262_v25  ;;  %6869 = vmatprep.mubr.f32.mxu0 %v2510_v28 }
 0x246   :  { %5720 = vst.msk [vmem:[%s10766_s7 + $0x18] sm:$0xff] %vm5716_vm0, %v4483_v29  ;;  %v3990_v41 = vmul.f32 0.01, %v3190_v31  ;;  %7111 = vmatprep.mubr.f32.mxu1 %v4238_v63  ;;  %v1760_v45 = vmul.f32 %v9071_v3, %v1415_v43  ;;  %v6712_v47 = vpop.f32.mrb[114].mxu0  ;;  %v1410_v52 = vpop.permute.xlu0 %1409  ;;  %v2265_v59 = vmul.f32 0.01, %v9208_v40  ;;  %v2513_v1 = vmax.f32 %v9179_v35, %v2263_v33 }
 0x247   :  { %5719 = vst.msk [vmem:[%s10766_s7 + $0x10] sm:$0xff] %vm5716_vm0, %v4478_v37  ;;  %v6954_v46 = vpop.f32.mrb[4].mxu1  ;;  %v9222_v50 = vadd.f32 %v9035_v14, %v6712_v47  ;;  %v3199_v53 = vpop.f32.mrb[115].mxu0  ;;  %v2264_v54 = vmul.f32 0.01, %v2014_v38  ;;  %v1759_v58 = vmul.f32 %v9071_v3, %v1410_v52  ;;  %6870 = vmatmul.mubr.f32.gmra.mrb[220].mxu0 %v2511_v26  ;;  %v4241_v0 = vmax.f32 %v9199_v27, %v3991_v44 }
 0x248   :  { %v4240_v49 = vmax.f32 %v3190_v31, %v3990_v41  ;;  %v4493_v51 = vadd.f32 %v6954_v46, %v9164_v55  ;;  %v9226_v56 = vadd.f32 %v9081_v15, %v1760_v45  ;;  %v3200_v42 = vadd.f32 %v9035_v14, %v3199_v53  ;;  %v4487_v60 = vpop.f32.mrb[5].mxu1  ;;  %7112 = vmatmul.mubr.f32.gmra.mrb[110].mxu1 %v4239_v39 }
 0x249   :  { %v4488_v62 = vadd.f32 %v9164_v55, %v4487_v60  ;;  %6872 = vmatprep.mubr.f32.mxu0 %v2512_v48  ;;  %v1425_v61 = vpop.permute.xlu1 %1424  ;;  %v2016_v23 = vadd.f32 %v9081_v15, %v1759_v58  ;;  %v3993_v34 = vmul.f32 0.01, %v9222_v50  ;;  %v2514_v9 = vmax.f32 %v2014_v38, %v2264_v54 }
 0x24a   :  { %5722 = vst.msk [vmem:[%s10766_s7 + $0x28] sm:$0xff] %vm5716_vm0, %v4493_v51  ;;  %7114 = vmatprep.mubr.f32.mxu1 %v4240_v49  ;;  %v3992_v2 = vmul.f32 0.01, %v3200_v42  ;;  %v1762_v5 = vmul.f32 %v9071_v3, %v1425_v61  ;;  %v6715_v6 = vpop.f32.mrb[116].mxu0  ;;  %v1420_v8 = vpop.permute.xlu0 %1419  ;;  %v2267_v35 = vmul.f32 0.01, %v9226_v56  ;;  %v2515_v20 = vmax.f32 %v9208_v40, %v2265_v59 }
 0x24b   :  { %v6957_v4 = vpop.f32.mrb[6].mxu1  ;;  %5721 = vst.msk [vmem:[%s10766_s7 + $0x20] sm:$0xff] %vm5716_vm0, %v4488_v62  ;;  %v2266_v10 = vmul.f32 0.01, %v2016_v23  ;;  %v9248_v12 = vadd.f32 %v9035_v14, %v6715_v6  ;;  %v3209_v13 = vpop.f32.mrb[117].mxu0  ;;  %6873 = vmatmul.mubr.f32.gmra.mrb[222].mxu0 %v2513_v1  ;;  %v1761_v17 = vmul.f32 %v9071_v3, %v1420_v8  ;;  %v4243_v27 = vmax.f32 %v9222_v50, %v3993_v34 }
 0x24c   :  { %v4503_v7 = vadd.f32 %v6957_v4, %v9164_v55  ;;  %v4242_v11 = vmax.f32 %v3200_v42, %v3992_v2  ;;  %v4497_v57 = vpop.f32.mrb[7].mxu1  ;;  %7115 = vmatmul.mubr.f32.gmra.mrb[112].mxu1 %v4241_v0  ;;  %v3210_v16 = vadd.f32 %v9035_v14, %v3209_v13  ;;  %6875 = vmatprep.mubr.f32.mxu0 %v2514_v9 }
 0x24d   :  { %v4498_v19 = vadd.f32 %v9164_v55, %v4497_v57  ;;  %v1435_v18 = vpop.permute.xlu1 %1434  ;;  %v9259_v21 = vadd.f32 %v9081_v15, %v1762_v5  ;;  %v3995_v22 = vmul.f32 0.01, %v9248_v12  ;;  %v2516_v63 = vmax.f32 %v2016_v23, %v2266_v10 }
 0x24e   :  { %5724 = vst.msk [vmem:[%s10766_s7 + $0x38] sm:$0xff] %vm5716_vm0, %v4503_v7  ;;  %v1764_v24 = vmul.f32 %v9071_v3, %v1435_v18  ;;  %7117 = vmatprep.mubr.f32.mxu1 %v4242_v11  ;;  %v2018_v29 = vadd.f32 %v9081_v15, %v1761_v17  ;;  %v3994_v30 = vmul.f32 0.01, %v3210_v16  ;;  %v6718_v31 = vpop.f32.mrb[118].mxu0  ;;  %v1430_v33 = vpop.permute.xlu0 %1429  ;;  %v2517_v41 = vmax.f32 %v9226_v56, %v2267_v35 }
 0x24f   :  { %v6960_v26 = vpop.f32.mrb[8].mxu1  ;;  %5723 = vst.msk [vmem:[%s10766_s7 + $0x30] sm:$0xff] %vm5716_vm0, %v4498_v19  ;;  %v9274_v36 = vadd.f32 %v9035_v14, %v6718_v31  ;;  %v1763_v37 = vmul.f32 %v9071_v3, %v1430_v33  ;;  %v3219_v39 = vpop.f32.mrb[119].mxu0  ;;  %6876 = vmatmul.mubr.f32.gmra.mrb[224].mxu0 %v2515_v20  ;;  %v2269_v47 = vmul.f32 0.01, %v9259_v21  ;;  %v4245_v46 = vmax.f32 %v9248_v12, %v3995_v22 }
 0x250   :  { %v4513_v32 = vadd.f32 %v6960_v26, %v9164_v55  ;;  %v9271_v25 = vadd.f32 %v9081_v15, %v1764_v24  ;;  %v4507_v40 = vpop.f32.mrb[9].mxu1  ;;  %v2268_v28 = vmul.f32 0.01, %v2018_v29  ;;  %v4244_v43 = vmax.f32 %v3210_v16, %v3994_v30  ;;  %7118 = vmatmul.mubr.f32.gmra.mrb[114].mxu1 %v4243_v27  ;;  %6878 = vmatprep.mubr.f32.mxu0 %v2516_v63 }
 0x251   :  { %v3220_v44 = vadd.f32 %v9035_v14, %v3219_v39  ;;  %v4508_v38 = vadd.f32 %v9164_v55, %v4507_v40  ;;  %v1445_v45 = vpop.permute.xlu1 %1444  ;;  %v2020_v48 = vadd.f32 %v9081_v15, %v1763_v37  ;;  %v3997_v51 = vmul.f32 0.01, %v9274_v36 }
 0x252   :  { %5726 = vst.msk [vmem:[%s10766_s7 + $0x48] sm:$0xff] %vm5716_vm0, %v4513_v32  ;;  %v1766_v49 = vmul.f32 %v9071_v3, %v1445_v45  ;;  %v6721_v53 = vpop.f32.mrb[120].mxu0  ;;  %7120 = vmatprep.mubr.f32.mxu1 %v4244_v43  ;;  %v1440_v56 = vpop.permute.xlu0 %1439  ;;  %v2518_v58 = vmax.f32 %v2018_v29, %v2268_v28  ;;  %v2271_v42 = vmul.f32 0.01, %v9271_v25  ;;  %v2519_v8 = vmax.f32 %v9259_v21, %v2269_v47 }
 0x253   :  { %v6963_v50 = vpop.f32.mrb[10].mxu1  ;;  %v3996_v52 = vmul.f32 0.01, %v3220_v44  ;;  %5725 = vst.msk [vmem:[%s10766_s7 + $0x40] sm:$0xff] %vm5716_vm0, %v4508_v38  ;;  %v2270_v60 = vmul.f32 0.01, %v2020_v48  ;;  %v9299_v62 = vadd.f32 %v9035_v14, %v6721_v53  ;;  %6879 = vmatmul.mubr.f32.gmra.mrb[226].mxu0 %v2517_v41  ;;  %v1765_v23 = vmul.f32 %v9071_v3, %v1440_v56 }
 0x254   :  { %v4523_v54 = vadd.f32 %v6963_v50, %v9164_v55  ;;  %v9296_v59 = vadd.f32 %v9081_v15, %v1766_v49  ;;  %v3229_v61 = vpop.f32.mrb[121].mxu0  ;;  %v4517_v1 = vpop.f32.mrb[11].mxu1  ;;  %7121 = vmatmul.mubr.f32.gmra.mrb[116].mxu1 %v4245_v46  ;;  %6881 = vmatprep.mubr.f32.mxu0 %v2518_v58  ;;  %v4247_v35 = vmax.f32 %v9274_v36, %v3997_v51 }
 0x255   :  { %v4246_v0 = vmax.f32 %v3220_v44, %v3996_v52  ;;  %v3230_v2 = vadd.f32 %v9035_v14, %v3229_v61  ;;  %v4518_v5 = vadd.f32 %v9164_v55, %v4517_v1  ;;  %v1455_v4 = vpop.permute.xlu1 %1454  ;;  %v3999_v34 = vmul.f32 0.01, %v9299_v62 }
 0x256   :  { %5728 = vst.msk [vmem:[%s10766_s7 + $0x58] sm:$0xff] %vm5716_vm0, %v4523_v54  ;;  %v1768_v6 = vmul.f32 %v9071_v3, %v1455_v4  ;;  %v2520_v9 = vmax.f32 %v2020_v48, %v2270_v60  ;;  %v2022_v10 = vadd.f32 %v9081_v15, %v1765_v23  ;;  %v6724_v12 = vpop.f32.mrb[122].mxu0  ;;  %v1450_v57 = vpop.permute.xlu0 %1449  ;;  %v2273_v17 = vmul.f32 0.01, %v9296_v59 }
 0x257   :  { %v6966_v7 = vpop.f32.mrb[12].mxu1  ;;  %v3998_v11 = vmul.f32 0.01, %v3230_v2  ;;  %5727 = vst.msk [vmem:[%s10766_s7 + $0x50] sm:$0xff] %vm5716_vm0, %v4518_v5  ;;  %7123 = vmatprep.mubr.f32.mxu1 %v4246_v0  ;;  %v9323_v19 = vadd.f32 %v9035_v14, %v6724_v12  ;;  %v1767_v18 = vmul.f32 %v9071_v3, %v1450_v57  ;;  %v3239_v20 = vpop.f32.mrb[123].mxu0  ;;  %6882 = vmatmul.mubr.f32.gmra.mrb[228].mxu0 %v2519_v8 }
 0x258   :  { %v4533_v13 = vadd.f32 %v6966_v7, %v9164_v55  ;;  %v9320_v16 = vadd.f32 %v9081_v15, %v1768_v6  ;;  %v4527_v21 = vpop.f32.mrb[13].mxu1  ;;  %v2272_v22 = vmul.f32 0.01, %v2022_v10  ;;  %v3240_v26 = vadd.f32 %v9035_v14, %v3239_v20  ;;  %7124 = vmatmul.mubr.f32.gmra.mrb[118].mxu1 %v4247_v35  ;;  %6884 = vmatprep.mubr.f32.mxu0 %v2520_v9 }
 0x259   :  { %v4248_v24 = vmax.f32 %v3230_v2, %v3998_v11  ;;  %v4528_v63 = vadd.f32 %v9164_v55, %v4527_v21  ;;  %v1465_v27 = vpop.permute.xlu1 %1464  ;;  %v4249_v29 = vmax.f32 %v9299_v62, %v3999_v34  ;;  %v2024_v30 = vadd.f32 %v9081_v15, %v1767_v18 }
 0x25a   :  { %5730 = vst.msk [vmem:[%s10766_s7 + $0x68] sm:$0xff] %vm5716_vm0, %v4533_v13  ;;  %v1770_v31 = vmul.f32 %v9071_v3, %v1465_v27  ;;  %v2521_v33 = vmax.f32 %v9271_v25, %v2271_v42  ;;  %v4001_v36 = vmul.f32 0.01, %v9323_v19  ;;  %v4000_v37 = vmul.f32 0.01, %v3240_v26  ;;  %v6727_v14 = vpop.f32.mrb[124].mxu0  ;;  %v1460_v40 = vpop.permute.xlu0 %1459 }
 0x25b   :  { %v6969_v32 = vpop.f32.mrb[14].mxu1  ;;  %5729 = vst.msk [vmem:[%s10766_s7 + $0x60] sm:$0xff] %vm5716_vm0, %v4528_v63  ;;  %7126 = vmatprep.mubr.f32.mxu1 %v4248_v24  ;;  %v2522_v41 = vmax.f32 %v2022_v10, %v2272_v22  ;;  %v2275_v28 = vmul.f32 0.01, %v9320_v16  ;;  %v2274_v43 = vmul.f32 0.01, %v2024_v30  ;;  %v1769_v48 = vmul.f32 %v9071_v3, %v1460_v40 }
 0x25c   :  { %v4543_v39 = vadd.f32 %v6969_v32, %v9164_v55  ;;  %v9344_v44 = vadd.f32 %v9081_v15, %v1770_v31  ;;  %v9349_v25 = vld [vmem:[%s10764_s4] ss:$0 sm:$0xff]  ;;  %v3249_v45 = vpop.f32.mrb[125].mxu0  ;;  %6885 = vmatmul.mubr.f32.gmra.mrb[230].mxu0 %v2521_v33  ;;  %v4537_v47 = vpop.f32.mrb[15].mxu1  ;;  %v4250_v46 = vmax.f32 %v3240_v26, %v4000_v37  ;;  %7127 = vmatmul.mubr.f32.gmra.mrb[120].mxu1 %v4249_v29 }
 0x25d   :  { %v9352_v38 = vadd.f32 %v9349_v25, %v6727_v14  ;;  %v3250_v49 = vadd.f32 %v9349_v25, %v3249_v45  ;;  %v4538_v50 = vadd.f32 %v9164_v55, %v4537_v47  ;;  %v1475_v51 = vpop.permute.xlu1 %1474  ;;  %6887 = vmatprep.mubr.f32.mxu0 %v2522_v41  ;;  %v2523_v56 = vmax.f32 %v9296_v59, %v2273_v17 }
 0x25e   :  { %5732 = vst.msk [vmem:[%s10766_s7 + $0x78] sm:$0xff] %vm5716_vm0, %v4543_v39  ;;  %v1772_v53 = vmul.f32 %v9071_v3, %v1475_v51  ;;  %v2524_v58 = vmax.f32 %v2024_v30, %v2274_v43  ;;  %v4251_v42 = vmax.f32 %v9323_v19, %v4001_v36  ;;  %v2026_v60 = vadd.f32 %v9081_v15, %v1769_v48  ;;  %v6730_v61 = vpop.f32.mrb[126].mxu0  ;;  %v1470_v0 = vpop.permute.xlu0 %1469 }
 0x25f   :  { %v4003_v52 = vmul.f32 0.01, %v9352_v38  ;;  %v6972_v54 = vpop.f32.mrb[16].mxu1  ;;  %v4002_v62 = vmul.f32 0.01, %v3250_v49  ;;  %5731 = vst.msk [vmem:[%s10766_s7 + $0x70] sm:$0xff] %vm5716_vm0, %v4538_v50  ;;  %7129 = vmatprep.mubr.f32.mxu1 %v4250_v46  ;;  %v9376_v2 = vadd.f32 %v9349_v25, %v6730_v61  ;;  %v1771_v5 = vmul.f32 %v9071_v3, %v1470_v0 }
 0x260   :  { %v4553_v1 = vadd.f32 %v6972_v54, %v9164_v55  ;;  %v2277_v23 = vmul.f32 0.01, %v9344_v44  ;;  %v9373_v59 = vadd.f32 %v9081_v15, %v1772_v53  ;;  %v3259_v4 = vpop.f32.mrb[127].mxu0  ;;  %6888 = vmatmul.mubr.f32.gmra.mrb[232].mxu0 %v2523_v56  ;;  %v4547_v34 = vpop.f32.mrb[17].mxu1  ;;  %v2276_v6 = vmul.f32 0.01, %v2026_v60  ;;  %7130 = vmatmul.mubr.f32.gmra.mrb[122].mxu1 %v4251_v42 }
 0x261   :  { %v4252_v7 = vmax.f32 %v3250_v49, %v4002_v62  ;;  %v3260_v8 = vadd.f32 %v9349_v25, %v3259_v4  ;;  %v4548_v9 = vadd.f32 %v9164_v55, %v4547_v34  ;;  %6890 = vmatprep.mubr.f32.mxu0 %v2524_v58  ;;  %v1485_v35 = vpop.permute.xlu1 %1484  ;;  %v4253_v10 = vmax.f32 %v9352_v38, %v4003_v52  ;;  %v9433_v49 = vld [vmem:[%s10761_s1] ss:$0 sm:$0xff] }
 0x262   :  { %5734 = vst.msk [vmem:[%s10766_s7 + $0x88] sm:$0xff] %vm5716_vm0, %v4553_v1  ;;  %v2028_v11 = vadd.f32 %v9081_v15, %v1771_v5  ;;  %v1774_v12 = vmul.f32 %v9071_v3, %v1485_v35  ;;  %v2525_v57 = vmax.f32 %v9320_v16, %v2275_v28  ;;  %v4005_v17 = vmul.f32 0.01, %v9376_v2  ;;  %v6733_v18 = vpop.f32.mrb[128].mxu0  ;;  %v1480_v21 = vpop.permute.xlu0 %1479 }
 0x263   :  { %v6975_v13 = vpop.f32.mrb[18].mxu1  ;;  %v4004_v19 = vmul.f32 0.01, %v3260_v8  ;;  %5733 = vst.msk [vmem:[%s10766_s7 + $0x80] sm:$0xff] %vm5716_vm0, %v4548_v9  ;;  %7132 = vmatprep.mubr.f32.mxu1 %v4252_v7  ;;  %v2526_v22 = vmax.f32 %v2026_v60, %v2276_v6  ;;  %v9396_v24 = vmul.f32 0.01, %v9373_v59  ;;  %v9402_v63 = vadd.f32 %v9349_v25, %v6733_v18 }
 0x264   :  { %v4563_v20 = vadd.f32 %v6975_v13, %v9164_v55  ;;  %v2278_v26 = vmul.f32 0.01, %v2028_v11  ;;  %v9399_v16 = vadd.f32 %v9081_v15, %v1774_v12  ;;  %v3269_v27 = vpop.f32.mrb[129].mxu0  ;;  %6891 = vmatmul.mubr.f32.gmra.mrb[234].mxu0 %v2525_v57  ;;  %v4557_v29 = vpop.f32.mrb[19].mxu1  ;;  %v1773_v31 = vmul.f32 %v9071_v3, %v1480_v21  ;;  %7133 = vmatmul.mubr.f32.gmra.mrb[124].mxu1 %v4253_v10 }
 0x265   :  { %v4254_v30 = vmax.f32 %v3260_v8, %v4004_v19  ;;  %v3270_v32 = vadd.f32 %v9349_v25, %v3269_v27  ;;  %v4558_v33 = vadd.f32 %v9164_v55, %v4557_v29  ;;  %v1495_v36 = vpop.permute.xlu1 %1494  ;;  %v4007_v37 = vmul.f32 0.01, %v9402_v63  ;;  %6893 = vmatprep.mubr.f32.mxu0 %v2526_v22 }
 0x266   :  { %5736 = vst.msk [vmem:[%s10766_s7 + $0x98] sm:$0xff] %vm5716_vm0, %v4563_v20  ;;  %v1776_v14 = vmul.f32 %v9071_v3, %v1495_v36  ;;  %v2527_v40 = vmax.f32 %v9344_v44, %v2277_v23  ;;  %v2528_v41 = vmax.f32 %v2028_v11, %v2278_v26  ;;  %v4255_v28 = vmax.f32 %v9376_v2, %v4005_v17  ;;  %v6736_v45 = vpop.f32.mrb[130].mxu0  ;;  %v1490_v46 = vpop.permute.xlu0 %1489 }
 0x267   :  { %v6978_v39 = vpop.f32.mrb[20].mxu1  ;;  %v2030_v43 = vadd.f32 %v9081_v15, %v1773_v31  ;;  %v4006_v38 = vmul.f32 0.01, %v3270_v32  ;;  %5735 = vst.msk [vmem:[%s10766_s7 + $0x90] sm:$0xff] %vm5716_vm0, %v4558_v33  ;;  %7135 = vmatprep.mubr.f32.mxu1 %v4254_v30  ;;  %v9422_v3 = vmul.f32 0.01, %v9399_v16  ;;  %v9428_v48 = vadd.f32 %v9349_v25, %v6736_v45 }
 0x268   :  { %v4573_v47 = vadd.f32 %v6978_v39, %v9164_v55  ;;  %v9425_v44 = vadd.f32 %v9081_v15, %v1776_v14  ;;  %v1775_v50 = vmul.f32 %v9433_v49, %v1490_v46  ;;  %v3279_v51 = vpop.f32.mrb[131].mxu0  ;;  %6894 = vmatmul.mubr.f32.gmra.mrb[236].mxu0 %v2527_v40  ;;  %v4567_v52 = vpop.f32.mrb[21].mxu1  ;;  %7136 = vmatmul.mubr.f32.gmra.mrb[126].mxu1 %v4255_v28 }
 0x269   :  { %v2280_v53 = vmul.f32 0.01, %v2030_v43  ;;  %v4256_v54 = vmax.f32 %v3270_v32, %v4006_v38  ;;  %v3280_v56 = vadd.f32 %v9349_v25, %v3279_v51  ;;  %v4568_v58 = vadd.f32 %v9164_v55, %v4567_v52  ;;  %6896 = vmatprep.mubr.f32.mxu0 %v2528_v41  ;;  %v1505_v42 = vpop.permute.xlu1 %1504 }
 0x26a   :  { %5738 = vst.msk [vmem:[%s10766_s7 + $0xa8] sm:$0xff] %vm5716_vm0, %v4573_v47  ;;  %v4257_v60 = vmax.f32 %v9402_v63, %v4007_v37  ;;  %v2032_v62 = vadd.f32 %v9081_v15, %v1775_v50  ;;  %v1778_v61 = vmul.f32 %v9433_v49, %v1505_v42  ;;  %v2529_v0 = vmax.f32 %v9373_v59, %v9396_v24  ;;  %v6739_v5 = vpop.f32.mrb[132].mxu0  ;;  %v1500_v34 = vpop.permute.xlu0 %1499  ;;  %v9457_v59 = vld [vmem:[%s10762_s2] ss:$0 sm:$0xff] }
 0x26b   :  { %v6981_v1 = vpop.f32.mrb[22].mxu1  ;;  %v4009_v23 = vmul.f32 0.01, %v9428_v48  ;;  %v4008_v2 = vmul.f32 0.01, %v3280_v56  ;;  %5737 = vst.msk [vmem:[%s10766_s7 + $0xa0] sm:$0xff] %vm5716_vm0, %v4568_v58  ;;  %7138 = vmatprep.mubr.f32.mxu1 %v4256_v54  ;;  %v2530_v15 = vmax.f32 %v2030_v43, %v2280_v53  ;;  %v9463_v9 = vadd.f32 %v9349_v25, %v6739_v5 }
 0x26c   :  { %v4583_v4 = vadd.f32 %v6981_v1, %v9164_v55  ;;  %v2283_v6 = vmul.f32 0.01, %v9425_v44  ;;  %v2282_v7 = vmul.f32 0.01, %v2032_v62  ;;  %v9460_v8 = vadd.f32 %v9457_v59, %v1778_v61  ;;  %v3289_v35 = vpop.f32.mrb[133].mxu0  ;;  %6897 = vmatmul.mubr.f32.gmra.mrb[238].mxu0 %v2529_v0  ;;  %v4577_v10 = vpop.f32.mrb[23].mxu1  ;;  %7139 = vmatmul.mubr.f32.gmra.mrb[128].mxu1 %v4257_v60 }
 0x26d   :  { %v4258_v11 = vmax.f32 %v3280_v56, %v4008_v2  ;;  %v1777_v12 = vmul.f32 %v9433_v49, %v1500_v34  ;;  %v3290_v13 = vadd.f32 %v9349_v25, %v3289_v35  ;;  %v4578_v57 = vadd.f32 %v9164_v55, %v4577_v10  ;;  %v1515_v17 = vpop.permute.xlu1 %1514  ;;  %6899 = vmatprep.mubr.f32.mxu0 %v2530_v15 }
 0x26e   :  { %5740 = vst.msk [vmem:[%s10766_s7 + $0xb8] sm:$0xff] %vm5716_vm0, %v4583_v4  ;;  %v4011_v19 = vmul.f32 0.01, %v9463_v9  ;;  %v1780_v18 = vmul.f32 %v9433_v49, %v1515_v17  ;;  %v2531_v21 = vmax.f32 %v9399_v16, %v9422_v3  ;;  %v2532_v22 = vmax.f32 %v2032_v62, %v2282_v7  ;;  %v6742_v27 = vpop.f32.mrb[134].mxu0  ;;  %v1510_v30 = vpop.permute.xlu0 %1509 }
 0x26f   :  { %v6984_v20 = vpop.f32.mrb[24].mxu1  ;;  %v4259_v24 = vmax.f32 %v9428_v48, %v4009_v23  ;;  %v2034_v26 = vadd.f32 %v9457_v59, %v1777_v12  ;;  %v4010_v63 = vmul.f32 0.01, %v3290_v13  ;;  %5739 = vst.msk [vmem:[%s10766_s7 + $0xb0] sm:$0xff] %vm5716_vm0, %v4578_v57  ;;  %7141 = vmatprep.mubr.f32.mxu1 %v4258_v11  ;;  %v2285_v31 = vmul.f32 0.01, %v9460_v8 }
 0x270   :  { %v4593_v29 = vadd.f32 %v6984_v20, %v9164_v55  ;;  %v9485_v16 = vadd.f32 %v9457_v59, %v1780_v18  ;;  %v3305_v32 = vadd.f32 %v9349_v25, %v6742_v27  ;;  %v1779_v33 = vmul.f32 %v9433_v49, %v1510_v30  ;;  %v3299_v36 = vpop.f32.mrb[135].mxu0  ;;  %6900 = vmatmul.mubr.f32.gmra.mrb[240].mxu0 %v2531_v21  ;;  %v4587_v37 = vpop.f32.mrb[25].mxu1 }
 0x271   :  { %v2284_v14 = vmul.f32 0.01, %v2034_v26  ;;  %v4260_v39 = vmax.f32 %v3290_v13, %v4010_v63  ;;  %v3300_v40 = vadd.f32 %v9349_v25, %v3299_v36  ;;  %v4588_v41 = vadd.f32 %v9164_v55, %v4587_v37  ;;  %7142 = vmatmul.mubr.f32.gmra.mrb[130].mxu1 %v4259_v24  ;;  %6902 = vmatprep.mubr.f32.mxu0 %v2532_v22  ;;  %v1525_v28 = vpop.permute.xlu1 %1524 }
 0x272   :  { %5742 = vst.msk [vmem:[%s10766_s7 + $0xc8] sm:$0xff] %vm5716_vm0, %v4593_v29  ;;  %v4261_v43 = vmax.f32 %v9463_v9, %v4011_v19  ;;  %v2036_v38 = vadd.f32 %v9457_v59, %v1779_v33  ;;  %v1782_v45 = vmul.f32 %v9433_v49, %v1525_v28  ;;  %v2533_v46 = vmax.f32 %v9425_v44, %v2283_v6  ;;  %v6745_v50 = vpop.f32.mrb[136].mxu0  ;;  %v1520_v52 = vpop.permute.xlu0 %1519 }
 0x273   :  { %v6987_v47 = vpop.f32.mrb[26].mxu1  ;;  %v4013_v3 = vmul.f32 0.01, %v3305_v32  ;;  %v4012_v48 = vmul.f32 0.01, %v3300_v40  ;;  %5741 = vst.msk [vmem:[%s10766_s7 + $0xc0] sm:$0xff] %vm5716_vm0, %v4588_v41  ;;  %7144 = vmatprep.mubr.f32.mxu1 %v4260_v39  ;;  %v2534_v53 = vmax.f32 %v2034_v26, %v2284_v14  ;;  %v3315_v58 = vadd.f32 %v9349_v25, %v6745_v50 }
 0x274   :  { %v4603_v51 = vadd.f32 %v6987_v47, %v9164_v55  ;;  %v2287_v54 = vmul.f32 0.01, %v9485_v16  ;;  %v2286_v56 = vmul.f32 0.01, %v2036_v38  ;;  %v3309_v42 = vpop.f32.mrb[137].mxu0  ;;  %6903 = vmatmul.mubr.f32.gmra.mrb[242].mxu0 %v2533_v46  ;;  %v4597_v44 = vpop.f32.mrb[27].mxu1  ;;  %v1781_v62 = vmul.f32 %v9433_v49, %v1520_v52 }
 0x275   :  { %v4262_v60 = vmax.f32 %v3300_v40, %v4012_v48  ;;  %v3310_v61 = vadd.f32 %v9349_v25, %v3309_v42  ;;  %v4598_v1 = vadd.f32 %v9164_v55, %v4597_v44  ;;  %7145 = vmatmul.mubr.f32.gmra.mrb[132].mxu1 %v4261_v43  ;;  %v2039_v0 = vadd.f32 %v9457_v59, %v1782_v45 }
 0x276   :  { %5744 = vst.msk [vmem:[%s10766_s7 + $0xd8] sm:$0xff] %vm5716_vm0, %v4603_v51  ;;  %v4015_v23 = vmul.f32 0.01, %v3315_v58  ;;  %6905 = vmatprep.mubr.f32.mxu0 %v2534_v53  ;;  %v2535_v5 = vmax.f32 %v9460_v8, %v2285_v31  ;;  %v2536_v4 = vmax.f32 %v2036_v38, %v2286_v56  ;;  %v4263_v34 = vmax.f32 %v3305_v32, %v4013_v3  ;;  %v6748_v49 = vpop.f32.mrb[138].mxu0 }
 0x277   :  { %v6990_v2 = vpop.f32.mrb[28].mxu1  ;;  %v2038_v15 = vadd.f32 %v9457_v59, %v1781_v62  ;;  %v4014_v6 = vmul.f32 0.01, %v3310_v61  ;;  %5743 = vst.msk [vmem:[%s10766_s7 + $0xd0] sm:$0xff] %vm5716_vm0, %v4598_v1  ;;  %7147 = vmatprep.mubr.f32.mxu1 %v4262_v60  ;;  %v3325_v35 = vadd.f32 %v9349_v25, %v6748_v49  ;;  %v3319_v10 = vpop.f32.mrb[139].mxu0  ;;  %v2537_v19 = vmax.f32 %v9485_v16, %v2287_v54 }
 0x278   :  { %v4613_v7 = vadd.f32 %v6990_v2, %v9164_v55  ;;  %v4607_v9 = vpop.f32.mrb[29].mxu1  ;;  %6906 = vmatmul.mubr.f32.gmra.mrb[244].mxu0 %v2535_v5  ;;  %v3320_v59 = vadd.f32 %v9349_v25, %v3319_v10  ;;  %v2289_v13 = vmul.f32 0.01, %v2039_v0  ;;  %v4265_v57 = vmax.f32 %v3315_v58, %v4015_v23 }
 0x279   :  { %v4608_v8 = vadd.f32 %v9164_v55, %v4607_v9  ;;  %v2288_v11 = vmul.f32 0.01, %v2038_v15  ;;  %v4264_v12 = vmax.f32 %v3310_v61, %v4014_v6  ;;  %7148 = vmatmul.mubr.f32.gmra.mrb[134].mxu1 %v4263_v34  ;;  %6908 = vmatprep.mubr.f32.mxu0 %v2536_v4  ;;  %v4017_v18 = vmul.f32 0.01, %v3325_v35 }
 0x27a   :  { %5746 = vst.msk [vmem:[%s10766_s7 + $0xe8] sm:$0xff] %vm5716_vm0, %v4613_v7  ;;  %v4016_v20 = vmul.f32 0.01, %v3320_v59  ;;  %v6751_v21 = vpop.f32.mrb[140].mxu0  ;;  %v2539_v32 = vmax.f32 %v2039_v0, %v2289_v13 }
 0x27b   :  { %5745 = vst.msk [vmem:[%s10766_s7 + $0xe0] sm:$0xff] %vm5716_vm0, %v4608_v8  ;;  %v6993_v17 = vpop.f32.mrb[30].mxu1  ;;  %7150 = vmatprep.mubr.f32.mxu1 %v4264_v12  ;;  %v2538_v26 = vmax.f32 %v2038_v15, %v2288_v11  ;;  %v3335_v63 = vadd.f32 %v9349_v25, %v6751_v21  ;;  %v3329_v27 = vpop.f32.mrb[141].mxu0  ;;  %v4267_v33 = vmax.f32 %v3325_v35, %v4017_v18 }
 0x27c   :  { %v4623_v22 = vadd.f32 %v6993_v17, %v9164_v55  ;;  %v4617_v24 = vpop.f32.mrb[31].mxu1  ;;  %6909 = vmatmul.mubr.f32.gmra.mrb[246].mxu0 %v2537_v19  ;;  %v4266_v30 = vmax.f32 %v3320_v59, %v4016_v20  ;;  %v3330_v31 = vadd.f32 %v9349_v25, %v3329_v27  ;;  %v9598_v27 = vld [vmem:[%s10765_s6] ss:$0 sm:$0xff] }
 0x27d   :  { %v4618_v29 = vadd.f32 %v9164_v55, %v4617_v24  ;;  %7151 = vmatmul.mubr.f32.gmra.mrb[136].mxu1 %v4265_v57  ;;  %6911 = vmatprep.mubr.f32.mxu0 %v2538_v26  ;;  %v4019_v36 = vmul.f32 0.01, %v3335_v63 }
 0x27e   :  { %5748 = vst.msk [vmem:[%s10766_s7 + $0xf8] sm:$0xff] %vm5716_vm0, %v4623_v22  ;;  %v4018_v37 = vmul.f32 0.01, %v3330_v31  ;;  %v6754_v14 = vpop.f32.mrb[142].mxu0  ;;  %7153 = vmatprep.mubr.f32.mxu1 %v4266_v30 }
 0x27f   :  { %5747 = vst.msk [vmem:[%s10766_s7 + $0xf0] sm:$0xff] %vm5716_vm0, %v4618_v29  ;;  %v6996_v16 = vpop.f32.mrb[32].mxu1  ;;  %v3345_v41 = vadd.f32 %v9349_v25, %v6754_v14  ;;  %v3339_v28 = vpop.f32.mrb[143].mxu0  ;;  %v4269_v46 = vmax.f32 %v3335_v63, %v4019_v36 }
 0x280   :  { %v4633_v39 = vadd.f32 %v6996_v16, %v9164_v55  ;;  %v4627_v40 = vpop.f32.mrb[33].mxu1  ;;  %6912 = vmatmul.mubr.f32.gmra.mrb[248].mxu0 %v2539_v32  ;;  %v4268_v38 = vmax.f32 %v3330_v31, %v4018_v37  ;;  %v3340_v45 = vadd.f32 %v9349_v25, %v3339_v28 }
 0x281   :  { %v4628_v43 = vadd.f32 %v9164_v55, %v4627_v40  ;;  %7154 = vmatmul.mubr.f32.gmra.mrb[138].mxu1 %v4267_v33  ;;  %v4021_v3 = vmul.f32 0.01, %v3345_v41 }
 0x282   :  { %5750 = vst.msk [vmem:[%s10766_s7 + $0x108] sm:$0xff] %vm5716_vm0, %v4633_v39  ;;  %v4020_v48 = vmul.f32 0.01, %v3340_v45  ;;  %v6757_v50 = vpop.f32.mrb[144].mxu0  ;;  %7156 = vmatprep.mubr.f32.mxu1 %v4268_v38 }
 0x283   :  { %5749 = vst.msk [vmem:[%s10766_s7 + $0x100] sm:$0xff] %vm5716_vm0, %v4628_v43  ;;  %v6999_v47 = vpop.f32.mrb[34].mxu1  ;;  %v3355_v53 = vadd.f32 %v9349_v25, %v6757_v50  ;;  %v3349_v54 = vpop.f32.mrb[145].mxu0  ;;  %v4271_v60 = vmax.f32 %v3345_v41, %v4021_v3 }
 0x284   :  { %v4643_v51 = vadd.f32 %v6999_v47, %v9164_v55  ;;  %v4637_v52 = vpop.f32.mrb[35].mxu1  ;;  %v4270_v58 = vmax.f32 %v3340_v45, %v4020_v48  ;;  %v3350_v42 = vadd.f32 %v9349_v25, %v3349_v54 }
 0x285   :  { %v4638_v56 = vadd.f32 %v9164_v55, %v4637_v52  ;;  %7157 = vmatmul.mubr.f32.gmra.mrb[140].mxu1 %v4269_v46  ;;  %v4023_v62 = vmul.f32 0.01, %v3355_v53 }
 0x286   :  { %5752 = vst.msk [vmem:[%s10766_s7 + $0x118] sm:$0xff] %vm5716_vm0, %v4643_v51  ;;  %v4022_v61 = vmul.f32 0.01, %v3350_v42  ;;  %v6760_v1 = vpop.f32.mrb[146].mxu0  ;;  %7159 = vmatprep.mubr.f32.mxu1 %v4270_v58 }
 0x287   :  { %5751 = vst.msk [vmem:[%s10766_s7 + $0x110] sm:$0xff] %vm5716_vm0, %v4638_v56  ;;  %v7002_v44 = vpop.f32.mrb[36].mxu1  ;;  %v3365_v2 = vadd.f32 %v9349_v25, %v6760_v1  ;;  %v3359_v5 = vpop.f32.mrb[147].mxu0  ;;  %v4273_v49 = vmax.f32 %v3355_v53, %v4023_v62 }
 0x288   :  { %v4653_v0 = vadd.f32 %v7002_v44, %v9164_v55  ;;  %v4647_v23 = vpop.f32.mrb[37].mxu1  ;;  %v4272_v34 = vmax.f32 %v3350_v42, %v4022_v61  ;;  %v3360_v15 = vadd.f32 %v9349_v25, %v3359_v5 }
 0x289   :  { %v4648_v4 = vadd.f32 %v9164_v55, %v4647_v23  ;;  %7160 = vmatmul.mubr.f32.gmra.mrb[142].mxu1 %v4271_v60  ;;  %v4025_v7 = vmul.f32 0.01, %v3365_v2 }
 0x28a   :  { %5754 = vst.msk [vmem:[%s10766_s7 + $0x128] sm:$0xff] %vm5716_vm0, %v4653_v0  ;;  %v4024_v9 = vmul.f32 0.01, %v3360_v15  ;;  %v6763_v35 = vpop.f32.mrb[148].mxu0  ;;  %7162 = vmatprep.mubr.f32.mxu1 %v4272_v34 }
 0x28b   :  { %5753 = vst.msk [vmem:[%s10766_s7 + $0x120] sm:$0xff] %vm5716_vm0, %v4648_v4  ;;  %v7005_v6 = vpop.f32.mrb[38].mxu1  ;;  %v3375_v11 = vadd.f32 %v9349_v25, %v6763_v35  ;;  %v3369_v12 = vpop.f32.mrb[149].mxu0  ;;  %v4275_v19 = vmax.f32 %v3365_v2, %v4025_v7 }
 0x28c   :  { %v4663_v10 = vadd.f32 %v7005_v6, %v9164_v55  ;;  %v4657_v8 = vpop.f32.mrb[39].mxu1  ;;  %v4274_v13 = vmax.f32 %v3360_v15, %v4024_v9  ;;  %v3370_v57 = vadd.f32 %v9349_v25, %v3369_v12 }
 0x28d   :  { %v4658_v59 = vadd.f32 %v9164_v55, %v4657_v8  ;;  %7163 = vmatmul.mubr.f32.gmra.mrb[144].mxu1 %v4273_v49  ;;  %v4027_v18 = vmul.f32 0.01, %v3375_v11 }
 0x28e   :  { %5756 = vst.msk [vmem:[%s10766_s7 + $0x138] sm:$0xff] %vm5716_vm0, %v4663_v10  ;;  %v4026_v20 = vmul.f32 0.01, %v3370_v57  ;;  %v6766_v21 = vpop.f32.mrb[150].mxu0  ;;  %7165 = vmatprep.mubr.f32.mxu1 %v4274_v13 }
 0x28f   :  { %5755 = vst.msk [vmem:[%s10766_s7 + $0x130] sm:$0xff] %vm5716_vm0, %v4658_v59  ;;  %v7008_v17 = vpop.f32.mrb[40].mxu1  ;;  %v3385_v26 = vadd.f32 %v9349_v25, %v6766_v21  ;;  %v3379_v63 = vpop.f32.mrb[151].mxu0  ;;  %v4277_v16 = vmax.f32 %v3375_v11, %v4027_v18 }
 0x290   :  { %v4673_v22 = vadd.f32 %v7008_v17, %v9164_v55  ;;  %v4667_v24 = vpop.f32.mrb[41].mxu1  ;;  %v4276_v30 = vmax.f32 %v3370_v57, %v4026_v20  ;;  %v3380_v55 = vadd.f32 %v9349_v25, %v3379_v63 }
 0x291   :  { %v4668_v29 = vadd.f32 %v9598_v27, %v4667_v24  ;;  %7166 = vmatmul.mubr.f32.gmra.mrb[146].mxu1 %v4275_v19  ;;  %v4029_v32 = vmul.f32 0.01, %v3385_v26 }
 0x292   :  { %5758 = vst.msk [vmem:[%s10766_s7 + $0x148] sm:$0xff] %vm5716_vm0, %v4673_v22  ;;  %v4028_v33 = vmul.f32 0.01, %v3380_v55  ;;  %v6769_v36 = vpop.f32.mrb[152].mxu0  ;;  %7168 = vmatprep.mubr.f32.mxu1 %v4276_v30 }
 0x293   :  { %5757 = vst.msk [vmem:[%s10766_s7 + $0x140] sm:$0xff] %vm5716_vm0, %v4668_v29  ;;  %v7011_v31 = vpop.f32.mrb[42].mxu1  ;;  %v3395_v39 = vadd.f32 %v9349_v25, %v6769_v36  ;;  %v3389_v40 = vpop.f32.mrb[153].mxu0  ;;  %v4279_v45 = vmax.f32 %v3385_v26, %v4029_v32 }
 0x294   :  { %v4683_v37 = vadd.f32 %v9598_v27, %v7011_v31  ;;  %v4677_v14 = vpop.f32.mrb[43].mxu1  ;;  %v4278_v28 = vmax.f32 %v3380_v55, %v4028_v33  ;;  %v3390_v43 = vadd.f32 %v9349_v25, %v3389_v40 }
 0x295   :  { %v4678_v41 = vadd.f32 %v9598_v27, %v4677_v14  ;;  %7169 = vmatmul.mubr.f32.gmra.mrb[148].mxu1 %v4277_v16  ;;  %v4031_v47 = vmul.f32 0.01, %v3395_v39 }
 0x296   :  { %5760 = vst.msk [vmem:[%s10766_s7 + $0x158] sm:$0xff] %vm5716_vm0, %v4683_v37  ;;  %v4030_v46 = vmul.f32 0.01, %v3390_v43  ;;  %v6772_v3 = vpop.f32.mrb[154].mxu0  ;;  %7171 = vmatprep.mubr.f32.mxu1 %v4278_v28 }
 0x297   :  { %5759 = vst.msk [vmem:[%s10766_s7 + $0x150] sm:$0xff] %vm5716_vm0, %v4678_v41  ;;  %v7014_v38 = vpop.f32.mrb[44].mxu1  ;;  %v3405_v51 = vadd.f32 %v9349_v25, %v6772_v3  ;;  %v3399_v52 = vpop.f32.mrb[155].mxu0  ;;  %v4281_v42 = vmax.f32 %v3395_v39, %v4031_v47 }
 0x298   :  { %v4693_v48 = vadd.f32 %v9598_v27, %v7014_v38  ;;  %v4687_v50 = vpop.f32.mrb[45].mxu1  ;;  %v4280_v54 = vmax.f32 %v3390_v43, %v4030_v46  ;;  %v3400_v56 = vadd.f32 %v9349_v25, %v3399_v52 }
 0x299   :  { %v4688_v53 = vadd.f32 %v9598_v27, %v4687_v50  ;;  %7172 = vmatmul.mubr.f32.gmra.mrb[150].mxu1 %v4279_v45  ;;  %v4033_v44 = vmul.f32 0.01, %v3405_v51 }
 0x29a   :  { %5762 = vst.msk [vmem:[%s10766_s7 + $0x168] sm:$0xff] %vm5716_vm0, %v4693_v48  ;;  %v4032_v60 = vmul.f32 0.01, %v3400_v56  ;;  %v6775_v62 = vpop.f32.mrb[156].mxu0  ;;  %7174 = vmatprep.mubr.f32.mxu1 %v4280_v54 }
 0x29b   :  { %5761 = vst.msk [vmem:[%s10766_s7 + $0x160] sm:$0xff] %vm5716_vm0, %v4688_v53  ;;  %v7017_v58 = vpop.f32.mrb[46].mxu1  ;;  %v3415_v0 = vadd.f32 %v9349_v25, %v6775_v62  ;;  %v3409_v23 = vpop.f32.mrb[157].mxu0  ;;  %v4283_v15 = vmax.f32 %v3405_v51, %v4033_v44 }
 0x29c   :  { %v4703_v61 = vadd.f32 %v9598_v27, %v7017_v58  ;;  %v4697_v1 = vpop.f32.mrb[47].mxu1  ;;  %v4282_v5 = vmax.f32 %v3400_v56, %v4032_v60  ;;  %v3410_v4 = vadd.f32 %v9349_v25, %v3409_v23 }
 0x29d   :  { %v4698_v2 = vadd.f32 %v9598_v27, %v4697_v1  ;;  %7175 = vmatmul.mubr.f32.gmra.mrb[152].mxu1 %v4281_v42  ;;  %v4035_v6 = vmul.f32 0.01, %v3415_v0 }
 0x29e   :  { %5764 = vst.msk [vmem:[%s10766_s7 + $0x178] sm:$0xff] %vm5716_vm0, %v4703_v61  ;;  %v4034_v49 = vmul.f32 0.01, %v3410_v4  ;;  %v6778_v7 = vpop.f32.mrb[158].mxu0  ;;  %7177 = vmatprep.mubr.f32.mxu1 %v4282_v5 }
 0x29f   :  { %5763 = vst.msk [vmem:[%s10766_s7 + $0x170] sm:$0xff] %vm5716_vm0, %v4698_v2  ;;  %v7020_v34 = vpop.f32.mrb[48].mxu1  ;;  %v3425_v10 = vadd.f32 %v9349_v25, %v6778_v7  ;;  %v3419_v8 = vpop.f32.mrb[159].mxu0  ;;  %v4285_v57 = vmax.f32 %v3415_v0, %v4035_v6 }
 0x2a0   :  { %v4713_v9 = vadd.f32 %v9598_v27, %v7020_v34  ;;  %v4707_v35 = vpop.f32.mrb[49].mxu1  ;;  %v4284_v12 = vmax.f32 %v3410_v4, %v4034_v49  ;;  %v3420_v59 = vadd.f32 %v9349_v25, %v3419_v8 }
 0x2a1   :  { %v4708_v11 = vadd.f32 %v9598_v27, %v4707_v35  ;;  %7178 = vmatmul.mubr.f32.gmra.mrb[154].mxu1 %v4283_v15  ;;  %v4037_v17 = vmul.f32 0.01, %v3425_v10 }
 0x2a2   :  { %5766 = vst.msk [vmem:[%s10766_s7 + $0x188] sm:$0xff] %vm5716_vm0, %v4713_v9  ;;  %v4036_v19 = vmul.f32 0.01, %v3420_v59  ;;  %v6781_v18 = vpop.f32.mrb[160].mxu0  ;;  %7180 = vmatprep.mubr.f32.mxu1 %v4284_v12 }
 0x2a3   :  { %5765 = vst.msk [vmem:[%s10766_s7 + $0x180] sm:$0xff] %vm5716_vm0, %v4708_v11  ;;  %v7023_v13 = vpop.f32.mrb[50].mxu1  ;;  %v3435_v22 = vadd.f32 %v9349_v25, %v6781_v18  ;;  %v3429_v24 = vpop.f32.mrb[161].mxu0  ;;  %v4287_v55 = vmax.f32 %v3425_v10, %v4037_v17 }
 0x2a4   :  { %v4723_v20 = vadd.f32 %v9598_v27, %v7023_v13  ;;  %v4717_v21 = vpop.f32.mrb[51].mxu1  ;;  %v4286_v63 = vmax.f32 %v3420_v59, %v4036_v19  ;;  %v3430_v29 = vadd.f32 %v9349_v25, %v3429_v24 }
 0x2a5   :  { %v4718_v26 = vadd.f32 %v9598_v27, %v4717_v21  ;;  %7181 = vmatmul.mubr.f32.gmra.mrb[156].mxu1 %v4285_v57  ;;  %v4039_v31 = vmul.f32 0.01, %v3435_v22 }
 0x2a6   :  { %5768 = vst.msk [vmem:[%s10766_s7 + $0x198] sm:$0xff] %vm5716_vm0, %v4723_v20  ;;  %v4038_v16 = vmul.f32 0.01, %v3430_v29  ;;  %v6784_v32 = vpop.f32.mrb[162].mxu0  ;;  %7183 = vmatprep.mubr.f32.mxu1 %v4286_v63 }
 0x2a7   :  { %5767 = vst.msk [vmem:[%s10766_s7 + $0x190] sm:$0xff] %vm5716_vm0, %v4718_v26  ;;  %v7026_v30 = vpop.f32.mrb[52].mxu1  ;;  %v3445_v37 = vadd.f32 %v9349_v25, %v6784_v32  ;;  %v3439_v14 = vpop.f32.mrb[163].mxu0  ;;  %v4289_v43 = vmax.f32 %v3435_v22, %v4039_v31 }
 0x2a8   :  { %v4733_v33 = vadd.f32 %v9598_v27, %v7026_v30  ;;  %v4727_v36 = vpop.f32.mrb[53].mxu1  ;;  %v4288_v40 = vmax.f32 %v3430_v29, %v4038_v16  ;;  %v3440_v41 = vadd.f32 %v9349_v25, %v3439_v14 }
 0x2a9   :  { %v4728_v39 = vadd.f32 %v9598_v27, %v4727_v36  ;;  %7184 = vmatmul.mubr.f32.gmra.mrb[158].mxu1 %v4287_v55  ;;  %v4041_v38 = vmul.f32 0.01, %v3445_v37 }
 0x2aa   :  { %5770 = vst.msk [vmem:[%s10766_s7 + $0x1a8] sm:$0xff] %vm5716_vm0, %v4733_v33  ;;  %v4040_v45 = vmul.f32 0.01, %v3440_v41  ;;  %v6787_v47 = vpop.f32.mrb[164].mxu0  ;;  %7186 = vmatprep.mubr.f32.mxu1 %v4288_v40 }
 0x2ab   :  { %5769 = vst.msk [vmem:[%s10766_s7 + $0x1a0] sm:$0xff] %vm5716_vm0, %v4728_v39  ;;  %v7029_v28 = vpop.f32.mrb[54].mxu1  ;;  %v3455_v48 = vadd.f32 %v9349_v25, %v6787_v47  ;;  %v3449_v50 = vpop.f32.mrb[165].mxu0  ;;  %v4291_v56 = vmax.f32 %v3445_v37, %v4041_v38 }
 0x2ac   :  { %v4743_v46 = vadd.f32 %v9598_v27, %v7029_v28  ;;  %v4737_v3 = vpop.f32.mrb[55].mxu1  ;;  %v4290_v52 = vmax.f32 %v3440_v41, %v4040_v45  ;;  %v3450_v53 = vadd.f32 %v9349_v25, %v3449_v50 }
 0x2ad   :  { %v4738_v51 = vadd.f32 %v9598_v27, %v4737_v3  ;;  %7187 = vmatmul.mubr.f32.gmra.mrb[160].mxu1 %v4289_v43  ;;  %v4043_v58 = vmul.f32 0.01, %v3455_v48 }
 0x2ae   :  { %5772 = vst.msk [vmem:[%s10766_s7 + $0x1b8] sm:$0xff] %vm5716_vm0, %v4743_v46  ;;  %v4042_v42 = vmul.f32 0.01, %v3450_v53  ;;  %v6790_v44 = vpop.f32.mrb[166].mxu0  ;;  %7189 = vmatprep.mubr.f32.mxu1 %v4290_v52 }
 0x2af   :  { %5771 = vst.msk [vmem:[%s10766_s7 + $0x1b0] sm:$0xff] %vm5716_vm0, %v4738_v51  ;;  %v7032_v54 = vpop.f32.mrb[56].mxu1  ;;  %v3465_v61 = vadd.f32 %v9349_v25, %v6790_v44  ;;  %v3459_v1 = vpop.f32.mrb[167].mxu0  ;;  %v4293_v4 = vmax.f32 %v3455_v48, %v4043_v58 }
 0x2b0   :  { %v4753_v60 = vadd.f32 %v9598_v27, %v7032_v54  ;;  %v4747_v62 = vpop.f32.mrb[57].mxu1  ;;  %v4292_v23 = vmax.f32 %v3450_v53, %v4042_v42  ;;  %v3460_v2 = vadd.f32 %v9349_v25, %v3459_v1 }
 0x2b1   :  { %v4748_v0 = vadd.f32 %v9598_v27, %v4747_v62  ;;  %7190 = vmatmul.mubr.f32.gmra.mrb[162].mxu1 %v4291_v56  ;;  %v4045_v34 = vmul.f32 0.01, %v3465_v61 }
 0x2b2   :  { %5774 = vst.msk [vmem:[%s10766_s7 + $0x1c8] sm:$0xff] %vm5716_vm0, %v4753_v60  ;;  %v4044_v15 = vmul.f32 0.01, %v3460_v2  ;;  %v6793_v6 = vpop.f32.mrb[168].mxu0  ;;  %7192 = vmatprep.mubr.f32.mxu1 %v4292_v23 }
 0x2b3   :  { %5773 = vst.msk [vmem:[%s10766_s7 + $0x1c0] sm:$0xff] %vm5716_vm0, %v4748_v0  ;;  %v7035_v5 = vpop.f32.mrb[58].mxu1  ;;  %v3475_v9 = vadd.f32 %v9349_v25, %v6793_v6  ;;  %v3469_v35 = vpop.f32.mrb[169].mxu0  ;;  %v4295_v59 = vmax.f32 %v3465_v61, %v4045_v34 }
 0x2b4   :  { %v4763_v49 = vadd.f32 %v9598_v27, %v7035_v5  ;;  %v4757_v7 = vpop.f32.mrb[59].mxu1  ;;  %v4294_v8 = vmax.f32 %v3460_v2, %v4044_v15  ;;  %v3470_v11 = vadd.f32 %v9349_v25, %v3469_v35 }
 0x2b5   :  { %v4758_v10 = vadd.f32 %v9598_v27, %v4757_v7  ;;  %7193 = vmatmul.mubr.f32.gmra.mrb[164].mxu1 %v4293_v4  ;;  %v4047_v13 = vmul.f32 0.01, %v3475_v9 }
 0x2b6   :  { %5776 = vst.msk [vmem:[%s10766_s7 + $0x1d8] sm:$0xff] %vm5716_vm0, %v4763_v49  ;;  %v4046_v57 = vmul.f32 0.01, %v3470_v11  ;;  %v6796_v17 = vpop.f32.mrb[170].mxu0  ;;  %7195 = vmatprep.mubr.f32.mxu1 %v4294_v8  ;;  %v9770_v49 = vld [vmem:[%s10764_s4] ss:$0 sm:$0xff] }
 0x2b7   :  { %5775 = vst.msk [vmem:[%s10766_s7 + $0x1d0] sm:$0xff] %vm5716_vm0, %v4758_v10  ;;  %v7038_v12 = vpop.f32.mrb[60].mxu1  ;;  %v3485_v20 = vadd.f32 %v9349_v25, %v6796_v17  ;;  %v3479_v21 = vpop.f32.mrb[171].mxu0  ;;  %v4297_v29 = vmax.f32 %v3475_v9, %v4047_v13 }
 0x2b8   :  { %v4773_v19 = vadd.f32 %v9598_v27, %v7038_v12  ;;  %v4767_v18 = vpop.f32.mrb[61].mxu1  ;;  %v4296_v24 = vmax.f32 %v3470_v11, %v4046_v57  ;;  %v3480_v26 = vadd.f32 %v9349_v25, %v3479_v21 }
 0x2b9   :  { %v4768_v22 = vadd.f32 %v9598_v27, %v4767_v18  ;;  %7196 = vmatmul.mubr.f32.gmra.mrb[166].mxu1 %v4295_v59  ;;  %v4049_v30 = vmul.f32 0.01, %v3485_v20 }
 0x2ba   :  { %5778 = vst.msk [vmem:[%s10766_s7 + $0x1e8] sm:$0xff] %vm5716_vm0, %v4773_v19  ;;  %v4048_v55 = vmul.f32 0.01, %v3480_v26  ;;  %v6799_v31 = vpop.f32.mrb[172].mxu0  ;;  %7198 = vmatprep.mubr.f32.mxu1 %v4296_v24 }
 0x2bb   :  { %5777 = vst.msk [vmem:[%s10766_s7 + $0x1e0] sm:$0xff] %vm5716_vm0, %v4768_v22  ;;  %v7041_v63 = vpop.f32.mrb[62].mxu1  ;;  %v3495_v33 = vadd.f32 %v9349_v25, %v6799_v31  ;;  %v3489_v36 = vpop.f32.mrb[173].mxu0  ;;  %v4299_v41 = vmax.f32 %v3485_v20, %v4049_v30 }
 0x2bc   :  { %v4783_v16 = vadd.f32 %v9598_v27, %v7041_v63  ;;  %v4777_v32 = vpop.f32.mrb[63].mxu1  ;;  %v4298_v14 = vmax.f32 %v3480_v26, %v4048_v55  ;;  %v3490_v39 = vadd.f32 %v9349_v25, %v3489_v36 }
 0x2bd   :  { %v4778_v37 = vadd.f32 %v9598_v27, %v4777_v32  ;;  %7199 = vmatmul.mubr.f32.gmra.mrb[168].mxu1 %v4297_v29  ;;  %v4051_v28 = vmul.f32 0.01, %v3495_v33 }
 0x2be   :  { %5780 = vst.msk [vmem:[%s10766_s7 + $0x1f8] sm:$0xff] %vm5716_vm0, %v4783_v16  ;;  %v4050_v43 = vmul.f32 0.01, %v3490_v39  ;;  %v6802_v38 = vpop.f32.mrb[174].mxu0  ;;  %7201 = vmatprep.mubr.f32.mxu1 %v4298_v14 }
 0x2bf   :  { %5779 = vst.msk [vmem:[%s10766_s7 + $0x1f0] sm:$0xff] %vm5716_vm0, %v4778_v37  ;;  %v7044_v40 = vpop.f32.mrb[64].mxu1  ;;  %v3505_v46 = vadd.f32 %v9349_v25, %v6802_v38  ;;  %v3499_v3 = vpop.f32.mrb[175].mxu0  ;;  %v4301_v53 = vmax.f32 %v3495_v33, %v4051_v28 }
 0x2c0   :  { %v4793_v45 = vadd.f32 %v9598_v27, %v7044_v40  ;;  %v4787_v47 = vpop.f32.mrb[65].mxu1  ;;  %v4300_v50 = vmax.f32 %v3490_v39, %v4050_v43  ;;  %v3500_v51 = vadd.f32 %v9349_v25, %v3499_v3 }
 0x2c1   :  { %v4788_v48 = vadd.f32 %v9598_v27, %v4787_v47  ;;  %7202 = vmatmul.mubr.f32.gmra.mrb[170].mxu1 %v4299_v41  ;;  %v4053_v54 = vmul.f32 0.01, %v3505_v46 }
 0x2c2   :  { %5782 = vst.msk [vmem:[%s10766_s7 + $0x208] sm:$0xff] %vm5716_vm0, %v4793_v45  ;;  %v4052_v56 = vmul.f32 0.01, %v3500_v51  ;;  %v6805_v58 = vpop.f32.mrb[176].mxu0  ;;  %7204 = vmatprep.mubr.f32.mxu1 %v4300_v50 }
 0x2c3   :  { %5781 = vst.msk [vmem:[%s10766_s7 + $0x200] sm:$0xff] %vm5716_vm0, %v4788_v48  ;;  %v7047_v52 = vpop.f32.mrb[66].mxu1  ;;  %v3515_v60 = vadd.f32 %v9349_v25, %v6805_v58  ;;  %v3509_v62 = vpop.f32.mrb[177].mxu0  ;;  %v4303_v2 = vmax.f32 %v3505_v46, %v4053_v54 }
 0x2c4   :  { %v4803_v42 = vadd.f32 %v9598_v27, %v7047_v52  ;;  %v4797_v44 = vpop.f32.mrb[67].mxu1  ;;  %v4302_v1 = vmax.f32 %v3500_v51, %v4052_v56  ;;  %v3510_v0 = vadd.f32 %v9349_v25, %v3509_v62 }
 0x2c5   :  { %v4798_v61 = vadd.f32 %v9598_v27, %v4797_v44  ;;  %7205 = vmatmul.mubr.f32.gmra.mrb[172].mxu1 %v4301_v53  ;;  %v4055_v5 = vmul.f32 0.01, %v3515_v60 }
 0x2c6   :  { %5784 = vst.msk [vmem:[%s10766_s7 + $0x218] sm:$0xff] %vm5716_vm0, %v4803_v42  ;;  %v4054_v4 = vmul.f32 0.01, %v3510_v0  ;;  %v6808_v34 = vpop.f32.mrb[178].mxu0  ;;  %7207 = vmatprep.mubr.f32.mxu1 %v4302_v1 }
 0x2c7   :  { %5783 = vst.msk [vmem:[%s10766_s7 + $0x210] sm:$0xff] %vm5716_vm0, %v4798_v61  ;;  %v7050_v23 = vpop.f32.mrb[68].mxu1  ;;  %v3525_v25 = vadd.f32 %v9770_v49, %v6808_v34  ;;  %v3519_v7 = vpop.f32.mrb[179].mxu0  ;;  %v4305_v11 = vmax.f32 %v3515_v60, %v4055_v5 }
 0x2c8   :  { %v4813_v15 = vadd.f32 %v9598_v27, %v7050_v23  ;;  %v4807_v6 = vpop.f32.mrb[69].mxu1  ;;  %v4304_v35 = vmax.f32 %v3510_v0, %v4054_v4  ;;  %v3520_v10 = vadd.f32 %v9770_v49, %v3519_v7 }
 0x2c9   :  { %v4808_v9 = vadd.f32 %v9598_v27, %v4807_v6  ;;  %7208 = vmatmul.mubr.f32.gmra.mrb[174].mxu1 %v4303_v2  ;;  %v4057_v12 = vmul.f32 0.01, %v3525_v25 }
 0x2ca   :  { %5786 = vst.msk [vmem:[%s10766_s7 + $0x228] sm:$0xff] %vm5716_vm0, %v4813_v15  ;;  %v4056_v59 = vmul.f32 0.01, %v3520_v10  ;;  %v6811_v13 = vpop.f32.mrb[180].mxu0  ;;  %7210 = vmatprep.mubr.f32.mxu1 %v4304_v35 }
 0x2cb   :  { %5785 = vst.msk [vmem:[%s10766_s7 + $0x220] sm:$0xff] %vm5716_vm0, %v4808_v9  ;;  %v7053_v8 = vpop.f32.mrb[70].mxu1  ;;  %v3535_v19 = vadd.f32 %v9770_v49, %v6811_v13  ;;  %v3529_v18 = vpop.f32.mrb[181].mxu0  ;;  %v4307_v26 = vmax.f32 %v3525_v25, %v4057_v12 }
 0x2cc   :  { %v4823_v57 = vadd.f32 %v9598_v27, %v7053_v8  ;;  %v4817_v17 = vpop.f32.mrb[71].mxu1  ;;  %v4306_v21 = vmax.f32 %v3520_v10, %v4056_v59  ;;  %v3530_v22 = vadd.f32 %v9770_v49, %v3529_v18 }
 0x2cd   :  { %v4818_v20 = vadd.f32 %v9598_v27, %v4817_v17  ;;  %7211 = vmatmul.mubr.f32.gmra.mrb[176].mxu1 %v4305_v11  ;;  %v4059_v63 = vmul.f32 0.01, %v3535_v19 }
 0x2ce   :  { %5788 = vst.msk [vmem:[%s10766_s7 + $0x238] sm:$0xff] %vm5716_vm0, %v4823_v57  ;;  %v4058_v29 = vmul.f32 0.01, %v3530_v22  ;;  %v6814_v30 = vpop.f32.mrb[182].mxu0  ;;  %7213 = vmatprep.mubr.f32.mxu1 %v4306_v21 }
 0x2cf   :  { %5787 = vst.msk [vmem:[%s10766_s7 + $0x230] sm:$0xff] %vm5716_vm0, %v4818_v20  ;;  %v7056_v24 = vpop.f32.mrb[72].mxu1  ;;  %v3545_v16 = vadd.f32 %v9770_v49, %v6814_v30  ;;  %v3539_v32 = vpop.f32.mrb[183].mxu0  ;;  %v4309_v39 = vmax.f32 %v3535_v19, %v4059_v63 }
 0x2d0   :  { %v4833_v55 = vadd.f32 %v9598_v27, %v7056_v24  ;;  %v4827_v31 = vpop.f32.mrb[73].mxu1  ;;  %v4308_v36 = vmax.f32 %v3530_v22, %v4058_v29  ;;  %v3540_v37 = vadd.f32 %v9770_v49, %v3539_v32 }
 0x2d1   :  { %v4828_v33 = vadd.f32 %v9598_v27, %v4827_v31  ;;  %7214 = vmatmul.mubr.f32.gmra.mrb[178].mxu1 %v4307_v26  ;;  %v4061_v40 = vmul.f32 0.01, %v3545_v16 }
 0x2d2   :  { %5790 = vst.msk [vmem:[%s10766_s7 + $0x248] sm:$0xff] %vm5716_vm0, %v4833_v55  ;;  %v4060_v41 = vmul.f32 0.01, %v3540_v37  ;;  %v6817_v28 = vpop.f32.mrb[184].mxu0  ;;  %7216 = vmatprep.mubr.f32.mxu1 %v4308_v36 }
 0x2d3   :  { %5789 = vst.msk [vmem:[%s10766_s7 + $0x240] sm:$0xff] %vm5716_vm0, %v4828_v33  ;;  %v7059_v14 = vpop.f32.mrb[74].mxu1  ;;  %v3555_v45 = vadd.f32 %v9770_v49, %v6817_v28  ;;  %v3549_v47 = vpop.f32.mrb[185].mxu0  ;;  %v4311_v51 = vmax.f32 %v3545_v16, %v4061_v40 }
 0x2d4   :  { %v4843_v43 = vadd.f32 %v9598_v27, %v7059_v14  ;;  %v4837_v38 = vpop.f32.mrb[75].mxu1  ;;  %v4310_v3 = vmax.f32 %v3540_v37, %v4060_v41  ;;  %v3550_v48 = vadd.f32 %v9770_v49, %v3549_v47 }
 0x2d5   :  { %v4838_v46 = vadd.f32 %v9598_v27, %v4837_v38  ;;  %7217 = vmatmul.mubr.f32.gmra.mrb[180].mxu1 %v4309_v39  ;;  %v4063_v52 = vmul.f32 0.01, %v3555_v45 }
 0x2d6   :  { %5792 = vst.msk [vmem:[%s10766_s7 + $0x258] sm:$0xff] %vm5716_vm0, %v4843_v43  ;;  %v4062_v53 = vmul.f32 0.01, %v3550_v48  ;;  %v6820_v54 = vpop.f32.mrb[186].mxu0  ;;  %7219 = vmatprep.mubr.f32.mxu1 %v4310_v3 }
 0x2d7   :  { %5791 = vst.msk [vmem:[%s10766_s7 + $0x250] sm:$0xff] %vm5716_vm0, %v4838_v46  ;;  %v7062_v50 = vpop.f32.mrb[76].mxu1  ;;  %v3565_v42 = vadd.f32 %v9770_v49, %v6820_v54  ;;  %v3559_v44 = vpop.f32.mrb[187].mxu0  ;;  %v4313_v0 = vmax.f32 %v3555_v45, %v4063_v52 }
 0x2d8   :  { %v4853_v56 = vadd.f32 %v9598_v27, %v7062_v50  ;;  %v4847_v58 = vpop.f32.mrb[77].mxu1  ;;  %v4312_v62 = vmax.f32 %v3550_v48, %v4062_v53  ;;  %v3560_v61 = vadd.f32 %v9770_v49, %v3559_v44 }
 0x2d9   :  { %v4848_v60 = vadd.f32 %v9598_v27, %v4847_v58  ;;  %7220 = vmatmul.mubr.f32.gmra.mrb[182].mxu1 %v4311_v51  ;;  %v4065_v23 = vmul.f32 0.01, %v3565_v42 }
 0x2da   :  { %5794 = vst.msk [vmem:[%s10766_s7 + $0x268] sm:$0xff] %vm5716_vm0, %v4853_v56  ;;  %v4064_v2 = vmul.f32 0.01, %v3560_v61  ;;  %v6823_v5 = vpop.f32.mrb[188].mxu0  ;;  %7222 = vmatprep.mubr.f32.mxu1 %v4312_v62 }
 0x2db   :  { %5793 = vst.msk [vmem:[%s10766_s7 + $0x260] sm:$0xff] %vm5716_vm0, %v4848_v60  ;;  %v7065_v1 = vpop.f32.mrb[78].mxu1  ;;  %v3575_v15 = vadd.f32 %v9770_v49, %v6823_v5  ;;  %v3569_v6 = vpop.f32.mrb[189].mxu0  ;;  %v4315_v10 = vmax.f32 %v3565_v42, %v4065_v23 }
 0x2dc   :  { %v4863_v4 = vadd.f32 %v9598_v27, %v7065_v1  ;;  %v4857_v34 = vpop.f32.mrb[79].mxu1  ;;  %v4314_v7 = vmax.f32 %v3560_v61, %v4064_v2  ;;  %v3570_v9 = vadd.f32 %v9770_v49, %v3569_v6 }
 0x2dd   :  { %v4858_v25 = vadd.f32 %v9598_v27, %v4857_v34  ;;  %7223 = vmatmul.mubr.f32.gmra.mrb[184].mxu1 %v4313_v0  ;;  %v4067_v8 = vmul.f32 0.01, %v3575_v15 }
 0x2de   :  { %5796 = vst.msk [vmem:[%s10766_s7 + $0x278] sm:$0xff] %vm5716_vm0, %v4863_v4  ;;  %v4066_v11 = vmul.f32 0.01, %v3570_v9  ;;  %v6826_v12 = vpop.f32.mrb[190].mxu0  ;;  %7225 = vmatprep.mubr.f32.mxu1 %v4314_v7 }
 0x2df   :  { %5795 = vst.msk [vmem:[%s10766_s7 + $0x270] sm:$0xff] %vm5716_vm0, %v4858_v25  ;;  %v7068_v35 = vpop.f32.mrb[80].mxu1  ;;  %v3585_v57 = vadd.f32 %v9770_v49, %v6826_v12  ;;  %v3579_v17 = vpop.f32.mrb[191].mxu0  ;;  %v4317_v22 = vmax.f32 %v3575_v15, %v4067_v8 }
 0x2e0   :  { %v4873_v59 = vadd.f32 %v9598_v27, %v7068_v35  ;;  %v4867_v13 = vpop.f32.mrb[81].mxu1  ;;  %v4316_v18 = vmax.f32 %v3570_v9, %v4066_v11  ;;  %v3580_v20 = vadd.f32 %v9770_v49, %v3579_v17 }
 0x2e1   :  { %v4868_v19 = vadd.f32 %v9598_v27, %v4867_v13  ;;  %7226 = vmatmul.mubr.f32.gmra.mrb[186].mxu1 %v4315_v10  ;;  %v4069_v24 = vmul.f32 0.01, %v3585_v57 }
 0x2e2   :  { %5798 = vst.msk [vmem:[%s10766_s7 + $0x288] sm:$0xff] %vm5716_vm0, %v4873_v59  ;;  %v4068_v26 = vmul.f32 0.01, %v3580_v20  ;;  %v6829_v63 = vpop.f32.mrb[192].mxu0  ;;  %7228 = vmatprep.mubr.f32.mxu1 %v4316_v18 }
 0x2e3   :  { %5797 = vst.msk [vmem:[%s10766_s7 + $0x280] sm:$0xff] %vm5716_vm0, %v4868_v19  ;;  %v7071_v21 = vpop.f32.mrb[82].mxu1  ;;  %v3595_v55 = vadd.f32 %v9770_v49, %v6829_v63  ;;  %v3589_v31 = vpop.f32.mrb[193].mxu0  ;;  %v4319_v37 = vmax.f32 %v3585_v57, %v4069_v24 }
 0x2e4   :  { %v4883_v29 = vadd.f32 %v9598_v27, %v7071_v21  ;;  %v4877_v30 = vpop.f32.mrb[83].mxu1  ;;  %v4318_v32 = vmax.f32 %v3580_v20, %v4068_v26  ;;  %v3590_v33 = vadd.f32 %v9770_v49, %v3589_v31 }
 0x2e5   :  { %v4878_v16 = vadd.f32 %v9598_v27, %v4877_v30  ;;  %7229 = vmatmul.mubr.f32.gmra.mrb[188].mxu1 %v4317_v22  ;;  %v4071_v14 = vmul.f32 0.01, %v3595_v55 }
 0x2e6   :  { %5800 = vst.msk [vmem:[%s10766_s7 + $0x298] sm:$0xff] %vm5716_vm0, %v4883_v29  ;;  %v4070_v39 = vmul.f32 0.01, %v3590_v33  ;;  %v6832_v40 = vpop.f32.mrb[194].mxu0  ;;  %7231 = vmatprep.mubr.f32.mxu1 %v4318_v32 }
 0x2e7   :  { %5799 = vst.msk [vmem:[%s10766_s7 + $0x290] sm:$0xff] %vm5716_vm0, %v4878_v16  ;;  %v7074_v36 = vpop.f32.mrb[84].mxu1  ;;  %v3605_v43 = vadd.f32 %v9770_v49, %v6832_v40  ;;  %v3599_v38 = vpop.f32.mrb[195].mxu0  ;;  %v4321_v48 = vmax.f32 %v3595_v55, %v4071_v14 }
 0x2e8   :  { %v4893_v41 = vadd.f32 %v9598_v27, %v7074_v36  ;;  %v4887_v28 = vpop.f32.mrb[85].mxu1  ;;  %v4320_v47 = vmax.f32 %v3590_v33, %v4070_v39  ;;  %v3600_v46 = vadd.f32 %v9770_v49, %v3599_v38 }
 0x2e9   :  { %v4888_v45 = vadd.f32 %v9598_v27, %v4887_v28  ;;  %7232 = vmatmul.mubr.f32.gmra.mrb[190].mxu1 %v4319_v37  ;;  %v4073_v50 = vmul.f32 0.01, %v3605_v43 }
 0x2ea   :  { %5802 = vst.msk [vmem:[%s10766_s7 + $0x2a8] sm:$0xff] %vm5716_vm0, %v4893_v41  ;;  %v4072_v51 = vmul.f32 0.01, %v3600_v46  ;;  %v6835_v52 = vpop.f32.mrb[196].mxu0  ;;  %7234 = vmatprep.mubr.f32.mxu1 %v4320_v47 }
 0x2eb   :  { %5801 = vst.msk [vmem:[%s10766_s7 + $0x2a0] sm:$0xff] %vm5716_vm0, %v4888_v45  ;;  %v7077_v3 = vpop.f32.mrb[86].mxu1  ;;  %v3615_v56 = vadd.f32 %v9770_v49, %v6835_v52  ;;  %v3609_v58 = vpop.f32.mrb[197].mxu0  ;;  %v4323_v61 = vmax.f32 %v3605_v43, %v4073_v50 }
 0x2ec   :  { %v4903_v53 = vadd.f32 %v9598_v27, %v7077_v3  ;;  %v4897_v54 = vpop.f32.mrb[87].mxu1  ;;  %v4322_v44 = vmax.f32 %v3600_v46, %v4072_v51  ;;  %v3610_v60 = vadd.f32 %v9770_v49, %v3609_v58 }
 0x2ed   :  { %v4898_v42 = vadd.f32 %v9598_v27, %v4897_v54  ;;  %7235 = vmatmul.mubr.f32.gmra.mrb[192].mxu1 %v4321_v48  ;;  %v4075_v1 = vmul.f32 0.01, %v3615_v56 }
 0x2ee   :  { %5804 = vst.msk [vmem:[%s10766_s7 + $0x2b8] sm:$0xff] %vm5716_vm0, %v4903_v53  ;;  %v4074_v0 = vmul.f32 0.01, %v3610_v60  ;;  %v6838_v23 = vpop.f32.mrb[198].mxu0  ;;  %7237 = vmatprep.mubr.f32.mxu1 %v4322_v44 }
 0x2ef   :  { %5803 = vst.msk [vmem:[%s10766_s7 + $0x2b0] sm:$0xff] %vm5716_vm0, %v4898_v42  ;;  %v7080_v62 = vpop.f32.mrb[88].mxu1  ;;  %v3625_v4 = vadd.f32 %v9770_v49, %v6838_v23  ;;  %v3619_v34 = vpop.f32.mrb[199].mxu0  ;;  %v4325_v9 = vmax.f32 %v3615_v56, %v4075_v1 }
 0x2f0   :  { %v4913_v2 = vadd.f32 %v9598_v27, %v7080_v62  ;;  %v4907_v5 = vpop.f32.mrb[89].mxu1  ;;  %v4324_v6 = vmax.f32 %v3610_v60, %v4074_v0  ;;  %v3620_v25 = vadd.f32 %v9770_v49, %v3619_v34 }
 0x2f1   :  { %v4908_v15 = vadd.f32 %v9598_v27, %v4907_v5  ;;  %7238 = vmatmul.mubr.f32.gmra.mrb[194].mxu1 %v4323_v61  ;;  %v4077_v35 = vmul.f32 0.01, %v3625_v4 }
 0x2f2   :  { %5806 = vst.msk [vmem:[%s10766_s7 + $0x2c8] sm:$0xff] %vm5716_vm0, %v4913_v2  ;;  %v4076_v10 = vmul.f32 0.01, %v3620_v25  ;;  %v6841_v8 = vpop.f32.mrb[200].mxu0  ;;  %7240 = vmatprep.mubr.f32.mxu1 %v4324_v6 }
 0x2f3   :  { %5805 = vst.msk [vmem:[%s10766_s7 + $0x2c0] sm:$0xff] %vm5716_vm0, %v4908_v15  ;;  %v7083_v7 = vpop.f32.mrb[90].mxu1  ;;  %v3635_v59 = vadd.f32 %v9770_v49, %v6841_v8  ;;  %v3629_v13 = vpop.f32.mrb[201].mxu0  ;;  %v4327_v20 = vmax.f32 %v3625_v4, %v4077_v35 }
 0x2f4   :  { %v4923_v11 = vadd.f32 %v9598_v27, %v7083_v7  ;;  %v4917_v12 = vpop.f32.mrb[91].mxu1  ;;  %v4326_v17 = vmax.f32 %v3620_v25, %v4076_v10  ;;  %v3630_v19 = vadd.f32 %v9770_v49, %v3629_v13 }
 0x2f5   :  { %v4918_v57 = vadd.f32 %v9598_v27, %v4917_v12  ;;  %7241 = vmatmul.mubr.f32.gmra.mrb[196].mxu1 %v4325_v9  ;;  %v4079_v21 = vmul.f32 0.01, %v3635_v59 }
 0x2f6   :  { %5808 = vst.msk [vmem:[%s10766_s7 + $0x2d8] sm:$0xff] %vm5716_vm0, %v4923_v11  ;;  %v4078_v22 = vmul.f32 0.01, %v3630_v19  ;;  %v6844_v24 = vpop.f32.mrb[202].mxu0  ;;  %7243 = vmatprep.mubr.f32.mxu1 %v4326_v17 }
 0x2f7   :  { %5807 = vst.msk [vmem:[%s10766_s7 + $0x2d0] sm:$0xff] %vm5716_vm0, %v4918_v57  ;;  %v7086_v18 = vpop.f32.mrb[92].mxu1  ;;  %v3645_v29 = vadd.f32 %v9770_v49, %v6844_v24  ;;  %v3639_v30 = vpop.f32.mrb[203].mxu0  ;;  %v4329_v33 = vmax.f32 %v3635_v59, %v4079_v21 }
 0x2f8   :  { %v4933_v26 = vadd.f32 %v9598_v27, %v7086_v18  ;;  %v4927_v63 = vpop.f32.mrb[93].mxu1  ;;  %v4328_v31 = vmax.f32 %v3630_v19, %v4078_v22  ;;  %v3640_v16 = vadd.f32 %v9770_v49, %v3639_v30 }
 0x2f9   :  { %v4928_v55 = vadd.f32 %v9598_v27, %v4927_v63  ;;  %7244 = vmatmul.mubr.f32.gmra.mrb[198].mxu1 %v4327_v20  ;;  %v4081_v36 = vmul.f32 0.01, %v3645_v29 }
 0x2fa   :  { %5810 = vst.msk [vmem:[%s10766_s7 + $0x2e8] sm:$0xff] %vm5716_vm0, %v4933_v26  ;;  %v4080_v37 = vmul.f32 0.01, %v3640_v16  ;;  %v6847_v14 = vpop.f32.mrb[204].mxu0  ;;  %7246 = vmatprep.mubr.f32.mxu1 %v4328_v31 }
 0x2fb   :  { %5809 = vst.msk [vmem:[%s10766_s7 + $0x2e0] sm:$0xff] %vm5716_vm0, %v4928_v55  ;;  %v7089_v32 = vpop.f32.mrb[94].mxu1  ;;  %v3655_v41 = vadd.f32 %v9770_v49, %v6847_v14  ;;  %v3649_v28 = vpop.f32.mrb[205].mxu0  ;;  %v4331_v46 = vmax.f32 %v3645_v29, %v4081_v36 }
 0x2fc   :  { %v4943_v39 = vadd.f32 %v9598_v27, %v7089_v32  ;;  %v4937_v40 = vpop.f32.mrb[95].mxu1  ;;  %v4330_v38 = vmax.f32 %v3640_v16, %v4080_v37  ;;  %v3650_v45 = vadd.f32 %v9770_v49, %v3649_v28 }
 0x2fd   :  { %v4938_v43 = vadd.f32 %v9598_v27, %v4937_v40  ;;  %7247 = vmatmul.mubr.f32.gmra.mrb[200].mxu1 %v4329_v33  ;;  %v4083_v3 = vmul.f32 0.01, %v3655_v41 }
 0x2fe   :  { %5812 = vst.msk [vmem:[%s10766_s7 + $0x2f8] sm:$0xff] %vm5716_vm0, %v4943_v39  ;;  %v4082_v48 = vmul.f32 0.01, %v3650_v45  ;;  %v6850_v50 = vpop.f32.mrb[206].mxu0  ;;  %7249 = vmatprep.mubr.f32.mxu1 %v4330_v38 }
 0x2ff   :  { %5811 = vst.msk [vmem:[%s10766_s7 + $0x2f0] sm:$0xff] %vm5716_vm0, %v4938_v43  ;;  %v7092_v47 = vpop.f32.mrb[96].mxu1  ;;  %v3665_v53 = vadd.f32 %v9770_v49, %v6850_v50  ;;  %v3659_v54 = vpop.f32.mrb[207].mxu0  ;;  %v4333_v60 = vmax.f32 %v3655_v41, %v4083_v3  ;;  %v9992_v41 = vld [vmem:[%s10765_s6] ss:$0 sm:$0xff] }
 0x300   :  { %v4953_v51 = vadd.f32 %v9598_v27, %v7092_v47  ;;  %v4947_v52 = vpop.f32.mrb[97].mxu1  ;;  %v4332_v58 = vmax.f32 %v3650_v45, %v4082_v48  ;;  %v3660_v42 = vadd.f32 %v9770_v49, %v3659_v54 }
 0x301   :  { %v4948_v56 = vadd.f32 %v9598_v27, %v4947_v52  ;;  %7250 = vmatmul.mubr.f32.gmra.mrb[202].mxu1 %v4331_v46  ;;  %v4085_v62 = vmul.f32 0.01, %v3665_v53 }
 0x302   :  { %5814 = vst.msk [vmem:[%s10766_s7 + $0x308] sm:$0xff] %vm5716_vm0, %v4953_v51  ;;  %v4084_v61 = vmul.f32 0.01, %v3660_v42  ;;  %v6853_v1 = vpop.f32.mrb[208].mxu0  ;;  %7252 = vmatprep.mubr.f32.mxu1 %v4332_v58 }
 0x303   :  { %5813 = vst.msk [vmem:[%s10766_s7 + $0x300] sm:$0xff] %vm5716_vm0, %v4948_v56  ;;  %v7095_v44 = vpop.f32.mrb[98].mxu1  ;;  %v3675_v2 = vadd.f32 %v9770_v49, %v6853_v1  ;;  %v3669_v5 = vpop.f32.mrb[209].mxu0  ;;  %v4335_v25 = vmax.f32 %v3665_v53, %v4085_v62 }
 0x304   :  { %v4963_v0 = vadd.f32 %v9598_v27, %v7095_v44  ;;  %v4957_v23 = vpop.f32.mrb[99].mxu1  ;;  %v4334_v34 = vmax.f32 %v3660_v42, %v4084_v61  ;;  %v3670_v15 = vadd.f32 %v9770_v49, %v3669_v5 }
 0x305   :  { %v4958_v4 = vadd.f32 %v9598_v27, %v4957_v23  ;;  %7253 = vmatmul.mubr.f32.gmra.mrb[204].mxu1 %v4333_v60  ;;  %v4087_v7 = vmul.f32 0.01, %v3675_v2 }
 0x306   :  { %5816 = vst.msk [vmem:[%s10766_s7 + $0x318] sm:$0xff] %vm5716_vm0, %v4963_v0  ;;  %v4086_v9 = vmul.f32 0.01, %v3670_v15  ;;  %v6856_v35 = vpop.f32.mrb[210].mxu0  ;;  %7255 = vmatprep.mubr.f32.mxu1 %v4334_v34 }
 0x307   :  { %5815 = vst.msk [vmem:[%s10766_s7 + $0x310] sm:$0xff] %vm5716_vm0, %v4958_v4  ;;  %v7098_v6 = vpop.f32.mrb[100].mxu1  ;;  %v3685_v11 = vadd.f32 %v9770_v49, %v6856_v35  ;;  %v3679_v12 = vpop.f32.mrb[211].mxu0  ;;  %v4337_v19 = vmax.f32 %v3675_v2, %v4087_v7 }
 0x308   :  { %v4973_v10 = vadd.f32 %v9598_v27, %v7098_v6  ;;  %v4967_v8 = vpop.f32.mrb[101].mxu1  ;;  %v4336_v13 = vmax.f32 %v3670_v15, %v4086_v9  ;;  %v3680_v57 = vadd.f32 %v9770_v49, %v3679_v12 }
 0x309   :  { %v4968_v59 = vadd.f32 %v9598_v27, %v4967_v8  ;;  %7256 = vmatmul.mubr.f32.gmra.mrb[206].mxu1 %v4335_v25  ;;  %v4089_v18 = vmul.f32 0.01, %v3685_v11 }
 0x30a   :  { %5818 = vst.msk [vmem:[%s10766_s7 + $0x328] sm:$0xff] %vm5716_vm0, %v4973_v10  ;;  %v4088_v20 = vmul.f32 0.01, %v3680_v57  ;;  %v6859_v21 = vpop.f32.mrb[212].mxu0  ;;  %7258 = vmatprep.mubr.f32.mxu1 %v4336_v13 }
 0x30b   :  { %5817 = vst.msk [vmem:[%s10766_s7 + $0x320] sm:$0xff] %vm5716_vm0, %v4968_v59  ;;  %v7101_v17 = vpop.f32.mrb[102].mxu1  ;;  %v3695_v26 = vadd.f32 %v9770_v49, %v6859_v21  ;;  %v3689_v63 = vpop.f32.mrb[213].mxu0  ;;  %v4339_v16 = vmax.f32 %v3685_v11, %v4089_v18 }
 0x30c   :  { %v4983_v22 = vadd.f32 %v9598_v27, %v7101_v17  ;;  %v4977_v24 = vpop.f32.mrb[103].mxu1  ;;  %v4338_v30 = vmax.f32 %v3680_v57, %v4088_v20  ;;  %v3690_v55 = vadd.f32 %v9770_v49, %v3689_v63 }
 0x30d   :  { %v4978_v29 = vadd.f32 %v9598_v27, %v4977_v24  ;;  %7259 = vmatmul.mubr.f32.gmra.mrb[208].mxu1 %v4337_v19  ;;  %v4091_v32 = vmul.f32 0.01, %v3695_v26 }
 0x30e   :  { %5820 = vst.msk [vmem:[%s10766_s7 + $0x338] sm:$0xff] %vm5716_vm0, %v4983_v22  ;;  %v4090_v33 = vmul.f32 0.01, %v3690_v55  ;;  %v6862_v36 = vpop.f32.mrb[214].mxu0  ;;  %7261 = vmatprep.mubr.f32.mxu1 %v4338_v30 }
 0x30f   :  { %5819 = vst.msk [vmem:[%s10766_s7 + $0x330] sm:$0xff] %vm5716_vm0, %v4978_v29  ;;  %v7104_v31 = vpop.f32.mrb[104].mxu1  ;;  %v3705_v39 = vadd.f32 %v9770_v49, %v6862_v36  ;;  %v3699_v40 = vpop.f32.mrb[215].mxu0  ;;  %v4341_v45 = vmax.f32 %v3695_v26, %v4091_v32 }
 0x310   :  { %v4993_v37 = vadd.f32 %v9598_v27, %v7104_v31  ;;  %v4987_v14 = vpop.f32.mrb[105].mxu1  ;;  %v4340_v43 = vmax.f32 %v3690_v55, %v4090_v33  ;;  %v3700_v27 = vadd.f32 %v9770_v49, %v3699_v40 }
 0x311   :  { %v4988_v28 = vadd.f32 %v9992_v41, %v4987_v14  ;;  %7262 = vmatmul.mubr.f32.gmra.mrb[210].mxu1 %v4339_v16  ;;  %v4093_v47 = vmul.f32 0.01, %v3705_v39 }
 0x312   :  { %5822 = vst.msk [vmem:[%s10766_s7 + $0x348] sm:$0xff] %vm5716_vm0, %v4993_v37  ;;  %v4092_v46 = vmul.f32 0.01, %v3700_v27  ;;  %v6865_v3 = vpop.f32.mrb[216].mxu0  ;;  %7264 = vmatprep.mubr.f32.mxu1 %v4340_v43 }
 0x313   :  { %5821 = vst.msk [vmem:[%s10766_s7 + $0x340] sm:$0xff] %vm5716_vm0, %v4988_v28  ;;  %v7107_v38 = vpop.f32.mrb[106].mxu1  ;;  %v3715_v51 = vadd.f32 %v9770_v49, %v6865_v3  ;;  %v3709_v52 = vpop.f32.mrb[217].mxu0  ;;  %v4343_v58 = vmax.f32 %v3705_v39, %v4093_v47 }
 0x314   :  { %v5003_v48 = vadd.f32 %v9992_v41, %v7107_v38  ;;  %v4997_v50 = vpop.f32.mrb[107].mxu1  ;;  %v4342_v54 = vmax.f32 %v3700_v27, %v4092_v46  ;;  %v3710_v56 = vadd.f32 %v9770_v49, %v3709_v52 }
 0x315   :  { %v4998_v53 = vadd.f32 %v9992_v41, %v4997_v50  ;;  %7265 = vmatmul.mubr.f32.gmra.mrb[212].mxu1 %v4341_v45  ;;  %v4095_v42 = vmul.f32 0.01, %v3715_v51 }
 0x316   :  { %5824 = vst.msk [vmem:[%s10766_s7 + $0x358] sm:$0xff] %vm5716_vm0, %v5003_v48  ;;  %v4094_v44 = vmul.f32 0.01, %v3710_v56  ;;  %v6868_v60 = vpop.f32.mrb[218].mxu0  ;;  %7267 = vmatprep.mubr.f32.mxu1 %v4342_v54 }
 0x317   :  { %5823 = vst.msk [vmem:[%s10766_s7 + $0x350] sm:$0xff] %vm5716_vm0, %v4998_v53  ;;  %v7110_v62 = vpop.f32.mrb[108].mxu1  ;;  %v3725_v61 = vadd.f32 %v9770_v49, %v6868_v60  ;;  %v3719_v0 = vpop.f32.mrb[219].mxu0  ;;  %v4345_v34 = vmax.f32 %v3715_v51, %v4095_v42 }
 0x318   :  { %v5013_v1 = vadd.f32 %v9992_v41, %v7110_v62  ;;  %v5007_v23 = vpop.f32.mrb[109].mxu1  ;;  %v4344_v2 = vmax.f32 %v3710_v56, %v4094_v44  ;;  %v3720_v5 = vadd.f32 %v9770_v49, %v3719_v0 }
 0x319   :  { %v5008_v4 = vadd.f32 %v9992_v41, %v5007_v23  ;;  %7268 = vmatmul.mubr.f32.gmra.mrb[214].mxu1 %v4343_v58  ;;  %v4097_v15 = vmul.f32 0.01, %v3725_v61 }
 0x31a   :  { %5826 = vst.msk [vmem:[%s10766_s7 + $0x368] sm:$0xff] %vm5716_vm0, %v5013_v1  ;;  %v4096_v6 = vmul.f32 0.01, %v3720_v5  ;;  %v6871_v25 = vpop.f32.mrb[220].mxu0  ;;  %7270 = vmatprep.mubr.f32.mxu1 %v4344_v2 }
 0x31b   :  { %5825 = vst.msk [vmem:[%s10766_s7 + $0x360] sm:$0xff] %vm5716_vm0, %v5008_v4  ;;  %v7113_v7 = vpop.f32.mrb[110].mxu1  ;;  %v3735_v9 = vadd.f32 %v9770_v49, %v6871_v25  ;;  %v3729_v10 = vpop.f32.mrb[221].mxu0  ;;  %v4347_v13 = vmax.f32 %v3725_v61, %v4097_v15 }
 0x31c   :  { %v5023_v35 = vadd.f32 %v9992_v41, %v7113_v7  ;;  %v5017_v8 = vpop.f32.mrb[111].mxu1  ;;  %v4346_v11 = vmax.f32 %v3720_v5, %v4096_v6  ;;  %v3730_v12 = vadd.f32 %v9770_v49, %v3729_v10 }
 0x31d   :  { %v5018_v59 = vadd.f32 %v9992_v41, %v5017_v8  ;;  %7271 = vmatmul.mubr.f32.gmra.mrb[216].mxu1 %v4345_v34  ;;  %v4099_v57 = vmul.f32 0.01, %v3735_v9 }
 0x31e   :  { %5828 = vst.msk [vmem:[%s10766_s7 + $0x378] sm:$0xff] %vm5716_vm0, %v5023_v35  ;;  %v4098_v17 = vmul.f32 0.01, %v3730_v12  ;;  %v6874_v19 = vpop.f32.mrb[222].mxu0  ;;  %7273 = vmatprep.mubr.f32.mxu1 %v4346_v11 }
 0x31f   :  { %5827 = vst.msk [vmem:[%s10766_s7 + $0x370] sm:$0xff] %vm5716_vm0, %v5018_v59  ;;  %v7116_v18 = vpop.f32.mrb[112].mxu1  ;;  %v3745_v20 = vadd.f32 %v9770_v49, %v6874_v19  ;;  %v3739_v22 = vpop.f32.mrb[223].mxu0  ;;  %v4349_v30 = vmax.f32 %v3735_v9, %v4099_v57 }
 0x320   :  { %v5033_v21 = vadd.f32 %v9992_v41, %v7116_v18  ;;  %v5027_v24 = vpop.f32.mrb[113].mxu1  ;;  %v4348_v26 = vmax.f32 %v3730_v12, %v4098_v17  ;;  %v3740_v63 = vadd.f32 %v9770_v49, %v3739_v22 }
 0x321   :  { %v5028_v29 = vadd.f32 %v9992_v41, %v5027_v24  ;;  %7274 = vmatmul.mubr.f32.gmra.mrb[218].mxu1 %v4347_v13  ;;  %v4101_v55 = vmul.f32 0.01, %v3745_v20 }
 0x322   :  { %5830 = vst.msk [vmem:[%s10766_s7 + $0x388] sm:$0xff] %vm5716_vm0, %v5033_v21  ;;  %v4100_v31 = vmul.f32 0.01, %v3740_v63  ;;  %v6877_v16 = vpop.f32.mrb[224].mxu0  ;;  %7276 = vmatprep.mubr.f32.mxu1 %v4348_v26 }
 0x323   :  { %5829 = vst.msk [vmem:[%s10766_s7 + $0x380] sm:$0xff] %vm5716_vm0, %v5028_v29  ;;  %v3755_v32 = vadd.f32 %v9770_v49, %v6877_v16  ;;  %v7119_v33 = vpop.f32.mrb[114].mxu1  ;;  %v3749_v36 = vpop.f32.mrb[225].mxu0  ;;  %v4351_v43 = vmax.f32 %v3745_v20, %v4101_v55 }
 0x324   :  { %v4350_v37 = vmax.f32 %v3740_v63, %v4100_v31  ;;  %v5043_v14 = vadd.f32 %v9992_v41, %v7119_v33  ;;  %v3750_v39 = vadd.f32 %v9770_v49, %v3749_v36  ;;  %v5037_v40 = vpop.f32.mrb[115].mxu1 }
 0x325   :  { %7277 = vmatmul.mubr.f32.gmra.mrb[220].mxu1 %v4349_v30  ;;  %v5038_v28 = vadd.f32 %v9992_v41, %v5037_v40  ;;  %v4103_v27 = vmul.f32 0.01, %v3755_v32 }
 0x326   :  { %5832 = vst.msk [vmem:[%s10766_s7 + $0x398] sm:$0xff] %vm5716_vm0, %v5043_v14  ;;  %v4102_v38 = vmul.f32 0.01, %v3750_v39  ;;  %v6880_v45 = vpop.f32.mrb[226].mxu0  ;;  %7279 = vmatprep.mubr.f32.mxu1 %v4350_v37 }
 0x327   :  { %5831 = vst.msk [vmem:[%s10766_s7 + $0x390] sm:$0xff] %vm5716_vm0, %v5038_v28  ;;  %v3765_v47 = vadd.f32 %v9770_v49, %v6880_v45  ;;  %v7122_v46 = vpop.f32.mrb[116].mxu1  ;;  %v3759_v3 = vpop.f32.mrb[227].mxu0  ;;  %v4353_v54 = vmax.f32 %v3755_v32, %v4103_v27 }
 0x328   :  { %v4352_v48 = vmax.f32 %v3750_v39, %v4102_v38  ;;  %v5053_v50 = vadd.f32 %v9992_v41, %v7122_v46  ;;  %v3760_v51 = vadd.f32 %v9770_v49, %v3759_v3  ;;  %v5047_v52 = vpop.f32.mrb[117].mxu1 }
 0x329   :  { %7280 = vmatmul.mubr.f32.gmra.mrb[222].mxu1 %v4351_v43  ;;  %v5048_v53 = vadd.f32 %v9992_v41, %v5047_v52  ;;  %v4105_v56 = vmul.f32 0.01, %v3765_v47 }
 0x32a   :  { %5834 = vst.msk [vmem:[%s10766_s7 + $0x3a8] sm:$0xff] %vm5716_vm0, %v5053_v50  ;;  %v4104_v58 = vmul.f32 0.01, %v3760_v51  ;;  %v6883_v42 = vpop.f32.mrb[228].mxu0  ;;  %7282 = vmatprep.mubr.f32.mxu1 %v4352_v48 }
 0x32b   :  { %5833 = vst.msk [vmem:[%s10766_s7 + $0x3a0] sm:$0xff] %vm5716_vm0, %v5048_v53  ;;  %v3775_v44 = vadd.f32 %v9770_v49, %v6883_v42  ;;  %v7125_v60 = vpop.f32.mrb[118].mxu1  ;;  %v3769_v62 = vpop.f32.mrb[229].mxu0  ;;  %v4355_v5 = vmax.f32 %v3765_v47, %v4105_v56 }
 0x32c   :  { %v4354_v61 = vmax.f32 %v3760_v51, %v4104_v58  ;;  %v5063_v1 = vadd.f32 %v9992_v41, %v7125_v60  ;;  %v3770_v0 = vadd.f32 %v9770_v49, %v3769_v62  ;;  %v5057_v23 = vpop.f32.mrb[119].mxu1 }
 0x32d   :  { %7283 = vmatmul.mubr.f32.gmra.mrb[224].mxu1 %v4353_v54  ;;  %v5058_v2 = vadd.f32 %v9992_v41, %v5057_v23  ;;  %v4107_v4 = vmul.f32 0.01, %v3775_v44 }
 0x32e   :  { %5836 = vst.msk [vmem:[%s10766_s7 + $0x3b8] sm:$0xff] %vm5716_vm0, %v5063_v1  ;;  %v4106_v34 = vmul.f32 0.01, %v3770_v0  ;;  %7285 = vmatprep.mubr.f32.mxu1 %v4354_v61 }
 0x32f   :  { %v6886_v15 = vpop.f32.mrb[230].mxu0  ;;  %5835 = vst.msk [vmem:[%s10766_s7 + $0x3b0] sm:$0xff] %vm5716_vm0, %v5058_v2  ;;  %v7128_v25 = vpop.f32.mrb[120].mxu1  ;;  %v4357_v12 = vmax.f32 %v3775_v44, %v4107_v4 }
 0x330   :  { %v3785_v6 = vadd.f32 %v9770_v49, %v6886_v15  ;;  %v3779_v7 = vpop.f32.mrb[231].mxu0  ;;  %v4356_v9 = vmax.f32 %v3770_v0, %v4106_v34  ;;  %v5073_v35 = vadd.f32 %v9992_v41, %v7128_v25  ;;  %v5067_v8 = vpop.f32.mrb[121].mxu1 }
 0x331   :  { %v3780_v10 = vadd.f32 %v9770_v49, %v3779_v7  ;;  %7286 = vmatmul.mubr.f32.gmra.mrb[226].mxu1 %v4355_v5  ;;  %v5068_v11 = vadd.f32 %v9992_v41, %v5067_v8 }
 0x332   :  { %v4109_v59 = vmul.f32 0.01, %v3785_v6  ;;  %5838 = vst.msk [vmem:[%s10766_s7 + $0x3c8] sm:$0xff] %vm5716_vm0, %v5073_v35  ;;  %7288 = vmatprep.mubr.f32.mxu1 %v4356_v9 }
 0x333   :  { %v4108_v13 = vmul.f32 0.01, %v3780_v10  ;;  %v6889_v57 = vpop.f32.mrb[232].mxu0  ;;  %5837 = vst.msk [vmem:[%s10766_s7 + $0x3c0] sm:$0xff] %vm5716_vm0, %v5068_v11  ;;  %v7131_v19 = vpop.f32.mrb[122].mxu1 }
 0x334   :  { %v3795_v17 = vadd.f32 %v9770_v49, %v6889_v57  ;;  %v3789_v18 = vpop.f32.mrb[233].mxu0  ;;  %v5083_v21 = vadd.f32 %v9992_v41, %v7131_v19  ;;  %v5077_v24 = vpop.f32.mrb[123].mxu1  ;;  %v4359_v63 = vmax.f32 %v3785_v6, %v4109_v59 }
 0x335   :  { %v4358_v20 = vmax.f32 %v3780_v10, %v4108_v13  ;;  %v3790_v22 = vadd.f32 %v9770_v49, %v3789_v18  ;;  %7289 = vmatmul.mubr.f32.gmra.mrb[228].mxu1 %v4357_v12  ;;  %v5078_v26 = vadd.f32 %v9992_v41, %v5077_v24 }
 0x336   :  { %v4111_v29 = vmul.f32 0.01, %v3795_v17  ;;  %5840 = vst.msk [vmem:[%s10766_s7 + $0x3d8] sm:$0xff] %vm5716_vm0, %v5083_v21 }
 0x337   :  { %v4110_v30 = vmul.f32 0.01, %v3790_v22  ;;  %v6892_v55 = vpop.f32.mrb[234].mxu0  ;;  %7291 = vmatprep.mubr.f32.mxu1 %v4358_v20  ;;  %5839 = vst.msk [vmem:[%s10766_s7 + $0x3d0] sm:$0xff] %vm5716_vm0, %v5078_v26  ;;  %v7134_v16 = vpop.f32.mrb[124].mxu1 }
 0x338   :  { %v3805_v31 = vadd.f32 %v9770_v49, %v6892_v55  ;;  %v3799_v32 = vpop.f32.mrb[235].mxu0  ;;  %v5093_v36 = vadd.f32 %v9992_v41, %v7134_v16  ;;  %v5087_v14 = vpop.f32.mrb[125].mxu1  ;;  %v4361_v40 = vmax.f32 %v3795_v17, %v4111_v29  ;;  %v7404_v20 = vld [vmem:[%s10764_s4] ss:$0 sm:$0xff] }
 0x339   :  { %v4360_v33 = vmax.f32 %v3790_v22, %v4110_v30  ;;  %v3800_v37 = vadd.f32 %v9770_v49, %v3799_v32  ;;  %7292 = vmatmul.mubr.f32.gmra.mrb[230].mxu1 %v4359_v63  ;;  %v5088_v39 = vadd.f32 %v9992_v41, %v5087_v14 }
 0x33a   :  { %v4113_v28 = vmul.f32 0.01, %v3805_v31  ;;  %5842 = vst.msk [vmem:[%s10766_s7 + $0x3e8] sm:$0xff] %vm5716_vm0, %v5093_v36 }
 0x33b   :  { %v4112_v43 = vmul.f32 0.01, %v3800_v37  ;;  %v6895_v27 = vpop.f32.mrb[236].mxu0  ;;  %7294 = vmatprep.mubr.f32.mxu1 %v4360_v33  ;;  %5841 = vst.msk [vmem:[%s10766_s7 + $0x3e0] sm:$0xff] %vm5716_vm0, %v5088_v39  ;;  %v7137_v45 = vpop.f32.mrb[126].mxu1 }
 0x33c   :  { %v3815_v38 = vadd.f32 %v9770_v49, %v6895_v27  ;;  %v3809_v47 = vpop.f32.mrb[237].mxu0  ;;  %v5103_v3 = vadd.f32 %v9992_v41, %v7137_v45  ;;  %v5097_v50 = vpop.f32.mrb[127].mxu1  ;;  %v4363_v52 = vmax.f32 %v3805_v31, %v4113_v28 }
 0x33d   :  { %v4362_v46 = vmax.f32 %v3800_v37, %v4112_v43  ;;  %v3810_v48 = vadd.f32 %v9770_v49, %v3809_v47  ;;  %7295 = vmatmul.mubr.f32.gmra.mrb[232].mxu1 %v4361_v40  ;;  %v5098_v51 = vadd.f32 %v9992_v41, %v5097_v50 }
 0x33e   :  { %v4115_v53 = vmul.f32 0.01, %v3815_v38  ;;  %5844 = vst.msk [vmem:[%s10766_s7 + $0x3f8] sm:$0xff] %vm5716_vm0, %v5103_v3 }
 0x33f   :  { %v4114_v54 = vmul.f32 0.01, %v3810_v48  ;;  %v6898_v56 = vpop.f32.mrb[238].mxu0  ;;  %7297 = vmatprep.mubr.f32.mxu1 %v4362_v46  ;;  %5843 = vst.msk [vmem:[%s10766_s7 + $0x3f0] sm:$0xff] %vm5716_vm0, %v5098_v51  ;;  %v7140_v42 = vpop.f32.mrb[128].mxu1 }
 0x340   :  { %v3825_v58 = vadd.f32 %v9770_v49, %v6898_v56  ;;  %v3819_v44 = vpop.f32.mrb[239].mxu0  ;;  %v5113_v62 = vadd.f32 %v9992_v41, %v7140_v42  ;;  %v5107_v1 = vpop.f32.mrb[129].mxu1  ;;  %v4365_v23 = vmax.f32 %v3815_v38, %v4115_v53 }
 0x341   :  { %v4364_v60 = vmax.f32 %v3810_v48, %v4114_v54  ;;  %v3820_v61 = vadd.f32 %v9770_v49, %v3819_v44  ;;  %7298 = vmatmul.mubr.f32.gmra.mrb[234].mxu1 %v4363_v52  ;;  %v5108_v0 = vadd.f32 %v9992_v41, %v5107_v1 }
 0x342   :  { %v4117_v2 = vmul.f32 0.01, %v3825_v58  ;;  %5846 = vst.msk [vmem:[%s10766_s7 + $0x408] sm:$0xff] %vm5716_vm0, %v5113_v62 }
 0x343   :  { %v4116_v5 = vmul.f32 0.01, %v3820_v61  ;;  %v6901_v4 = vpop.f32.mrb[240].mxu0  ;;  %7300 = vmatprep.mubr.f32.mxu1 %v4364_v60  ;;  %5845 = vst.msk [vmem:[%s10766_s7 + $0x400] sm:$0xff] %vm5716_vm0, %v5108_v0 }
 0x344   :  { %v3835_v34 = vadd.f32 %v9770_v49, %v6901_v4  ;;  %v7143_v15 = vpop.f32.mrb[130].mxu1  ;;  %v3829_v6 = vpop.f32.mrb[241].mxu0  ;;  %v4367_v8 = vmax.f32 %v3825_v58, %v4117_v2 }
 0x345   :  { %v4366_v25 = vmax.f32 %v3820_v61, %v4116_v5  ;;  %v5123_v7 = vadd.f32 %v9992_v41, %v7143_v15  ;;  %v3830_v9 = vadd.f32 %v9770_v49, %v3829_v6  ;;  %v5117_v35 = vpop.f32.mrb[131].mxu1  ;;  %7301 = vmatmul.mubr.f32.gmra.mrb[236].mxu1 %v4365_v23 }
 0x346   :  { %v5118_v10 = vadd.f32 %v9992_v41, %v5117_v35  ;;  %v4119_v11 = vmul.f32 0.01, %v3835_v34 }
 0x347   :  { %5848 = vst.msk [vmem:[%s10766_s7 + $0x418] sm:$0xff] %vm5716_vm0, %v5123_v7  ;;  %v4118_v12 = vmul.f32 0.01, %v3830_v9  ;;  %v6904_v59 = vpop.f32.mrb[242].mxu0  ;;  %7303 = vmatprep.mubr.f32.mxu1 %v4366_v25 }
 0x348   :  { %5847 = vst.msk [vmem:[%s10766_s7 + $0x410] sm:$0xff] %vm5716_vm0, %v5118_v10  ;;  %v3845_v13 = vadd.f32 %v9770_v49, %v6904_v59  ;;  %v7146_v57 = vpop.f32.mrb[132].mxu1  ;;  %v3839_v17 = vpop.f32.mrb[243].mxu0  ;;  %v4369_v26 = vmax.f32 %v3835_v34, %v4119_v11 }
 0x349   :  { %v4368_v19 = vmax.f32 %v3830_v9, %v4118_v12  ;;  %v5133_v18 = vadd.f32 %v9992_v41, %v7146_v57  ;;  %v3840_v21 = vadd.f32 %v7404_v20, %v3839_v17  ;;  %v5127_v22 = vpop.f32.mrb[133].mxu1  ;;  %7304 = vmatmul.mubr.f32.gmra.mrb[238].mxu1 %v4367_v8 }
 0x34a   :  { %v5128_v24 = vadd.f32 %v9992_v41, %v5127_v22  ;;  %v4121_v63 = vmul.f32 0.01, %v3845_v13 }
 0x34b   :  { %5850 = vst.msk [vmem:[%s10766_s7 + $0x428] sm:$0xff] %vm5716_vm0, %v5133_v18  ;;  %v4120_v49 = vmul.f32 0.01, %v3840_v21  ;;  %v6907_v29 = vpop.f32.mrb[244].mxu0  ;;  %7306 = vmatprep.mubr.f32.mxu1 %v4368_v19 }
 0x34c   :  { %5849 = vst.msk [vmem:[%s10766_s7 + $0x420] sm:$0xff] %vm5716_vm0, %v5128_v24  ;;  %v3855_v30 = vadd.f32 %v7404_v20, %v6907_v29  ;;  %v7149_v55 = vpop.f32.mrb[134].mxu1  ;;  %v3849_v31 = vpop.f32.mrb[245].mxu0  ;;  %v4371_v14 = vmax.f32 %v3845_v13, %v4121_v63 }
 0x34d   :  { %v4370_v16 = vmax.f32 %v3840_v21, %v4120_v49  ;;  %v5143_v32 = vadd.f32 %v9992_v41, %v7149_v55  ;;  %v3850_v33 = vadd.f32 %v7404_v20, %v3849_v31  ;;  %v5137_v36 = vpop.f32.mrb[135].mxu1  ;;  %7307 = vmatmul.mubr.f32.gmra.mrb[240].mxu1 %v4369_v26 }
 0x34e   :  { %v5138_v37 = vadd.f32 %v9992_v41, %v5137_v36  ;;  %v4123_v39 = vmul.f32 0.01, %v3855_v30 }
 0x34f   :  { %5852 = vst.msk [vmem:[%s10766_s7 + $0x438] sm:$0xff] %vm5716_vm0, %v5143_v32  ;;  %v4122_v40 = vmul.f32 0.01, %v3850_v33  ;;  %v6910_v28 = vpop.f32.mrb[246].mxu0  ;;  %7309 = vmatprep.mubr.f32.mxu1 %v4370_v16 }
 0x350   :  { %5851 = vst.msk [vmem:[%s10766_s7 + $0x430] sm:$0xff] %vm5716_vm0, %v5138_v37  ;;  %v3865_v43 = vadd.f32 %v7404_v20, %v6910_v28  ;;  %v7152_v27 = vpop.f32.mrb[136].mxu1  ;;  %v3859_v38 = vpop.f32.mrb[247].mxu0  ;;  %v4373_v50 = vmax.f32 %v3855_v30, %v4123_v39 }
 0x351   :  { %v4372_v45 = vmax.f32 %v3850_v33, %v4122_v40  ;;  %v5153_v47 = vadd.f32 %v9992_v41, %v7152_v27  ;;  %v3860_v46 = vadd.f32 %v7404_v20, %v3859_v38  ;;  %v5147_v3 = vpop.f32.mrb[137].mxu1  ;;  %7310 = vmatmul.mubr.f32.gmra.mrb[242].mxu1 %v4371_v14 }
 0x352   :  { %v5148_v48 = vadd.f32 %v9992_v41, %v5147_v3  ;;  %v4125_v51 = vmul.f32 0.01, %v3865_v43 }
 0x353   :  { %5854 = vst.msk [vmem:[%s10766_s7 + $0x448] sm:$0xff] %vm5716_vm0, %v5153_v47  ;;  %v4124_v52 = vmul.f32 0.01, %v3860_v46  ;;  %v6913_v53 = vpop.f32.mrb[248].mxu0  ;;  %7312 = vmatprep.mubr.f32.mxu1 %v4372_v45 }
 0x354   :  { %5853 = vst.msk [vmem:[%s10766_s7 + $0x440] sm:$0xff] %vm5716_vm0, %v5148_v48  ;;  %v3875_v54 = vadd.f32 %v7404_v20, %v6913_v53  ;;  %v7155_v56 = vpop.f32.mrb[138].mxu1  ;;  %v3869_v58 = vpop.f32.mrb[249].mxu0  ;;  %v4375_v1 = vmax.f32 %v3865_v43, %v4125_v51 }
 0x355   :  { %v4374_v42 = vmax.f32 %v3860_v46, %v4124_v52  ;;  %v5163_v44 = vadd.f32 %v9992_v41, %v7155_v56  ;;  %v3870_v60 = vadd.f32 %v7404_v20, %v3869_v58  ;;  %v5157_v62 = vpop.f32.mrb[139].mxu1  ;;  %7313 = vmatmul.mubr.f32.gmra.mrb[244].mxu1 %v4373_v50 }
 0x356   :  { %v5158_v61 = vadd.f32 %v9992_v41, %v5157_v62  ;;  %v4127_v0 = vmul.f32 0.01, %v3875_v54 }
 0x357   :  { %5856 = vst.msk [vmem:[%s10766_s7 + $0x458] sm:$0xff] %vm5716_vm0, %v5163_v44  ;;  %v4126_v23 = vmul.f32 0.01, %v3870_v60  ;;  %7315 = vmatprep.mubr.f32.mxu1 %v4374_v42 }
 0x358   :  { %5855 = vst.msk [vmem:[%s10766_s7 + $0x450] sm:$0xff] %vm5716_vm0, %v5158_v61  ;;  %v7158_v2 = vpop.f32.mrb[140].mxu1  ;;  %v4377_v6 = vmax.f32 %v3875_v54, %v4127_v0 }
 0x359   :  { %v4376_v5 = vmax.f32 %v3870_v60, %v4126_v23  ;;  %v5173_v4 = vadd.f32 %v9992_v41, %v7158_v2  ;;  %v5167_v34 = vpop.f32.mrb[141].mxu1  ;;  %7316 = vmatmul.mubr.f32.gmra.mrb[246].mxu1 %v4375_v1 }
 0x35a   :  { %v5168_v15 = vadd.f32 %v9992_v41, %v5167_v34 }
 0x35b   :  { %5858 = vst.msk [vmem:[%s10766_s7 + $0x468] sm:$0xff] %vm5716_vm0, %v5173_v4  ;;  %7318 = vmatprep.mubr.f32.mxu1 %v4376_v5 }
 0x35c   :  { %5857 = vst.msk [vmem:[%s10766_s7 + $0x460] sm:$0xff] %vm5716_vm0, %v5168_v15  ;;  %v7161_v25 = vpop.f32.mrb[142].mxu1 }
 0x35d   :  { %v5183_v7 = vadd.f32 %v9992_v41, %v7161_v25  ;;  %v5177_v9 = vpop.f32.mrb[143].mxu1  ;;  %7319 = vmatmul.mubr.f32.gmra.mrb[248].mxu1 %v4377_v6 }
 0x35e   :  { %v5178_v35 = vadd.f32 %v9992_v41, %v5177_v9 }
 0x35f   :  { %5860 = vst.msk [vmem:[%s10766_s7 + $0x478] sm:$0xff] %vm5716_vm0, %v5183_v7 }
 0x360   :  { %5859 = vst.msk [vmem:[%s10766_s7 + $0x470] sm:$0xff] %vm5716_vm0, %v5178_v35  ;;  %v7164_v10 = vpop.f32.mrb[144].mxu1 }
 0x361   :  { %v5193_v8 = vadd.f32 %v9992_v41, %v7164_v10  ;;  %v5187_v11 = vpop.f32.mrb[145].mxu1 }
 0x362   :  { %v5188_v12 = vadd.f32 %v9992_v41, %v5187_v11 }
 0x363   :  { %5862 = vst.msk [vmem:[%s10766_s7 + $0x488] sm:$0xff] %vm5716_vm0, %v5193_v8 }
 0x364   :  { %5861 = vst.msk [vmem:[%s10766_s7 + $0x480] sm:$0xff] %vm5716_vm0, %v5188_v12  ;;  %v7167_v59 = vpop.f32.mrb[146].mxu1 }
 0x365   :  { %v5203_v13 = vadd.f32 %v9992_v41, %v7167_v59  ;;  %v5197_v57 = vpop.f32.mrb[147].mxu1 }
 0x366   :  { %v5198_v17 = vadd.f32 %v9992_v41, %v5197_v57 }
 0x367   :  { %5864 = vst.msk [vmem:[%s10766_s7 + $0x498] sm:$0xff] %vm5716_vm0, %v5203_v13 }
 0x368   :  { %5863 = vst.msk [vmem:[%s10766_s7 + $0x490] sm:$0xff] %vm5716_vm0, %v5198_v17  ;;  %v7170_v19 = vpop.f32.mrb[148].mxu1 }
 0x369   :  { %v5213_v18 = vadd.f32 %v9992_v41, %v7170_v19  ;;  %v5207_v20 = vpop.f32.mrb[149].mxu1 }
 0x36a   :  { %v5208_v21 = vadd.f32 %v9992_v41, %v5207_v20 }
 0x36b   :  { %5866 = vst.msk [vmem:[%s10766_s7 + $0x4a8] sm:$0xff] %vm5716_vm0, %v5213_v18 }
 0x36c   :  { %5865 = vst.msk [vmem:[%s10766_s7 + $0x4a0] sm:$0xff] %vm5716_vm0, %v5208_v21  ;;  %v7173_v22 = vpop.f32.mrb[150].mxu1 }
 0x36d   :  { %v5223_v24 = vadd.f32 %v9992_v41, %v7173_v22  ;;  %v5217_v26 = vpop.f32.mrb[151].mxu1 }
 0x36e   :  { %v5218_v63 = vadd.f32 %v9992_v41, %v5217_v26 }
 0x36f   :  { %5868 = vst.msk [vmem:[%s10766_s7 + $0x4b8] sm:$0xff] %vm5716_vm0, %v5223_v24 }
 0x370   :  { %5867 = vst.msk [vmem:[%s10766_s7 + $0x4b0] sm:$0xff] %vm5716_vm0, %v5218_v63  ;;  %v7176_v49 = vpop.f32.mrb[152].mxu1 }
 0x371   :  { %v5233_v29 = vadd.f32 %v9992_v41, %v7176_v49  ;;  %v5227_v30 = vpop.f32.mrb[153].mxu1 }
 0x372   :  { %v5228_v55 = vadd.f32 %v9992_v41, %v5227_v30 }
 0x373   :  { %5870 = vst.msk [vmem:[%s10766_s7 + $0x4c8] sm:$0xff] %vm5716_vm0, %v5233_v29 }
 0x374   :  { %5869 = vst.msk [vmem:[%s10766_s7 + $0x4c0] sm:$0xff] %vm5716_vm0, %v5228_v55  ;;  %v7179_v31 = vpop.f32.mrb[154].mxu1 }
 0x375   :  { %v5243_v16 = vadd.f32 %v9992_v41, %v7179_v31  ;;  %v5237_v32 = vpop.f32.mrb[155].mxu1 }
 0x376   :  { %v5238_v33 = vadd.f32 %v9992_v41, %v5237_v32 }
 0x377   :  { %5872 = vst.msk [vmem:[%s10766_s7 + $0x4d8] sm:$0xff] %vm5716_vm0, %v5243_v16 }
 0x378   :  { %5871 = vst.msk [vmem:[%s10766_s7 + $0x4d0] sm:$0xff] %vm5716_vm0, %v5238_v33  ;;  %v7182_v36 = vpop.f32.mrb[156].mxu1 }
 0x379   :  { %v5253_v37 = vadd.f32 %v9992_v41, %v7182_v36  ;;  %v5247_v14 = vpop.f32.mrb[157].mxu1 }
 0x37a   :  { %v5248_v39 = vadd.f32 %v9992_v41, %v5247_v14 }
 0x37b   :  { %5874 = vst.msk [vmem:[%s10766_s7 + $0x4e8] sm:$0xff] %vm5716_vm0, %v5253_v37 }
 0x37c   :  { %5873 = vst.msk [vmem:[%s10766_s7 + $0x4e0] sm:$0xff] %vm5716_vm0, %v5248_v39  ;;  %v7185_v40 = vpop.f32.mrb[158].mxu1 }
 0x37d   :  { %v5263_v28 = vadd.f32 %v9992_v41, %v7185_v40  ;;  %v5257_v43 = vpop.f32.mrb[159].mxu1 }
 0x37e   :  { %v5258_v27 = vadd.f32 %v9992_v41, %v5257_v43 }
 0x37f   :  { %5876 = vst.msk [vmem:[%s10766_s7 + $0x4f8] sm:$0xff] %vm5716_vm0, %v5263_v28 }
 0x380   :  { %5875 = vst.msk [vmem:[%s10766_s7 + $0x4f0] sm:$0xff] %vm5716_vm0, %v5258_v27  ;;  %v7188_v38 = vpop.f32.mrb[160].mxu1 }
 0x381   :  { %v5273_v45 = vadd.f32 %v9992_v41, %v7188_v38  ;;  %v5267_v47 = vpop.f32.mrb[161].mxu1 }
 0x382   :  { %v5268_v46 = vadd.f32 %v9992_v41, %v5267_v47 }
 0x383   :  { %5878 = vst.msk [vmem:[%s10766_s7 + $0x508] sm:$0xff] %vm5716_vm0, %v5273_v45 }
 0x384   :  { %5877 = vst.msk [vmem:[%s10766_s7 + $0x500] sm:$0xff] %vm5716_vm0, %v5268_v46  ;;  %v7191_v3 = vpop.f32.mrb[162].mxu1 }
 0x385   :  { %v5283_v48 = vadd.f32 %v9992_v41, %v7191_v3  ;;  %v5277_v50 = vpop.f32.mrb[163].mxu1 }
 0x386   :  { %v5278_v51 = vadd.f32 %v9992_v41, %v5277_v50 }
 0x387   :  { %5880 = vst.msk [vmem:[%s10766_s7 + $0x518] sm:$0xff] %vm5716_vm0, %v5283_v48 }
 0x388   :  { %5879 = vst.msk [vmem:[%s10766_s7 + $0x510] sm:$0xff] %vm5716_vm0, %v5278_v51  ;;  %v7194_v52 = vpop.f32.mrb[164].mxu1 }
 0x389   :  { %v5293_v53 = vadd.f32 %v9992_v41, %v7194_v52  ;;  %v5287_v54 = vpop.f32.mrb[165].mxu1 }
 0x38a   :  { %v5288_v56 = vadd.f32 %v9992_v41, %v5287_v54 }
 0x38b   :  { %5882 = vst.msk [vmem:[%s10766_s7 + $0x528] sm:$0xff] %vm5716_vm0, %v5293_v53 }
 0x38c   :  { %5881 = vst.msk [vmem:[%s10766_s7 + $0x520] sm:$0xff] %vm5716_vm0, %v5288_v56  ;;  %v7197_v58 = vpop.f32.mrb[166].mxu1 }
 0x38d   :  { %v5303_v42 = vadd.f32 %v9992_v41, %v7197_v58  ;;  %v5297_v44 = vpop.f32.mrb[167].mxu1 }
 0x38e   :  { %v5298_v60 = vadd.f32 %v9992_v41, %v5297_v44 }
 0x38f   :  { %5884 = vst.msk [vmem:[%s10766_s7 + $0x538] sm:$0xff] %vm5716_vm0, %v5303_v42 }
 0x390   :  { %5883 = vst.msk [vmem:[%s10766_s7 + $0x530] sm:$0xff] %vm5716_vm0, %v5298_v60  ;;  %v7200_v62 = vpop.f32.mrb[168].mxu1 }
 0x391   :  { %v5313_v61 = vadd.f32 %v9992_v41, %v7200_v62  ;;  %v5307_v1 = vpop.f32.mrb[169].mxu1 }
 0x392   :  { %v5308_v0 = vadd.f32 %v9992_v41, %v5307_v1 }
 0x393   :  { %5886 = vst.msk [vmem:[%s10766_s7 + $0x548] sm:$0xff] %vm5716_vm0, %v5313_v61 }
 0x394   :  { %5885 = vst.msk [vmem:[%s10766_s7 + $0x540] sm:$0xff] %vm5716_vm0, %v5308_v0  ;;  %v7203_v23 = vpop.f32.mrb[170].mxu1 }
 0x395   :  { %v5323_v2 = vadd.f32 %v9992_v41, %v7203_v23  ;;  %v5317_v5 = vpop.f32.mrb[171].mxu1 }
 0x396   :  { %v5318_v4 = vadd.f32 %v9992_v41, %v5317_v5 }
 0x397   :  { %5888 = vst.msk [vmem:[%s10766_s7 + $0x558] sm:$0xff] %vm5716_vm0, %v5323_v2 }
 0x398   :  { %5887 = vst.msk [vmem:[%s10766_s7 + $0x550] sm:$0xff] %vm5716_vm0, %v5318_v4  ;;  %v7206_v34 = vpop.f32.mrb[172].mxu1 }
 0x399   :  { %v5333_v15 = vadd.f32 %v9992_v41, %v7206_v34  ;;  %v5327_v6 = vpop.f32.mrb[173].mxu1 }
 0x39a   :  { %v5328_v25 = vadd.f32 %v9992_v41, %v5327_v6 }
 0x39b   :  { %5890 = vst.msk [vmem:[%s10766_s7 + $0x568] sm:$0xff] %vm5716_vm0, %v5333_v15 }
 0x39c   :  { %5889 = vst.msk [vmem:[%s10766_s7 + $0x560] sm:$0xff] %vm5716_vm0, %v5328_v25  ;;  %v7209_v7 = vpop.f32.mrb[174].mxu1 }
 0x39d   :  { %v5343_v9 = vadd.f32 %v9992_v41, %v7209_v7  ;;  %v5337_v35 = vpop.f32.mrb[175].mxu1 }
 0x39e   :  { %v5338_v10 = vadd.f32 %v9992_v41, %v5337_v35 }
 0x39f   :  { %5892 = vst.msk [vmem:[%s10766_s7 + $0x578] sm:$0xff] %vm5716_vm0, %v5343_v9 }
 0x3a0   :  { %5891 = vst.msk [vmem:[%s10766_s7 + $0x570] sm:$0xff] %vm5716_vm0, %v5338_v10  ;;  %v7212_v8 = vpop.f32.mrb[176].mxu1 }
 0x3a1   :  { %v5353_v11 = vadd.f32 %v9992_v41, %v7212_v8  ;;  %v5347_v12 = vpop.f32.mrb[177].mxu1 }
 0x3a2   :  { %v5348_v59 = vadd.f32 %v9992_v41, %v5347_v12 }
 0x3a3   :  { %5894 = vst.msk [vmem:[%s10766_s7 + $0x588] sm:$0xff] %vm5716_vm0, %v5353_v11 }
 0x3a4   :  { %5893 = vst.msk [vmem:[%s10766_s7 + $0x580] sm:$0xff] %vm5716_vm0, %v5348_v59  ;;  %v7215_v13 = vpop.f32.mrb[178].mxu1 }
 0x3a5   :  { %v5363_v57 = vadd.f32 %v9992_v41, %v7215_v13  ;;  %v5357_v17 = vpop.f32.mrb[179].mxu1 }
 0x3a6   :  { %v5358_v19 = vadd.f32 %v9992_v41, %v5357_v17 }
 0x3a7   :  { %5896 = vst.msk [vmem:[%s10766_s7 + $0x598] sm:$0xff] %vm5716_vm0, %v5363_v57 }
 0x3a8   :  { %5895 = vst.msk [vmem:[%s10766_s7 + $0x590] sm:$0xff] %vm5716_vm0, %v5358_v19  ;;  %v7218_v18 = vpop.f32.mrb[180].mxu1 }
 0x3a9   :  { %v5373_v20 = vadd.f32 %v9992_v41, %v7218_v18  ;;  %v5367_v21 = vpop.f32.mrb[181].mxu1 }
 0x3aa   :  { %v5368_v22 = vadd.f32 %v9992_v41, %v5367_v21 }
 0x3ab   :  { %5898 = vst.msk [vmem:[%s10766_s7 + $0x5a8] sm:$0xff] %vm5716_vm0, %v5373_v20 }
 0x3ac   :  { %5897 = vst.msk [vmem:[%s10766_s7 + $0x5a0] sm:$0xff] %vm5716_vm0, %v5368_v22  ;;  %v7221_v24 = vpop.f32.mrb[182].mxu1 }
 0x3ad   :  { %v5383_v26 = vadd.f32 %v9992_v41, %v7221_v24  ;;  %v5377_v63 = vpop.f32.mrb[183].mxu1 }
 0x3ae   :  { %v5378_v49 = vadd.f32 %v9992_v41, %v5377_v63 }
 0x3af   :  { %5900 = vst.msk [vmem:[%s10766_s7 + $0x5b8] sm:$0xff] %vm5716_vm0, %v5383_v26 }
 0x3b0   :  { %5899 = vst.msk [vmem:[%s10766_s7 + $0x5b0] sm:$0xff] %vm5716_vm0, %v5378_v49  ;;  %v7224_v29 = vpop.f32.mrb[184].mxu1 }
 0x3b1   :  { %v5393_v30 = vadd.f32 %v9992_v41, %v7224_v29  ;;  %v5387_v55 = vpop.f32.mrb[185].mxu1  ;;  %v10578_v29 = vld [vmem:[%s10765_s6] ss:$0 sm:$0xff] }
 0x3b2   :  { %v5388_v31 = vadd.f32 %v9992_v41, %v5387_v55 }
 0x3b3   :  { %5902 = vst.msk [vmem:[%s10766_s7 + $0x5c8] sm:$0xff] %vm5716_vm0, %v5393_v30 }
 0x3b4   :  { %5901 = vst.msk [vmem:[%s10766_s7 + $0x5c0] sm:$0xff] %vm5716_vm0, %v5388_v31  ;;  %v7227_v16 = vpop.f32.mrb[186].mxu1 }
 0x3b5   :  { %v5403_v32 = vadd.f32 %v9992_v41, %v7227_v16  ;;  %v5397_v33 = vpop.f32.mrb[187].mxu1 }
 0x3b6   :  { %v5398_v36 = vadd.f32 %v9992_v41, %v5397_v33 }
 0x3b7   :  { %5904 = vst.msk [vmem:[%s10766_s7 + $0x5d8] sm:$0xff] %vm5716_vm0, %v5403_v32 }
 0x3b8   :  { %5903 = vst.msk [vmem:[%s10766_s7 + $0x5d0] sm:$0xff] %vm5716_vm0, %v5398_v36  ;;  %v7230_v37 = vpop.f32.mrb[188].mxu1 }
 0x3b9   :  { %v5413_v14 = vadd.f32 %v9992_v41, %v7230_v37  ;;  %v5407_v39 = vpop.f32.mrb[189].mxu1 }
 0x3ba   :  { %v5408_v40 = vadd.f32 %v9992_v41, %v5407_v39 }
 0x3bb   :  { %5906 = vst.msk [vmem:[%s10766_s7 + $0x5e8] sm:$0xff] %vm5716_vm0, %v5413_v14 }
 0x3bc   :  { %5905 = vst.msk [vmem:[%s10766_s7 + $0x5e0] sm:$0xff] %vm5716_vm0, %v5408_v40  ;;  %v7233_v28 = vpop.f32.mrb[190].mxu1 }
 0x3bd   :  { %v5423_v43 = vadd.f32 %v9992_v41, %v7233_v28  ;;  %v5417_v27 = vpop.f32.mrb[191].mxu1 }
 0x3be   :  { %v5418_v38 = vadd.f32 %v9992_v41, %v5417_v27 }
 0x3bf   :  { %5908 = vst.msk [vmem:[%s10766_s7 + $0x5f8] sm:$0xff] %vm5716_vm0, %v5423_v43 }
 0x3c0   :  { %5907 = vst.msk [vmem:[%s10766_s7 + $0x5f0] sm:$0xff] %vm5716_vm0, %v5418_v38  ;;  %v7236_v45 = vpop.f32.mrb[192].mxu1 }
 0x3c1   :  { %v5433_v47 = vadd.f32 %v9992_v41, %v7236_v45  ;;  %v5427_v46 = vpop.f32.mrb[193].mxu1 }
 0x3c2   :  { %v5428_v3 = vadd.f32 %v9992_v41, %v5427_v46 }
 0x3c3   :  { %5910 = vst.msk [vmem:[%s10766_s7 + $0x608] sm:$0xff] %vm5716_vm0, %v5433_v47 }
 0x3c4   :  { %5909 = vst.msk [vmem:[%s10766_s7 + $0x600] sm:$0xff] %vm5716_vm0, %v5428_v3  ;;  %v7239_v48 = vpop.f32.mrb[194].mxu1 }
 0x3c5   :  { %v5443_v50 = vadd.f32 %v9992_v41, %v7239_v48  ;;  %v5437_v51 = vpop.f32.mrb[195].mxu1 }
 0x3c6   :  { %v5438_v52 = vadd.f32 %v9992_v41, %v5437_v51 }
 0x3c7   :  { %5912 = vst.msk [vmem:[%s10766_s7 + $0x618] sm:$0xff] %vm5716_vm0, %v5443_v50 }
 0x3c8   :  { %5911 = vst.msk [vmem:[%s10766_s7 + $0x610] sm:$0xff] %vm5716_vm0, %v5438_v52  ;;  %v7242_v53 = vpop.f32.mrb[196].mxu1 }
 0x3c9   :  { %v5453_v54 = vadd.f32 %v9992_v41, %v7242_v53  ;;  %v5447_v56 = vpop.f32.mrb[197].mxu1 }
 0x3ca   :  { %v5448_v58 = vadd.f32 %v9992_v41, %v5447_v56 }
 0x3cb   :  { %5914 = vst.msk [vmem:[%s10766_s7 + $0x628] sm:$0xff] %vm5716_vm0, %v5453_v54 }
 0x3cc   :  { %5913 = vst.msk [vmem:[%s10766_s7 + $0x620] sm:$0xff] %vm5716_vm0, %v5448_v58  ;;  %v7245_v42 = vpop.f32.mrb[198].mxu1 }
 0x3cd   :  { %v5463_v44 = vadd.f32 %v9992_v41, %v7245_v42  ;;  %v5457_v60 = vpop.f32.mrb[199].mxu1 }
 0x3ce   :  { %v5458_v62 = vadd.f32 %v9992_v41, %v5457_v60 }
 0x3cf   :  { %5916 = vst.msk [vmem:[%s10766_s7 + $0x638] sm:$0xff] %vm5716_vm0, %v5463_v44 }
 0x3d0   :  { %5915 = vst.msk [vmem:[%s10766_s7 + $0x630] sm:$0xff] %vm5716_vm0, %v5458_v62  ;;  %v7248_v61 = vpop.f32.mrb[200].mxu1 }
 0x3d1   :  { %v5473_v1 = vadd.f32 %v9992_v41, %v7248_v61  ;;  %v5467_v0 = vpop.f32.mrb[201].mxu1 }
 0x3d2   :  { %v5468_v23 = vadd.f32 %v9992_v41, %v5467_v0 }
 0x3d3   :  { %5918 = vst.msk [vmem:[%s10766_s7 + $0x648] sm:$0xff] %vm5716_vm0, %v5473_v1 }
 0x3d4   :  { %5917 = vst.msk [vmem:[%s10766_s7 + $0x640] sm:$0xff] %vm5716_vm0, %v5468_v23  ;;  %v7251_v2 = vpop.f32.mrb[202].mxu1 }
 0x3d5   :  { %v5483_v5 = vadd.f32 %v9992_v41, %v7251_v2  ;;  %v5477_v4 = vpop.f32.mrb[203].mxu1 }
 0x3d6   :  { %v5478_v34 = vadd.f32 %v9992_v41, %v5477_v4 }
 0x3d7   :  { %5920 = vst.msk [vmem:[%s10766_s7 + $0x658] sm:$0xff] %vm5716_vm0, %v5483_v5 }
 0x3d8   :  { %5919 = vst.msk [vmem:[%s10766_s7 + $0x650] sm:$0xff] %vm5716_vm0, %v5478_v34  ;;  %v7254_v15 = vpop.f32.mrb[204].mxu1 }
 0x3d9   :  { %v5493_v6 = vadd.f32 %v9992_v41, %v7254_v15  ;;  %v5487_v25 = vpop.f32.mrb[205].mxu1 }
 0x3da   :  { %v5488_v7 = vadd.f32 %v9992_v41, %v5487_v25 }
 0x3db   :  { %5922 = vst.msk [vmem:[%s10766_s7 + $0x668] sm:$0xff] %vm5716_vm0, %v5493_v6 }
 0x3dc   :  { %5921 = vst.msk [vmem:[%s10766_s7 + $0x660] sm:$0xff] %vm5716_vm0, %v5488_v7  ;;  %v7257_v9 = vpop.f32.mrb[206].mxu1 }
 0x3dd   :  { %v5503_v35 = vadd.f32 %v9992_v41, %v7257_v9  ;;  %v5497_v10 = vpop.f32.mrb[207].mxu1 }
 0x3de   :  { %v5498_v8 = vadd.f32 %v9992_v41, %v5497_v10 }
 0x3df   :  { %5924 = vst.msk [vmem:[%s10766_s7 + $0x678] sm:$0xff] %vm5716_vm0, %v5503_v35 }
 0x3e0   :  { %5923 = vst.msk [vmem:[%s10766_s7 + $0x670] sm:$0xff] %vm5716_vm0, %v5498_v8  ;;  %v7260_v11 = vpop.f32.mrb[208].mxu1 }
 0x3e1   :  { %v5513_v12 = vadd.f32 %v9992_v41, %v7260_v11  ;;  %v5507_v59 = vpop.f32.mrb[209].mxu1 }
 0x3e2   :  { %v5508_v13 = vadd.f32 %v9992_v41, %v5507_v59 }
 0x3e3   :  { %5926 = vst.msk [vmem:[%s10766_s7 + $0x688] sm:$0xff] %vm5716_vm0, %v5513_v12 }
 0x3e4   :  { %5925 = vst.msk [vmem:[%s10766_s7 + $0x680] sm:$0xff] %vm5716_vm0, %v5508_v13  ;;  %v7263_v57 = vpop.f32.mrb[210].mxu1 }
 0x3e5   :  { %v5523_v17 = vadd.f32 %v9992_v41, %v7263_v57  ;;  %v5517_v19 = vpop.f32.mrb[211].mxu1 }
 0x3e6   :  { %v5518_v18 = vadd.f32 %v9992_v41, %v5517_v19 }
 0x3e7   :  { %5928 = vst.msk [vmem:[%s10766_s7 + $0x698] sm:$0xff] %vm5716_vm0, %v5523_v17 }
 0x3e8   :  { %5927 = vst.msk [vmem:[%s10766_s7 + $0x690] sm:$0xff] %vm5716_vm0, %v5518_v18  ;;  %v7266_v20 = vpop.f32.mrb[212].mxu1 }
 0x3e9   :  { %v5533_v21 = vadd.f32 %v9992_v41, %v7266_v20  ;;  %v5527_v22 = vpop.f32.mrb[213].mxu1 }
 0x3ea   :  { %v5528_v24 = vadd.f32 %v9992_v41, %v5527_v22 }
 0x3eb   :  { %5930 = vst.msk [vmem:[%s10766_s7 + $0x6a8] sm:$0xff] %vm5716_vm0, %v5533_v21 }
 0x3ec   :  { %5929 = vst.msk [vmem:[%s10766_s7 + $0x6a0] sm:$0xff] %vm5716_vm0, %v5528_v24  ;;  %v7269_v26 = vpop.f32.mrb[214].mxu1 }
 0x3ed   :  { %v5543_v63 = vadd.f32 %v9992_v41, %v7269_v26  ;;  %v5537_v49 = vpop.f32.mrb[215].mxu1 }
 0x3ee   :  { %v5538_v30 = vadd.f32 %v10578_v29, %v5537_v49 }
 0x3ef   :  { %5932 = vst.msk [vmem:[%s10766_s7 + $0x6b8] sm:$0xff] %vm5716_vm0, %v5543_v63 }
 0x3f0   :  { %5931 = vst.msk [vmem:[%s10766_s7 + $0x6b0] sm:$0xff] %vm5716_vm0, %v5538_v30  ;;  %v7272_v55 = vpop.f32.mrb[216].mxu1 }
 0x3f1   :  { %v5553_v41 = vadd.f32 %v10578_v29, %v7272_v55  ;;  %v5547_v31 = vpop.f32.mrb[217].mxu1 }
 0x3f2   :  { %v5548_v16 = vadd.f32 %v10578_v29, %v5547_v31 }
 0x3f3   :  { %5934 = vst.msk [vmem:[%s10766_s7 + $0x6c8] sm:$0xff] %vm5716_vm0, %v5553_v41 }
 0x3f4   :  { %5933 = vst.msk [vmem:[%s10766_s7 + $0x6c0] sm:$0xff] %vm5716_vm0, %v5548_v16  ;;  %v7275_v32 = vpop.f32.mrb[218].mxu1 }
 0x3f5   :  { %v5563_v33 = vadd.f32 %v10578_v29, %v7275_v32  ;;  %v5557_v36 = vpop.f32.mrb[219].mxu1 }
 0x3f6   :  { %v5558_v37 = vadd.f32 %v10578_v29, %v5557_v36 }
 0x3f7   :  { %5936 = vst.msk [vmem:[%s10766_s7 + $0x6d8] sm:$0xff] %vm5716_vm0, %v5563_v33 }
 0x3f8   :  { %5935 = vst.msk [vmem:[%s10766_s7 + $0x6d0] sm:$0xff] %vm5716_vm0, %v5558_v37  ;;  %v7278_v14 = vpop.f32.mrb[220].mxu1 }
 0x3f9   :  { %v5573_v39 = vadd.f32 %v10578_v29, %v7278_v14  ;;  %v5567_v40 = vpop.f32.mrb[221].mxu1 }
 0x3fa   :  { %v5568_v28 = vadd.f32 %v10578_v29, %v5567_v40 }
 0x3fb   :  { %5938 = vst.msk [vmem:[%s10766_s7 + $0x6e8] sm:$0xff] %vm5716_vm0, %v5573_v39 }
 0x3fc   :  { %5937 = vst.msk [vmem:[%s10766_s7 + $0x6e0] sm:$0xff] %vm5716_vm0, %v5568_v28  ;;  %v7281_v43 = vpop.f32.mrb[222].mxu1 }
 0x3fd   :  { %v5583_v27 = vadd.f32 %v10578_v29, %v7281_v43  ;;  %v5577_v38 = vpop.f32.mrb[223].mxu1 }
 0x3fe   :  { %v5578_v45 = vadd.f32 %v10578_v29, %v5577_v38 }
 0x3ff   :  { %5940 = vst.msk [vmem:[%s10766_s7 + $0x6f8] sm:$0xff] %vm5716_vm0, %v5583_v27 }
 0x400   :  { %5939 = vst.msk [vmem:[%s10766_s7 + $0x6f0] sm:$0xff] %vm5716_vm0, %v5578_v45  ;;  %v7284_v47 = vpop.f32.mrb[224].mxu1 }
 0x401   :  { %v5593_v46 = vadd.f32 %v10578_v29, %v7284_v47  ;;  %v5587_v3 = vpop.f32.mrb[225].mxu1 }
 0x402   :  { %v5588_v48 = vadd.f32 %v10578_v29, %v5587_v3 }
 0x403   :  { %5942 = vst.msk [vmem:[%s10766_s7 + $0x708] sm:$0xff] %vm5716_vm0, %v5593_v46 }
 0x404   :  { %5941 = vst.msk [vmem:[%s10766_s7 + $0x700] sm:$0xff] %vm5716_vm0, %v5588_v48  ;;  %v7287_v50 = vpop.f32.mrb[226].mxu1 }
 0x405   :  { %v5603_v51 = vadd.f32 %v10578_v29, %v7287_v50  ;;  %v5597_v52 = vpop.f32.mrb[227].mxu1 }
 0x406   :  { %v5598_v53 = vadd.f32 %v10578_v29, %v5597_v52 }
 0x407   :  { %5944 = vst.msk [vmem:[%s10766_s7 + $0x718] sm:$0xff] %vm5716_vm0, %v5603_v51 }
 0x408   :  { %5943 = vst.msk [vmem:[%s10766_s7 + $0x710] sm:$0xff] %vm5716_vm0, %v5598_v53  ;;  %v7290_v54 = vpop.f32.mrb[228].mxu1 }
 0x409   :  { %v5613_v56 = vadd.f32 %v10578_v29, %v7290_v54  ;;  %v5607_v58 = vpop.f32.mrb[229].mxu1 }
 0x40a   :  { %v5608_v42 = vadd.f32 %v10578_v29, %v5607_v58 }
 0x40b   :  { %5946 = vst.msk [vmem:[%s10766_s7 + $0x728] sm:$0xff] %vm5716_vm0, %v5613_v56 }
 0x40c   :  { %5945 = vst.msk [vmem:[%s10766_s7 + $0x720] sm:$0xff] %vm5716_vm0, %v5608_v42  ;;  %v7293_v44 = vpop.f32.mrb[230].mxu1 }
 0x40d   :  { %v5623_v60 = vadd.f32 %v10578_v29, %v7293_v44  ;;  %v5617_v62 = vpop.f32.mrb[231].mxu1 }
 0x40e   :  { %v5618_v61 = vadd.f32 %v10578_v29, %v5617_v62 }
 0x40f   :  { %5948 = vst.msk [vmem:[%s10766_s7 + $0x738] sm:$0xff] %vm5716_vm0, %v5623_v60 }
 0x410   :  { %5947 = vst.msk [vmem:[%s10766_s7 + $0x730] sm:$0xff] %vm5716_vm0, %v5618_v61  ;;  %v7296_v1 = vpop.f32.mrb[232].mxu1 }
 0x411   :  { %v5633_v0 = vadd.f32 %v10578_v29, %v7296_v1  ;;  %v5627_v23 = vpop.f32.mrb[233].mxu1 }
 0x412   :  { %v5628_v2 = vadd.f32 %v10578_v29, %v5627_v23 }
 0x413   :  { %5950 = vst.msk [vmem:[%s10766_s7 + $0x748] sm:$0xff] %vm5716_vm0, %v5633_v0 }
 0x414   :  { %5949 = vst.msk [vmem:[%s10766_s7 + $0x740] sm:$0xff] %vm5716_vm0, %v5628_v2  ;;  %v7299_v5 = vpop.f32.mrb[234].mxu1 }
 0x415   :  { %v5643_v4 = vadd.f32 %v10578_v29, %v7299_v5  ;;  %v5637_v34 = vpop.f32.mrb[235].mxu1 }
 0x416   :  { %v5638_v15 = vadd.f32 %v10578_v29, %v5637_v34 }
 0x417   :  { %5952 = vst.msk [vmem:[%s10766_s7 + $0x758] sm:$0xff] %vm5716_vm0, %v5643_v4 }
 0x418   :  { %5951 = vst.msk [vmem:[%s10766_s7 + $0x750] sm:$0xff] %vm5716_vm0, %v5638_v15  ;;  %v7302_v6 = vpop.f32.mrb[236].mxu1 }
 0x419   :  { %v5653_v25 = vadd.f32 %v10578_v29, %v7302_v6  ;;  %v5647_v7 = vpop.f32.mrb[237].mxu1 }
 0x41a   :  { %v5648_v9 = vadd.f32 %v10578_v29, %v5647_v7 }
 0x41b   :  { %5954 = vst.msk [vmem:[%s10766_s7 + $0x768] sm:$0xff] %vm5716_vm0, %v5653_v25 }
 0x41c   :  { %5953 = vst.msk [vmem:[%s10766_s7 + $0x760] sm:$0xff] %vm5716_vm0, %v5648_v9  ;;  %v7305_v35 = vpop.f32.mrb[238].mxu1 }
 0x41d   :  { %v5663_v10 = vadd.f32 %v10578_v29, %v7305_v35  ;;  %v5657_v8 = vpop.f32.mrb[239].mxu1 }
 0x41e   :  { %v5658_v11 = vadd.f32 %v10578_v29, %v5657_v8 }
 0x41f   :  { %5956 = vst.msk [vmem:[%s10766_s7 + $0x778] sm:$0xff] %vm5716_vm0, %v5663_v10 }
 0x420   :  { %5955 = vst.msk [vmem:[%s10766_s7 + $0x770] sm:$0xff] %vm5716_vm0, %v5658_v11  ;;  %v7308_v12 = vpop.f32.mrb[240].mxu1 }
 0x421   :  { %v5673_v59 = vadd.f32 %v10578_v29, %v7308_v12  ;;  %v5667_v13 = vpop.f32.mrb[241].mxu1 }
 0x422   :  { %v5668_v57 = vadd.f32 %v10578_v29, %v5667_v13 }
 0x423   :  { %5958 = vst.msk [vmem:[%s10766_s7 + $0x788] sm:$0xff] %vm5716_vm0, %v5673_v59 }
 0x424   :  { %5957 = vst.msk [vmem:[%s10766_s7 + $0x780] sm:$0xff] %vm5716_vm0, %v5668_v57  ;;  %v7311_v17 = vpop.f32.mrb[242].mxu1 }
 0x425   :  { %v5683_v19 = vadd.f32 %v10578_v29, %v7311_v17  ;;  %v5677_v18 = vpop.f32.mrb[243].mxu1 }
 0x426   :  { %v5678_v20 = vadd.f32 %v10578_v29, %v5677_v18 }
 0x427   :  { %5960 = vst.msk [vmem:[%s10766_s7 + $0x798] sm:$0xff] %vm5716_vm0, %v5683_v19 }
 0x428   :  { %5959 = vst.msk [vmem:[%s10766_s7 + $0x790] sm:$0xff] %vm5716_vm0, %v5678_v20  ;;  %v7314_v21 = vpop.f32.mrb[244].mxu1 }
 0x429   :  { %v5693_v22 = vadd.f32 %v10578_v29, %v7314_v21  ;;  %v5687_v24 = vpop.f32.mrb[245].mxu1 }
 0x42a   :  { %v5688_v26 = vadd.f32 %v10578_v29, %v5687_v24 }
 0x42b   :  { %5962 = vst.msk [vmem:[%s10766_s7 + $0x7a8] sm:$0xff] %vm5716_vm0, %v5693_v22 }
 0x42c   :  { %5961 = vst.msk [vmem:[%s10766_s7 + $0x7a0] sm:$0xff] %vm5716_vm0, %v5688_v26  ;;  %v7317_v63 = vpop.f32.mrb[246].mxu1 }
 0x42d   :  { %v5703_v49 = vadd.f32 %v10578_v29, %v7317_v63  ;;  %v5697_v30 = vpop.f32.mrb[247].mxu1 }
 0x42e   :  { %v5698_v55 = vadd.f32 %v10578_v29, %v5697_v30 }
 0x42f   :  { %5964 = vst.msk [vmem:[%s10766_s7 + $0x7b8] sm:$0xff] %vm5716_vm0, %v5703_v49 }
 0x430   :  { %5963 = vst.msk [vmem:[%s10766_s7 + $0x7b0] sm:$0xff] %vm5716_vm0, %v5698_v55  ;;  %v7320_v41 = vpop.f32.mrb[248].mxu1 }
 0x431   :  { %v5713_v31 = vadd.f32 %v10578_v29, %v7320_v41  ;;  %v5707_v16 = vpop.f32.mrb[249].mxu1 }
 0x432   :  { %v5708_v32 = vadd.f32 %v10578_v29, %v5707_v16 }
 0x433   :  { %5966 = vst.msk [vmem:[%s10766_s7 + $0x7c8] sm:$0xff] %vm5716_vm0, %v5713_v31 }
 0x434   :  { %5965 = vst.msk [vmem:[%s10766_s7 + $0x7c0] sm:$0xff] %vm5716_vm0, %v5708_v32 }

</bundles_post_ra>
